<compile_context>
chip_gen: v7x
topology: tpu7x:2x2x1
jax: 0.10.0
libtpu: 0.0.40
codegen_flags: <defaults>
</compile_context>

<pallas_src>
import jax
import jax.numpy as jnp
import numpy as np
from jax.experimental import pallas as pl
from jax.experimental.pallas import tpu as pltpu

BN_EPS = 1e-5


# ----------------------------------------------------------------------------
# Fused Pallas kernel: 3x (LSTM + BN) over time, then FC on the last step.
# ----------------------------------------------------------------------------
def _rnn_stack_kernel(x_ref,
                      w1i_ref, w1h_ref, b1_ref, s1_ref, sh1_ref,
                      w2i_ref, w2h_ref, b2_ref, s2_ref, sh2_ref,
                      w3i_ref, w3h_ref, b3_ref, s3_ref, sh3_ref,
                      fcw_ref, fcb_ref,
                      o_ref):
    """x_ref: (T, B, 3) time-major input.  o_ref: (B, 3) final FC output.

    w{k}i_ref : (Din_k, 4H_k)  input->gates weight (pre-transposed)
    w{k}h_ref : (H_k, 4H_k)    hidden->gates weight (pre-transposed)
    b{k}_ref  : (1, 4H_k)      b_ih + b_hh
    s{k}/sh{k}: (1, H_k)       BatchNorm eval scale / shift
    fcw_ref   : (8, 3), fcb_ref: (1, 3)
    """
    T, B, _ = x_ref.shape

    # Hoist every parameter load out of the time loop (single VMEM read each).
    W1i, W1h, B1 = w1i_ref[...], w1h_ref[...], b1_ref[...]
    S1, SH1 = s1_ref[...], sh1_ref[...]
    W2i, W2h, B2 = w2i_ref[...], w2h_ref[...], b2_ref[...]
    S2, SH2 = s2_ref[...], sh2_ref[...]
    W3i, W3h, B3 = w3i_ref[...], w3h_ref[...], b3_ref[...]
    S3, SH3 = s3_ref[...], sh3_ref[...]

    H1, H2, H3 = W1h.shape[0], W2h.shape[0], W3h.shape[0]

    def lstm_step(x_t, h, c, Wi, Wh, bias):
        Hd = h.shape[-1]
        gates = (jnp.dot(x_t, Wi, preferred_element_type=jnp.float32)
                 + jnp.dot(h, Wh, preferred_element_type=jnp.float32)
                 + bias)                                     # (B, 4H)
        # PyTorch LSTM gate order: i, f, g, o
        i_g = jax.nn.sigmoid(gates[:, 0:Hd])
        f_g = jax.nn.sigmoid(gates[:, Hd:2 * Hd])
        g_g = jnp.tanh(gates[:, 2 * Hd:3 * Hd])
        o_g = jax.nn.sigmoid(gates[:, 3 * Hd:4 * Hd])
        c_new = f_g * c + i_g * g_g
        h_new = o_g * jnp.tanh(c_new)
        return h_new, c_new

    def zeros(h):
        return jnp.zeros((B, h), jnp.float32)

    init = (zeros(H1), zeros(H1), zeros(H2), zeros(H2), zeros(H3), zeros(H3))

    def body(t, carry):
        h1, c1, h2, c2, h3, c3 = carry
        x_t = x_ref[t]                                       # (B, 3)
        # Layer 1 + BN1 (+ dropout identity)
        h1, c1 = lstm_step(x_t, h1, c1, W1i, W1h, B1)
        y1 = h1 * S1 + SH1
        # Layer 2 + BN2
        h2, c2 = lstm_step(y1, h2, c2, W2i, W2h, B2)
        y2 = h2 * S2 + SH2
        # Layer 3 (BN3 applied after the loop on the last hidden state only,
        # since only o[:, -1, :] feeds the FC and BN3 has no cross-time state).
        h3, c3 = lstm_step(y2, h3, c3, W3i, W3h, B3)
        return (h1, c1, h2, c2, h3, c3)

    # Fully unrolled recurrence: gives the scheduler the whole dependency chain
    # so EUP (sigmoid/tanh) latency hides under the next step's VPU/MXU work.
    h1, c1, h2, c2, h3, c3 = jax.lax.fori_loop(0, T, body, init, unroll=True)

    y3 = h3 * S3 + SH3                                       # BN3 on last step
    o_ref[...] = (jnp.dot(y3, fcw_ref[...], preferred_element_type=jnp.float32)
                  + fcb_ref[...])


# ----------------------------------------------------------------------------
# Wrapper
# ----------------------------------------------------------------------------
def rnn_stack_forward(x_btc, params):
    """Full RNNStack forward.  x_btc: (B, T, 3) -> (B, 3)."""
    B, T, C = x_btc.shape
    x_tbc = jnp.transpose(x_btc, (1, 0, 2))                  # time-major (T, B, C)

    flat_inputs = [x_tbc]
    for name in ("l1", "l2", "l3"):
        p = params[name]
        flat_inputs += [p["w_ih_t"], p["w_hh_t"], p["bias"],
                        p["bn_scale"], p["bn_shift"]]
    flat_inputs += [params["fc"]["w_t"], params["fc"]["b"]]

    n_out = params["fc"]["w_t"].shape[1]
    vmem_spec = pl.BlockSpec(memory_space=pltpu.MemorySpace.VMEM)

    return pl.pallas_call(
        _rnn_stack_kernel,
        out_shape=jax.ShapeDtypeStruct((B, n_out), jnp.float32),
        in_specs=[vmem_spec] * len(flat_inputs),
        out_specs=vmem_spec,
    )(*flat_inputs)


# ----------------------------------------------------------------------------
# Deterministic parameter init (shapes from the PyTorch module)
# ----------------------------------------------------------------------------
def init_params(key):
    dims = {"l1": (3, 32), "l2": (32, 16), "l3": (16, 8)}
    params = {}
    keys = jax.random.split(key, 14)
    ki = 0
    for name, (din, h) in dims.items():
        k = 1.0 / np.sqrt(h)
        w_ih = jax.random.uniform(keys[ki], (4 * h, din), jnp.float32, -k, k); ki += 1
        w_hh = jax.random.uniform(keys[ki], (4 * h, h), jnp.float32, -k, k); ki += 1
        b_ih = jax.random.uniform(keys[ki], (4 * h,), jnp.float32, -k, k); ki += 1
        b_hh = jax.random.uniform(keys[ki], (4 * h,), jnp.float32, -k, k); ki += 1
        gamma = jnp.ones((h,), jnp.float32)
        beta = jnp.zeros((h,), jnp.float32)
        run_mean = jnp.zeros((h,), jnp.float32)
        run_var = jnp.ones((h,), jnp.float32)
        scale = gamma / jnp.sqrt(run_var + BN_EPS)
        shift = beta - run_mean * scale
        params[name] = dict(
            w_ih=w_ih, w_hh=w_hh, b_ih=b_ih, b_hh=b_hh,
            w_ih_t=w_ih.T, w_hh_t=w_hh.T,
            bias=(b_ih + b_hh)[None, :],
            bn_scale=scale[None, :], bn_shift=shift[None, :],
        )
    kf = 1.0 / np.sqrt(8.0)
    fc_w = jax.random.uniform(keys[ki], (3, 8), jnp.float32, -kf, kf); ki += 1
    fc_b = jax.random.uniform(keys[ki], (3,), jnp.float32, -kf, kf); ki += 1
    params["fc"] = dict(w=fc_w, b_vec=fc_b, w_t=fc_w.T, b=fc_b[None, :])
    return params


# ----------------------------------------------------------------------------
# Pure-JAX reference (mirrors PyTorch eval-mode forward) for validation
# ----------------------------------------------------------------------------
def _lstm_ref(x, w_ih, w_hh, b_ih, b_hh):
    B, T, _ = x.shape
    H = w_hh.shape[1]
    h = jnp.zeros((B, H), jnp.float32)
    c = jnp.zeros((B, H), jnp.float32)
    outs = []
    for t in range(T):
        g = x[:, t] @ w_ih.T + h @ w_hh.T + b_ih + b_hh
        i = jax.nn.sigmoid(g[:, :H])
        f = jax.nn.sigmoid(g[:, H:2 * H])
        gg = jnp.tanh(g[:, 2 * H:3 * H])
        o = jax.nn.sigmoid(g[:, 3 * H:])
        c = f * c + i * gg
        h = o * jnp.tanh(c)
        outs.append(h)
    return jnp.stack(outs, axis=1)


def rnn_stack_ref(x, params):
    h = x
    for name in ("l1", "l2", "l3"):
        p = params[name]
        h = _lstm_ref(h, p["w_ih"], p["w_hh"], p["b_ih"], p["b_hh"])
        h = h * p["bn_scale"][None] + p["bn_shift"][None]   # BN eval + dropout id
    return h[:, -1, :] @ params["fc"]["w"].T + params["fc"]["b_vec"]


# ----------------------------------------------------------------------------
if __name__ == "__main__":
    key = jax.random.PRNGKey(0)
    k_x, k_p = jax.random.split(key)

    B, T, C = 2, 8, 3                    # (batch, seq, features) as in Table-5
    x = jax.random.normal(k_x, (B, T, C), jnp.float32)
    params = init_params(k_p)

    out = jax.block_until_ready(rnn_stack_forward(x, params))   # (B, 3)
    ref = jax.block_until_ready(rnn_stack_ref(x, params))

    assert out.shape == (B, 3), out.shape
    np.testing.assert_allclose(np.asarray(out), np.asarray(ref),
                               rtol=1e-4, atol=1e-5)
    # TODO(synk): training-mode BatchNorm batch statistics and dropout RNG masks
    # are not implemented (eval-mode semantics only).
    print("KERNEL_OK")
</pallas_src>

<mosaic_0001>
module attributes {stable_mosaic.version = 11 : i64} {
  func.func @_rnn_stack_kernel(%arg0: memref<8x2x3xf32, #tpu.memory_space<vmem>>, %arg1: memref<3x128xf32, #tpu.memory_space<vmem>>, %arg2: memref<32x128xf32, #tpu.memory_space<vmem>>, %arg3: memref<1x128xf32, #tpu.memory_space<vmem>>, %arg4: memref<1x32xf32, #tpu.memory_space<vmem>>, %arg5: memref<1x32xf32, #tpu.memory_space<vmem>>, %arg6: memref<32x64xf32, #tpu.memory_space<vmem>>, %arg7: memref<16x64xf32, #tpu.memory_space<vmem>>, %arg8: memref<1x64xf32, #tpu.memory_space<vmem>>, %arg9: memref<1x16xf32, #tpu.memory_space<vmem>>, %arg10: memref<1x16xf32, #tpu.memory_space<vmem>>, %arg11: memref<16x32xf32, #tpu.memory_space<vmem>>, %arg12: memref<8x32xf32, #tpu.memory_space<vmem>>, %arg13: memref<1x32xf32, #tpu.memory_space<vmem>>, %arg14: memref<1x8xf32, #tpu.memory_space<vmem>>, %arg15: memref<1x8xf32, #tpu.memory_space<vmem>>, %arg16: memref<8x3xf32, #tpu.memory_space<vmem>>, %arg17: memref<1x3xf32, #tpu.memory_space<vmem>>, %arg18: memref<2x3xf32, #tpu.memory_space<vmem>>) attributes {dimension_semantics = [], scalar_prefetch = 0 : i64, scratch_operands = 0 : i64, tpu.core_type = #tpu.core_type<tc>} {
    %c0 = arith.constant 0 : index
    %c0_0 = arith.constant 0 : index
    %0 = vector.load %arg1[%c0, %c0_0] : memref<3x128xf32, #tpu.memory_space<vmem>>, vector<3x128xf32>
    %c0_1 = arith.constant 0 : index
    %c0_2 = arith.constant 0 : index
    %1 = vector.load %arg2[%c0_1, %c0_2] : memref<32x128xf32, #tpu.memory_space<vmem>>, vector<32x128xf32>
    %c0_3 = arith.constant 0 : index
    %c0_4 = arith.constant 0 : index
    %2 = vector.load %arg3[%c0_3, %c0_4] : memref<1x128xf32, #tpu.memory_space<vmem>>, vector<1x128xf32>
    %c0_5 = arith.constant 0 : index
    %c0_6 = arith.constant 0 : index
    %3 = vector.load %arg4[%c0_5, %c0_6] : memref<1x32xf32, #tpu.memory_space<vmem>>, vector<1x32xf32>
    %c0_7 = arith.constant 0 : index
    %c0_8 = arith.constant 0 : index
    %4 = vector.load %arg5[%c0_7, %c0_8] : memref<1x32xf32, #tpu.memory_space<vmem>>, vector<1x32xf32>
    %c0_9 = arith.constant 0 : index
    %c0_10 = arith.constant 0 : index
    %5 = vector.load %arg6[%c0_9, %c0_10] : memref<32x64xf32, #tpu.memory_space<vmem>>, vector<32x64xf32>
    %c0_11 = arith.constant 0 : index
    %c0_12 = arith.constant 0 : index
    %6 = vector.load %arg7[%c0_11, %c0_12] : memref<16x64xf32, #tpu.memory_space<vmem>>, vector<16x64xf32>
    %c0_13 = arith.constant 0 : index
    %c0_14 = arith.constant 0 : index
    %7 = vector.load %arg8[%c0_13, %c0_14] : memref<1x64xf32, #tpu.memory_space<vmem>>, vector<1x64xf32>
    %c0_15 = arith.constant 0 : index
    %c0_16 = arith.constant 0 : index
    %8 = vector.load %arg9[%c0_15, %c0_16] : memref<1x16xf32, #tpu.memory_space<vmem>>, vector<1x16xf32>
    %c0_17 = arith.constant 0 : index
    %c0_18 = arith.constant 0 : index
    %9 = vector.load %arg10[%c0_17, %c0_18] : memref<1x16xf32, #tpu.memory_space<vmem>>, vector<1x16xf32>
    %c0_19 = arith.constant 0 : index
    %c0_20 = arith.constant 0 : index
    %10 = vector.load %arg11[%c0_19, %c0_20] : memref<16x32xf32, #tpu.memory_space<vmem>>, vector<16x32xf32>
    %c0_21 = arith.constant 0 : index
    %c0_22 = arith.constant 0 : index
    %11 = vector.load %arg12[%c0_21, %c0_22] : memref<8x32xf32, #tpu.memory_space<vmem>>, vector<8x32xf32>
    %c0_23 = arith.constant 0 : index
    %c0_24 = arith.constant 0 : index
    %12 = vector.load %arg13[%c0_23, %c0_24] : memref<1x32xf32, #tpu.memory_space<vmem>>, vector<1x32xf32>
    %c0_25 = arith.constant 0 : index
    %c0_26 = arith.constant 0 : index
    %13 = vector.load %arg14[%c0_25, %c0_26] : memref<1x8xf32, #tpu.memory_space<vmem>>, vector<1x8xf32>
    %c0_27 = arith.constant 0 : index
    %c0_28 = arith.constant 0 : index
    %14 = vector.load %arg15[%c0_27, %c0_28] : memref<1x8xf32, #tpu.memory_space<vmem>>, vector<1x8xf32>
    %cst = arith.constant 0.000000e+00 : f32
    %15 = vector.broadcast %cst : f32 to vector<2x32xf32>
    %cst_29 = arith.constant 0.000000e+00 : f32
    %16 = vector.broadcast %cst_29 : f32 to vector<2x32xf32>
    %cst_30 = arith.constant 0.000000e+00 : f32
    %17 = vector.broadcast %cst_30 : f32 to vector<2x16xf32>
    %cst_31 = arith.constant 0.000000e+00 : f32
    %18 = vector.broadcast %cst_31 : f32 to vector<2x16xf32>
    %cst_32 = arith.constant 0.000000e+00 : f32
    %19 = vector.broadcast %cst_32 : f32 to vector<2x8xf32>
    %cst_33 = arith.constant 0.000000e+00 : f32
    %20 = vector.broadcast %cst_33 : f32 to vector<2x8xf32>
    %c0_i32 = arith.constant 0 : i32
    %21 = arith.index_cast %c0_i32 : i32 to index
    %c0_34 = arith.constant 0 : index
    %c0_35 = arith.constant 0 : index
    %22 = vector.load %arg0[%21, %c0_34, %c0_35] : memref<8x2x3xf32, #tpu.memory_space<vmem>>, vector<1x2x3xf32>
    %23 = vector.shape_cast %22 : vector<1x2x3xf32> to vector<2x3xf32>
    %cst_36 = arith.constant dense<0.000000e+00> : vector<2x128xf32>
    %24 = tpu.matmul %23, %0, %cst_36 {dimension_numbers = #tpu.dot_dimension_numbers<[1], [0], [0], [1], [0, 0, 1, 1], [], []>} : vector<2x3xf32>, vector<3x128xf32>, vector<2x128xf32> -> vector<2x128xf32>
    %cst_37 = arith.constant dense<0.000000e+00> : vector<2x128xf32>
    %25 = tpu.matmul %15, %1, %cst_37 {dimension_numbers = #tpu.dot_dimension_numbers<[1], [0], [0], [1], [0, 0, 1, 1], [], []>} : vector<2x32xf32>, vector<32x128xf32>, vector<2x128xf32> -> vector<2x128xf32>
    %26 = arith.addf %24, %25 : vector<2x128xf32>
    %27 = vector.broadcast %2 : vector<1x128xf32> to vector<2x128xf32>
    %28 = arith.addf %26, %27 : vector<2x128xf32>
    %29 = vector.extract_strided_slice %28 {offsets = [0, 0], sizes = [2, 32], strides = [1, 1]} : vector<2x128xf32> to vector<2x32xf32>
    %30 = arith.negf %29 : vector<2x32xf32>
    %31 = math.exp %30 : vector<2x32xf32>
    %cst_38 = arith.constant 1.000000e+00 : f32
    %32 = vector.broadcast %cst_38 : f32 to vector<2x32xf32>
    %33 = arith.addf %32, %31 : vector<2x32xf32>
    %34 = arith.divf %32, %33 : vector<2x32xf32>
    %35 = vector.extract_strided_slice %28 {offsets = [0, 32], sizes = [2, 32], strides = [1, 1]} : vector<2x128xf32> to vector<2x32xf32>
    %36 = arith.negf %35 : vector<2x32xf32>
    %37 = math.exp %36 : vector<2x32xf32>
    %cst_39 = arith.constant 1.000000e+00 : f32
    %38 = vector.broadcast %cst_39 : f32 to vector<2x32xf32>
    %39 = arith.addf %38, %37 : vector<2x32xf32>
    %40 = arith.divf %38, %39 : vector<2x32xf32>
    %41 = vector.extract_strided_slice %28 {offsets = [0, 64], sizes = [2, 32], strides = [1, 1]} : vector<2x128xf32> to vector<2x32xf32>
    %42 = math.tanh %41 : vector<2x32xf32>
    %43 = vector.extract_strided_slice %28 {offsets = [0, 96], sizes = [2, 32], strides = [1, 1]} : vector<2x128xf32> to vector<2x32xf32>
    %44 = arith.negf %43 : vector<2x32xf32>
    %45 = math.exp %44 : vector<2x32xf32>
    %cst_40 = arith.constant 1.000000e+00 : f32
    %46 = vector.broadcast %cst_40 : f32 to vector<2x32xf32>
    %47 = arith.addf %46, %45 : vector<2x32xf32>
    %48 = arith.divf %46, %47 : vector<2x32xf32>
    %49 = arith.mulf %40, %16 : vector<2x32xf32>
    %50 = arith.mulf %34, %42 : vector<2x32xf32>
    %51 = arith.addf %49, %50 : vector<2x32xf32>
    %52 = math.tanh %51 : vector<2x32xf32>
    %53 = arith.mulf %48, %52 : vector<2x32xf32>
    %54 = vector.broadcast %3 : vector<1x32xf32> to vector<2x32xf32>
    %55 = arith.mulf %53, %54 : vector<2x32xf32>
    %56 = vector.broadcast %4 : vector<1x32xf32> to vector<2x32xf32>
    %57 = arith.addf %55, %56 : vector<2x32xf32>
    %cst_41 = arith.constant dense<0.000000e+00> : vector<2x64xf32>
    %58 = tpu.matmul %57, %5, %cst_41 {dimension_numbers = #tpu.dot_dimension_numbers<[1], [0], [0], [1], [0, 0, 1, 1], [], []>} : vector<2x32xf32>, vector<32x64xf32>, vector<2x64xf32> -> vector<2x64xf32>
    %cst_42 = arith.constant dense<0.000000e+00> : vector<2x64xf32>
    %59 = tpu.matmul %17, %6, %cst_42 {dimension_numbers = #tpu.dot_dimension_numbers<[1], [0], [0], [1], [0, 0, 1, 1], [], []>} : vector<2x16xf32>, vector<16x64xf32>, vector<2x64xf32> -> vector<2x64xf32>
    %60 = arith.addf %58, %59 : vector<2x64xf32>
    %61 = vector.broadcast %7 : vector<1x64xf32> to vector<2x64xf32>
    %62 = arith.addf %60, %61 : vector<2x64xf32>
    %63 = vector.extract_strided_slice %62 {offsets = [0, 0], sizes = [2, 16], strides = [1, 1]} : vector<2x64xf32> to vector<2x16xf32>
    %64 = arith.negf %63 : vector<2x16xf32>
    %65 = math.exp %64 : vector<2x16xf32>
    %cst_43 = arith.constant 1.000000e+00 : f32
    %66 = vector.broadcast %cst_43 : f32 to vector<2x16xf32>
    %67 = arith.addf %66, %65 : vector<2x16xf32>
    %68 = arith.divf %66, %67 : vector<2x16xf32>
    %69 = vector.extract_strided_slice %62 {offsets = [0, 16], sizes = [2, 16], strides = [1, 1]} : vector<2x64xf32> to vector<2x16xf32>
    %70 = arith.negf %69 : vector<2x16xf32>
    %71 = math.exp %70 : vector<2x16xf32>
    %cst_44 = arith.constant 1.000000e+00 : f32
    %72 = vector.broadcast %cst_44 : f32 to vector<2x16xf32>
    %73 = arith.addf %72, %71 : vector<2x16xf32>
    %74 = arith.divf %72, %73 : vector<2x16xf32>
    %75 = vector.extract_strided_slice %62 {offsets = [0, 32], sizes = [2, 16], strides = [1, 1]} : vector<2x64xf32> to vector<2x16xf32>
    %76 = math.tanh %75 : vector<2x16xf32>
    %77 = vector.extract_strided_slice %62 {offsets = [0, 48], sizes = [2, 16], strides = [1, 1]} : vector<2x64xf32> to vector<2x16xf32>
    %78 = arith.negf %77 : vector<2x16xf32>
    %79 = math.exp %78 : vector<2x16xf32>
    %cst_45 = arith.constant 1.000000e+00 : f32
    %80 = vector.broadcast %cst_45 : f32 to vector<2x16xf32>
    %81 = arith.addf %80, %79 : vector<2x16xf32>
    %82 = arith.divf %80, %81 : vector<2x16xf32>
    %83 = arith.mulf %74, %18 : vector<2x16xf32>
    %84 = arith.mulf %68, %76 : vector<2x16xf32>
    %85 = arith.addf %83, %84 : vector<2x16xf32>
    %86 = math.tanh %85 : vector<2x16xf32>
    %87 = arith.mulf %82, %86 : vector<2x16xf32>
    %88 = vector.broadcast %8 : vector<1x16xf32> to vector<2x16xf32>
    %89 = arith.mulf %87, %88 : vector<2x16xf32>
    %90 = vector.broadcast %9 : vector<1x16xf32> to vector<2x16xf32>
    %91 = arith.addf %89, %90 : vector<2x16xf32>
    %cst_46 = arith.constant dense<0.000000e+00> : vector<2x32xf32>
    %92 = tpu.matmul %91, %10, %cst_46 {dimension_numbers = #tpu.dot_dimension_numbers<[1], [0], [0], [1], [0, 0, 1, 1], [], []>} : vector<2x16xf32>, vector<16x32xf32>, vector<2x32xf32> -> vector<2x32xf32>
    %cst_47 = arith.constant dense<0.000000e+00> : vector<2x32xf32>
    %93 = tpu.matmul %19, %11, %cst_47 {dimension_numbers = #tpu.dot_dimension_numbers<[1], [0], [0], [1], [0, 0, 1, 1], [], []>} : vector<2x8xf32>, vector<8x32xf32>, vector<2x32xf32> -> vector<2x32xf32>
    %94 = arith.addf %92, %93 : vector<2x32xf32>
    %95 = vector.broadcast %12 : vector<1x32xf32> to vector<2x32xf32>
    %96 = arith.addf %94, %95 : vector<2x32xf32>
    %97 = vector.extract_strided_slice %96 {offsets = [0, 0], sizes = [2, 8], strides = [1, 1]} : vector<2x32xf32> to vector<2x8xf32>
    %98 = arith.negf %97 : vector<2x8xf32>
    %99 = math.exp %98 : vector<2x8xf32>
    %cst_48 = arith.constant 1.000000e+00 : f32
    %100 = vector.broadcast %cst_48 : f32 to vector<2x8xf32>
    %101 = arith.addf %100, %99 : vector<2x8xf32>
    %102 = arith.divf %100, %101 : vector<2x8xf32>
    %103 = vector.extract_strided_slice %96 {offsets = [0, 8], sizes = [2, 8], strides = [1, 1]} : vector<2x32xf32> to vector<2x8xf32>
    %104 = arith.negf %103 : vector<2x8xf32>
    %105 = math.exp %104 : vector<2x8xf32>
    %cst_49 = arith.constant 1.000000e+00 : f32
    %106 = vector.broadcast %cst_49 : f32 to vector<2x8xf32>
    %107 = arith.addf %106, %105 : vector<2x8xf32>
    %108 = arith.divf %106, %107 : vector<2x8xf32>
    %109 = vector.extract_strided_slice %96 {offsets = [0, 16], sizes = [2, 8], strides = [1, 1]} : vector<2x32xf32> to vector<2x8xf32>
    %110 = math.tanh %109 : vector<2x8xf32>
    %111 = vector.extract_strided_slice %96 {offsets = [0, 24], sizes = [2, 8], strides = [1, 1]} : vector<2x32xf32> to vector<2x8xf32>
    %112 = arith.negf %111 : vector<2x8xf32>
    %113 = math.exp %112 : vector<2x8xf32>
    %cst_50 = arith.constant 1.000000e+00 : f32
    %114 = vector.broadcast %cst_50 : f32 to vector<2x8xf32>
    %115 = arith.addf %114, %113 : vector<2x8xf32>
    %116 = arith.divf %114, %115 : vector<2x8xf32>
    %117 = arith.mulf %108, %20 : vector<2x8xf32>
    %118 = arith.mulf %102, %110 : vector<2x8xf32>
    %119 = arith.addf %117, %118 : vector<2x8xf32>
    %120 = math.tanh %119 : vector<2x8xf32>
    %121 = arith.mulf %116, %120 : vector<2x8xf32>
    %c1_i32 = arith.constant 1 : i32
    %122 = arith.index_cast %c1_i32 : i32 to index
    %c0_51 = arith.constant 0 : index
    %c0_52 = arith.constant 0 : index
    %123 = vector.load %arg0[%122, %c0_51, %c0_52] : memref<8x2x3xf32, #tpu.memory_space<vmem>>, vector<1x2x3xf32>
    %124 = vector.shape_cast %123 : vector<1x2x3xf32> to vector<2x3xf32>
    %cst_53 = arith.constant dense<0.000000e+00> : vector<2x128xf32>
    %125 = tpu.matmul %124, %0, %cst_53 {dimension_numbers = #tpu.dot_dimension_numbers<[1], [0], [0], [1], [0, 0, 1, 1], [], []>} : vector<2x3xf32>, vector<3x128xf32>, vector<2x128xf32> -> vector<2x128xf32>
    %cst_54 = arith.constant dense<0.000000e+00> : vector<2x128xf32>
    %126 = tpu.matmul %53, %1, %cst_54 {dimension_numbers = #tpu.dot_dimension_numbers<[1], [0], [0], [1], [0, 0, 1, 1], [], []>} : vector<2x32xf32>, vector<32x128xf32>, vector<2x128xf32> -> vector<2x128xf32>
    %127 = arith.addf %125, %126 : vector<2x128xf32>
    %128 = vector.broadcast %2 : vector<1x128xf32> to vector<2x128xf32>
    %129 = arith.addf %127, %128 : vector<2x128xf32>
    %130 = vector.extract_strided_slice %129 {offsets = [0, 0], sizes = [2, 32], strides = [1, 1]} : vector<2x128xf32> to vector<2x32xf32>
    %131 = arith.negf %130 : vector<2x32xf32>
    %132 = math.exp %131 : vector<2x32xf32>
    %cst_55 = arith.constant 1.000000e+00 : f32
    %133 = vector.broadcast %cst_55 : f32 to vector<2x32xf32>
    %134 = arith.addf %133, %132 : vector<2x32xf32>
    %135 = arith.divf %133, %134 : vector<2x32xf32>
    %136 = vector.extract_strided_slice %129 {offsets = [0, 32], sizes = [2, 32], strides = [1, 1]} : vector<2x128xf32> to vector<2x32xf32>
    %137 = arith.negf %136 : vector<2x32xf32>
    %138 = math.exp %137 : vector<2x32xf32>
    %cst_56 = arith.constant 1.000000e+00 : f32
    %139 = vector.broadcast %cst_56 : f32 to vector<2x32xf32>
    %140 = arith.addf %139, %138 : vector<2x32xf32>
    %141 = arith.divf %139, %140 : vector<2x32xf32>
    %142 = vector.extract_strided_slice %129 {offsets = [0, 64], sizes = [2, 32], strides = [1, 1]} : vector<2x128xf32> to vector<2x32xf32>
    %143 = math.tanh %142 : vector<2x32xf32>
    %144 = vector.extract_strided_slice %129 {offsets = [0, 96], sizes = [2, 32], strides = [1, 1]} : vector<2x128xf32> to vector<2x32xf32>
    %145 = arith.negf %144 : vector<2x32xf32>
    %146 = math.exp %145 : vector<2x32xf32>
    %cst_57 = arith.constant 1.000000e+00 : f32
    %147 = vector.broadcast %cst_57 : f32 to vector<2x32xf32>
    %148 = arith.addf %147, %146 : vector<2x32xf32>
    %149 = arith.divf %147, %148 : vector<2x32xf32>
    %150 = arith.mulf %141, %51 : vector<2x32xf32>
    %151 = arith.mulf %135, %143 : vector<2x32xf32>
    %152 = arith.addf %150, %151 : vector<2x32xf32>
    %153 = math.tanh %152 : vector<2x32xf32>
    %154 = arith.mulf %149, %153 : vector<2x32xf32>
    %155 = vector.broadcast %3 : vector<1x32xf32> to vector<2x32xf32>
    %156 = arith.mulf %154, %155 : vector<2x32xf32>
    %157 = vector.broadcast %4 : vector<1x32xf32> to vector<2x32xf32>
    %158 = arith.addf %156, %157 : vector<2x32xf32>
    %cst_58 = arith.constant dense<0.000000e+00> : vector<2x64xf32>
    %159 = tpu.matmul %158, %5, %cst_58 {dimension_numbers = #tpu.dot_dimension_numbers<[1], [0], [0], [1], [0, 0, 1, 1], [], []>} : vector<2x32xf32>, vector<32x64xf32>, vector<2x64xf32> -> vector<2x64xf32>
    %cst_59 = arith.constant dense<0.000000e+00> : vector<2x64xf32>
    %160 = tpu.matmul %87, %6, %cst_59 {dimension_numbers = #tpu.dot_dimension_numbers<[1], [0], [0], [1], [0, 0, 1, 1], [], []>} : vector<2x16xf32>, vector<16x64xf32>, vector<2x64xf32> -> vector<2x64xf32>
    %161 = arith.addf %159, %160 : vector<2x64xf32>
    %162 = vector.broadcast %7 : vector<1x64xf32> to vector<2x64xf32>
    %163 = arith.addf %161, %162 : vector<2x64xf32>
    %164 = vector.extract_strided_slice %163 {offsets = [0, 0], sizes = [2, 16], strides = [1, 1]} : vector<2x64xf32> to vector<2x16xf32>
    %165 = arith.negf %164 : vector<2x16xf32>
    %166 = math.exp %165 : vector<2x16xf32>
    %cst_60 = arith.constant 1.000000e+00 : f32
    %167 = vector.broadcast %cst_60 : f32 to vector<2x16xf32>
    %168 = arith.addf %167, %166 : vector<2x16xf32>
    %169 = arith.divf %167, %168 : vector<2x16xf32>
    %170 = vector.extract_strided_slice %163 {offsets = [0, 16], sizes = [2, 16], strides = [1, 1]} : vector<2x64xf32> to vector<2x16xf32>
    %171 = arith.negf %170 : vector<2x16xf32>
    %172 = math.exp %171 : vector<2x16xf32>
    %cst_61 = arith.constant 1.000000e+00 : f32
    %173 = vector.broadcast %cst_61 : f32 to vector<2x16xf32>
    %174 = arith.addf %173, %172 : vector<2x16xf32>
    %175 = arith.divf %173, %174 : vector<2x16xf32>
    %176 = vector.extract_strided_slice %163 {offsets = [0, 32], sizes = [2, 16], strides = [1, 1]} : vector<2x64xf32> to vector<2x16xf32>
    %177 = math.tanh %176 : vector<2x16xf32>
    %178 = vector.extract_strided_slice %163 {offsets = [0, 48], sizes = [2, 16], strides = [1, 1]} : vector<2x64xf32> to vector<2x16xf32>
    %179 = arith.negf %178 : vector<2x16xf32>
    %180 = math.exp %179 : vector<2x16xf32>
    %cst_62 = arith.constant 1.000000e+00 : f32
    %181 = vector.broadcast %cst_62 : f32 to vector<2x16xf32>
    %182 = arith.addf %181, %180 : vector<2x16xf32>
    %183 = arith.divf %181, %182 : vector<2x16xf32>
    %184 = arith.mulf %175, %85 : vector<2x16xf32>
    %185 = arith.mulf %169, %177 : vector<2x16xf32>
    %186 = arith.addf %184, %185 : vector<2x16xf32>
    %187 = math.tanh %186 : vector<2x16xf32>
    %188 = arith.mulf %183, %187 : vector<2x16xf32>
    %189 = vector.broadcast %8 : vector<1x16xf32> to vector<2x16xf32>
    %190 = arith.mulf %188, %189 : vector<2x16xf32>
    %191 = vector.broadcast %9 : vector<1x16xf32> to vector<2x16xf32>
    %192 = arith.addf %190, %191 : vector<2x16xf32>
    %cst_63 = arith.constant dense<0.000000e+00> : vector<2x32xf32>
    %193 = tpu.matmul %192, %10, %cst_63 {dimension_numbers = #tpu.dot_dimension_numbers<[1], [0], [0], [1], [0, 0, 1, 1], [], []>} : vector<2x16xf32>, vector<16x32xf32>, vector<2x32xf32> -> vector<2x32xf32>
    %cst_64 = arith.constant dense<0.000000e+00> : vector<2x32xf32>
    %194 = tpu.matmul %121, %11, %cst_64 {dimension_numbers = #tpu.dot_dimension_numbers<[1], [0], [0], [1], [0, 0, 1, 1], [], []>} : vector<2x8xf32>, vector<8x32xf32>, vector<2x32xf32> -> vector<2x32xf32>
    %195 = arith.addf %193, %194 : vector<2x32xf32>
    %196 = vector.broadcast %12 : vector<1x32xf32> to vector<2x32xf32>
    %197 = arith.addf %195, %196 : vector<2x32xf32>
    %198 = vector.extract_strided_slice %197 {offsets = [0, 0], sizes = [2, 8], strides = [1, 1]} : vector<2x32xf32> to vector<2x8xf32>
    %199 = arith.negf %198 : vector<2x8xf32>
    %200 = math.exp %199 : vector<2x8xf32>
    %cst_65 = arith.constant 1.000000e+00 : f32
    %201 = vector.broadcast %cst_65 : f32 to vector<2x8xf32>
    %202 = arith.addf %201, %200 : vector<2x8xf32>
    %203 = arith.divf %201, %202 : vector<2x8xf32>
    %204 = vector.extract_strided_slice %197 {offsets = [0, 8], sizes = [2, 8], strides = [1, 1]} : vector<2x32xf32> to vector<2x8xf32>
    %205 = arith.negf %204 : vector<2x8xf32>
    %206 = math.exp %205 : vector<2x8xf32>
    %cst_66 = arith.constant 1.000000e+00 : f32
    %207 = vector.broadcast %cst_66 : f32 to vector<2x8xf32>
    %208 = arith.addf %207, %206 : vector<2x8xf32>
    %209 = arith.divf %207, %208 : vector<2x8xf32>
    %210 = vector.extract_strided_slice %197 {offsets = [0, 16], sizes = [2, 8], strides = [1, 1]} : vector<2x32xf32> to vector<2x8xf32>
    %211 = math.tanh %210 : vector<2x8xf32>
    %212 = vector.extract_strided_slice %197 {offsets = [0, 24], sizes = [2, 8], strides = [1, 1]} : vector<2x32xf32> to vector<2x8xf32>
    %213 = arith.negf %212 : vector<2x8xf32>
    %214 = math.exp %213 : vector<2x8xf32>
    %cst_67 = arith.constant 1.000000e+00 : f32
    %215 = vector.broadcast %cst_67 : f32 to vector<2x8xf32>
    %216 = arith.addf %215, %214 : vector<2x8xf32>
    %217 = arith.divf %215, %216 : vector<2x8xf32>
    %218 = arith.mulf %209, %119 : vector<2x8xf32>
    %219 = arith.mulf %203, %211 : vector<2x8xf32>
    %220 = arith.addf %218, %219 : vector<2x8xf32>
    %221 = math.tanh %220 : vector<2x8xf32>
    %222 = arith.mulf %217, %221 : vector<2x8xf32>
    %c2_i32 = arith.constant 2 : i32
    %223 = arith.index_cast %c2_i32 : i32 to index
    %c0_68 = arith.constant 0 : index
    %c0_69 = arith.constant 0 : index
    %224 = vector.load %arg0[%223, %c0_68, %c0_69] : memref<8x2x3xf32, #tpu.memory_space<vmem>>, vector<1x2x3xf32>
    %225 = vector.shape_cast %224 : vector<1x2x3xf32> to vector<2x3xf32>
    %cst_70 = arith.constant dense<0.000000e+00> : vector<2x128xf32>
    %226 = tpu.matmul %225, %0, %cst_70 {dimension_numbers = #tpu.dot_dimension_numbers<[1], [0], [0], [1], [0, 0, 1, 1], [], []>} : vector<2x3xf32>, vector<3x128xf32>, vector<2x128xf32> -> vector<2x128xf32>
    %cst_71 = arith.constant dense<0.000000e+00> : vector<2x128xf32>
    %227 = tpu.matmul %154, %1, %cst_71 {dimension_numbers = #tpu.dot_dimension_numbers<[1], [0], [0], [1], [0, 0, 1, 1], [], []>} : vector<2x32xf32>, vector<32x128xf32>, vector<2x128xf32> -> vector<2x128xf32>
    %228 = arith.addf %226, %227 : vector<2x128xf32>
    %229 = vector.broadcast %2 : vector<1x128xf32> to vector<2x128xf32>
    %230 = arith.addf %228, %229 : vector<2x128xf32>
    %231 = vector.extract_strided_slice %230 {offsets = [0, 0], sizes = [2, 32], strides = [1, 1]} : vector<2x128xf32> to vector<2x32xf32>
    %232 = arith.negf %231 : vector<2x32xf32>
    %233 = math.exp %232 : vector<2x32xf32>
    %cst_72 = arith.constant 1.000000e+00 : f32
    %234 = vector.broadcast %cst_72 : f32 to vector<2x32xf32>
    %235 = arith.addf %234, %233 : vector<2x32xf32>
    %236 = arith.divf %234, %235 : vector<2x32xf32>
    %237 = vector.extract_strided_slice %230 {offsets = [0, 32], sizes = [2, 32], strides = [1, 1]} : vector<2x128xf32> to vector<2x32xf32>
    %238 = arith.negf %237 : vector<2x32xf32>
    %239 = math.exp %238 : vector<2x32xf32>
    %cst_73 = arith.constant 1.000000e+00 : f32
    %240 = vector.broadcast %cst_73 : f32 to vector<2x32xf32>
    %241 = arith.addf %240, %239 : vector<2x32xf32>
    %242 = arith.divf %240, %241 : vector<2x32xf32>
    %243 = vector.extract_strided_slice %230 {offsets = [0, 64], sizes = [2, 32], strides = [1, 1]} : vector<2x128xf32> to vector<2x32xf32>
    %244 = math.tanh %243 : vector<2x32xf32>
    %245 = vector.extract_strided_slice %230 {offsets = [0, 96], sizes = [2, 32], strides = [1, 1]} : vector<2x128xf32> to vector<2x32xf32>
    %246 = arith.negf %245 : vector<2x32xf32>
    %247 = math.exp %246 : vector<2x32xf32>
    %cst_74 = arith.constant 1.000000e+00 : f32
    %248 = vector.broadcast %cst_74 : f32 to vector<2x32xf32>
    %249 = arith.addf %248, %247 : vector<2x32xf32>
    %250 = arith.divf %248, %249 : vector<2x32xf32>
    %251 = arith.mulf %242, %152 : vector<2x32xf32>
    %252 = arith.mulf %236, %244 : vector<2x32xf32>
    %253 = arith.addf %251, %252 : vector<2x32xf32>
    %254 = math.tanh %253 : vector<2x32xf32>
    %255 = arith.mulf %250, %254 : vector<2x32xf32>
    %256 = vector.broadcast %3 : vector<1x32xf32> to vector<2x32xf32>
    %257 = arith.mulf %255, %256 : vector<2x32xf32>
    %258 = vector.broadcast %4 : vector<1x32xf32> to vector<2x32xf32>
    %259 = arith.addf %257, %258 : vector<2x32xf32>
    %cst_75 = arith.constant dense<0.000000e+00> : vector<2x64xf32>
    %260 = tpu.matmul %259, %5, %cst_75 {dimension_numbers = #tpu.dot_dimension_numbers<[1], [0], [0], [1], [0, 0, 1, 1], [], []>} : vector<2x32xf32>, vector<32x64xf32>, vector<2x64xf32> -> vector<2x64xf32>
    %cst_76 = arith.constant dense<0.000000e+00> : vector<2x64xf32>
    %261 = tpu.matmul %188, %6, %cst_76 {dimension_numbers = #tpu.dot_dimension_numbers<[1], [0], [0], [1], [0, 0, 1, 1], [], []>} : vector<2x16xf32>, vector<16x64xf32>, vector<2x64xf32> -> vector<2x64xf32>
    %262 = arith.addf %260, %261 : vector<2x64xf32>
    %263 = vector.broadcast %7 : vector<1x64xf32> to vector<2x64xf32>
    %264 = arith.addf %262, %263 : vector<2x64xf32>
    %265 = vector.extract_strided_slice %264 {offsets = [0, 0], sizes = [2, 16], strides = [1, 1]} : vector<2x64xf32> to vector<2x16xf32>
    %266 = arith.negf %265 : vector<2x16xf32>
    %267 = math.exp %266 : vector<2x16xf32>
    %cst_77 = arith.constant 1.000000e+00 : f32
    %268 = vector.broadcast %cst_77 : f32 to vector<2x16xf32>
    %269 = arith.addf %268, %267 : vector<2x16xf32>
    %270 = arith.divf %268, %269 : vector<2x16xf32>
    %271 = vector.extract_strided_slice %264 {offsets = [0, 16], sizes = [2, 16], strides = [1, 1]} : vector<2x64xf32> to vector<2x16xf32>
    %272 = arith.negf %271 : vector<2x16xf32>
    %273 = math.exp %272 : vector<2x16xf32>
    %cst_78 = arith.constant 1.000000e+00 : f32
    %274 = vector.broadcast %cst_78 : f32 to vector<2x16xf32>
    %275 = arith.addf %274, %273 : vector<2x16xf32>
    %276 = arith.divf %274, %275 : vector<2x16xf32>
    %277 = vector.extract_strided_slice %264 {offsets = [0, 32], sizes = [2, 16], strides = [1, 1]} : vector<2x64xf32> to vector<2x16xf32>
    %278 = math.tanh %277 : vector<2x16xf32>
    %279 = vector.extract_strided_slice %264 {offsets = [0, 48], sizes = [2, 16], strides = [1, 1]} : vector<2x64xf32> to vector<2x16xf32>
    %280 = arith.negf %279 : vector<2x16xf32>
    %281 = math.exp %280 : vector<2x16xf32>
    %cst_79 = arith.constant 1.000000e+00 : f32
    %282 = vector.broadcast %cst_79 : f32 to vector<2x16xf32>
    %283 = arith.addf %282, %281 : vector<2x16xf32>
    %284 = arith.divf %282, %283 : vector<2x16xf32>
    %285 = arith.mulf %276, %186 : vector<2x16xf32>
    %286 = arith.mulf %270, %278 : vector<2x16xf32>
    %287 = arith.addf %285, %286 : vector<2x16xf32>
    %288 = math.tanh %287 : vector<2x16xf32>
    %289 = arith.mulf %284, %288 : vector<2x16xf32>
    %290 = vector.broadcast %8 : vector<1x16xf32> to vector<2x16xf32>
    %291 = arith.mulf %289, %290 : vector<2x16xf32>
    %292 = vector.broadcast %9 : vector<1x16xf32> to vector<2x16xf32>
    %293 = arith.addf %291, %292 : vector<2x16xf32>
    %cst_80 = arith.constant dense<0.000000e+00> : vector<2x32xf32>
    %294 = tpu.matmul %293, %10, %cst_80 {dimension_numbers = #tpu.dot_dimension_numbers<[1], [0], [0], [1], [0, 0, 1, 1], [], []>} : vector<2x16xf32>, vector<16x32xf32>, vector<2x32xf32> -> vector<2x32xf32>
    %cst_81 = arith.constant dense<0.000000e+00> : vector<2x32xf32>
    %295 = tpu.matmul %222, %11, %cst_81 {dimension_numbers = #tpu.dot_dimension_numbers<[1], [0], [0], [1], [0, 0, 1, 1], [], []>} : vector<2x8xf32>, vector<8x32xf32>, vector<2x32xf32> -> vector<2x32xf32>
    %296 = arith.addf %294, %295 : vector<2x32xf32>
    %297 = vector.broadcast %12 : vector<1x32xf32> to vector<2x32xf32>
    %298 = arith.addf %296, %297 : vector<2x32xf32>
    %299 = vector.extract_strided_slice %298 {offsets = [0, 0], sizes = [2, 8], strides = [1, 1]} : vector<2x32xf32> to vector<2x8xf32>
    %300 = arith.negf %299 : vector<2x8xf32>
    %301 = math.exp %300 : vector<2x8xf32>
    %cst_82 = arith.constant 1.000000e+00 : f32
    %302 = vector.broadcast %cst_82 : f32 to vector<2x8xf32>
    %303 = arith.addf %302, %301 : vector<2x8xf32>
    %304 = arith.divf %302, %303 : vector<2x8xf32>
    %305 = vector.extract_strided_slice %298 {offsets = [0, 8], sizes = [2, 8], strides = [1, 1]} : vector<2x32xf32> to vector<2x8xf32>
    %306 = arith.negf %305 : vector<2x8xf32>
    %307 = math.exp %306 : vector<2x8xf32>
    %cst_83 = arith.constant 1.000000e+00 : f32
    %308 = vector.broadcast %cst_83 : f32 to vector<2x8xf32>
    %309 = arith.addf %308, %307 : vector<2x8xf32>
    %310 = arith.divf %308, %309 : vector<2x8xf32>
    %311 = vector.extract_strided_slice %298 {offsets = [0, 16], sizes = [2, 8], strides = [1, 1]} : vector<2x32xf32> to vector<2x8xf32>
    %312 = math.tanh %311 : vector<2x8xf32>
    %313 = vector.extract_strided_slice %298 {offsets = [0, 24], sizes = [2, 8], strides = [1, 1]} : vector<2x32xf32> to vector<2x8xf32>
    %314 = arith.negf %313 : vector<2x8xf32>
    %315 = math.exp %314 : vector<2x8xf32>
    %cst_84 = arith.constant 1.000000e+00 : f32
    %316 = vector.broadcast %cst_84 : f32 to vector<2x8xf32>
    %317 = arith.addf %316, %315 : vector<2x8xf32>
    %318 = arith.divf %316, %317 : vector<2x8xf32>
    %319 = arith.mulf %310, %220 : vector<2x8xf32>
    %320 = arith.mulf %304, %312 : vector<2x8xf32>
    %321 = arith.addf %319, %320 : vector<2x8xf32>
    %322 = math.tanh %321 : vector<2x8xf32>
    %323 = arith.mulf %318, %322 : vector<2x8xf32>
    %c3_i32 = arith.constant 3 : i32
    %324 = arith.index_cast %c3_i32 : i32 to index
    %c0_85 = arith.constant 0 : index
    %c0_86 = arith.constant 0 : index
    %325 = vector.load %arg0[%324, %c0_85, %c0_86] : memref<8x2x3xf32, #tpu.memory_space<vmem>>, vector<1x2x3xf32>
    %326 = vector.shape_cast %325 : vector<1x2x3xf32> to vector<2x3xf32>
    %cst_87 = arith.constant dense<0.000000e+00> : vector<2x128xf32>
    %327 = tpu.matmul %326, %0, %cst_87 {dimension_numbers = #tpu.dot_dimension_numbers<[1], [0], [0], [1], [0, 0, 1, 1], [], []>} : vector<2x3xf32>, vector<3x128xf32>, vector<2x128xf32> -> vector<2x128xf32>
    %cst_88 = arith.constant dense<0.000000e+00> : vector<2x128xf32>
    %328 = tpu.matmul %255, %1, %cst_88 {dimension_numbers = #tpu.dot_dimension_numbers<[1], [0], [0], [1], [0, 0, 1, 1], [], []>} : vector<2x32xf32>, vector<32x128xf32>, vector<2x128xf32> -> vector<2x128xf32>
    %329 = arith.addf %327, %328 : vector<2x128xf32>
    %330 = vector.broadcast %2 : vector<1x128xf32> to vector<2x128xf32>
    %331 = arith.addf %329, %330 : vector<2x128xf32>
    %332 = vector.extract_strided_slice %331 {offsets = [0, 0], sizes = [2, 32], strides = [1, 1]} : vector<2x128xf32> to vector<2x32xf32>
    %333 = arith.negf %332 : vector<2x32xf32>
    %334 = math.exp %333 : vector<2x32xf32>
    %cst_89 = arith.constant 1.000000e+00 : f32
    %335 = vector.broadcast %cst_89 : f32 to vector<2x32xf32>
    %336 = arith.addf %335, %334 : vector<2x32xf32>
    %337 = arith.divf %335, %336 : vector<2x32xf32>
    %338 = vector.extract_strided_slice %331 {offsets = [0, 32], sizes = [2, 32], strides = [1, 1]} : vector<2x128xf32> to vector<2x32xf32>
    %339 = arith.negf %338 : vector<2x32xf32>
    %340 = math.exp %339 : vector<2x32xf32>
    %cst_90 = arith.constant 1.000000e+00 : f32
    %341 = vector.broadcast %cst_90 : f32 to vector<2x32xf32>
    %342 = arith.addf %341, %340 : vector<2x32xf32>
    %343 = arith.divf %341, %342 : vector<2x32xf32>
    %344 = vector.extract_strided_slice %331 {offsets = [0, 64], sizes = [2, 32], strides = [1, 1]} : vector<2x128xf32> to vector<2x32xf32>
    %345 = math.tanh %344 : vector<2x32xf32>
    %346 = vector.extract_strided_slice %331 {offsets = [0, 96], sizes = [2, 32], strides = [1, 1]} : vector<2x128xf32> to vector<2x32xf32>
    %347 = arith.negf %346 : vector<2x32xf32>
    %348 = math.exp %347 : vector<2x32xf32>
    %cst_91 = arith.constant 1.000000e+00 : f32
    %349 = vector.broadcast %cst_91 : f32 to vector<2x32xf32>
    %350 = arith.addf %349, %348 : vector<2x32xf32>
    %351 = arith.divf %349, %350 : vector<2x32xf32>
    %352 = arith.mulf %343, %253 : vector<2x32xf32>
    %353 = arith.mulf %337, %345 : vector<2x32xf32>
    %354 = arith.addf %352, %353 : vector<2x32xf32>
    %355 = math.tanh %354 : vector<2x32xf32>
    %356 = arith.mulf %351, %355 : vector<2x32xf32>
    %357 = vector.broadcast %3 : vector<1x32xf32> to vector<2x32xf32>
    %358 = arith.mulf %356, %357 : vector<2x32xf32>
    %359 = vector.broadcast %4 : vector<1x32xf32> to vector<2x32xf32>
    %360 = arith.addf %358, %359 : vector<2x32xf32>
    %cst_92 = arith.constant dense<0.000000e+00> : vector<2x64xf32>
    %361 = tpu.matmul %360, %5, %cst_92 {dimension_numbers = #tpu.dot_dimension_numbers<[1], [0], [0], [1], [0, 0, 1, 1], [], []>} : vector<2x32xf32>, vector<32x64xf32>, vector<2x64xf32> -> vector<2x64xf32>
    %cst_93 = arith.constant dense<0.000000e+00> : vector<2x64xf32>
    %362 = tpu.matmul %289, %6, %cst_93 {dimension_numbers = #tpu.dot_dimension_numbers<[1], [0], [0], [1], [0, 0, 1, 1], [], []>} : vector<2x16xf32>, vector<16x64xf32>, vector<2x64xf32> -> vector<2x64xf32>
    %363 = arith.addf %361, %362 : vector<2x64xf32>
    %364 = vector.broadcast %7 : vector<1x64xf32> to vector<2x64xf32>
    %365 = arith.addf %363, %364 : vector<2x64xf32>
    %366 = vector.extract_strided_slice %365 {offsets = [0, 0], sizes = [2, 16], strides = [1, 1]} : vector<2x64xf32> to vector<2x16xf32>
    %367 = arith.negf %366 : vector<2x16xf32>
    %368 = math.exp %367 : vector<2x16xf32>
    %cst_94 = arith.constant 1.000000e+00 : f32
    %369 = vector.broadcast %cst_94 : f32 to vector<2x16xf32>
    %370 = arith.addf %369, %368 : vector<2x16xf32>
    %371 = arith.divf %369, %370 : vector<2x16xf32>
    %372 = vector.extract_strided_slice %365 {offsets = [0, 16], sizes = [2, 16], strides = [1, 1]} : vector<2x64xf32> to vector<2x16xf32>
    %373 = arith.negf %372 : vector<2x16xf32>
    %374 = math.exp %373 : vector<2x16xf32>
    %cst_95 = arith.constant 1.000000e+00 : f32
    %375 = vector.broadcast %cst_95 : f32 to vector<2x16xf32>
    %376 = arith.addf %375, %374 : vector<2x16xf32>
    %377 = arith.divf %375, %376 : vector<2x16xf32>
    %378 = vector.extract_strided_slice %365 {offsets = [0, 32], sizes = [2, 16], strides = [1, 1]} : vector<2x64xf32> to vector<2x16xf32>
    %379 = math.tanh %378 : vector<2x16xf32>
    %380 = vector.extract_strided_slice %365 {offsets = [0, 48], sizes = [2, 16], strides = [1, 1]} : vector<2x64xf32> to vector<2x16xf32>
    %381 = arith.negf %380 : vector<2x16xf32>
    %382 = math.exp %381 : vector<2x16xf32>
    %cst_96 = arith.constant 1.000000e+00 : f32
    %383 = vector.broadcast %cst_96 : f32 to vector<2x16xf32>
    %384 = arith.addf %383, %382 : vector<2x16xf32>
    %385 = arith.divf %383, %384 : vector<2x16xf32>
    %386 = arith.mulf %377, %287 : vector<2x16xf32>
    %387 = arith.mulf %371, %379 : vector<2x16xf32>
    %388 = arith.addf %386, %387 : vector<2x16xf32>
    %389 = math.tanh %388 : vector<2x16xf32>
    %390 = arith.mulf %385, %389 : vector<2x16xf32>
    %391 = vector.broadcast %8 : vector<1x16xf32> to vector<2x16xf32>
    %392 = arith.mulf %390, %391 : vector<2x16xf32>
    %393 = vector.broadcast %9 : vector<1x16xf32> to vector<2x16xf32>
    %394 = arith.addf %392, %393 : vector<2x16xf32>
    %cst_97 = arith.constant dense<0.000000e+00> : vector<2x32xf32>
    %395 = tpu.matmul %394, %10, %cst_97 {dimension_numbers = #tpu.dot_dimension_numbers<[1], [0], [0], [1], [0, 0, 1, 1], [], []>} : vector<2x16xf32>, vector<16x32xf32>, vector<2x32xf32> -> vector<2x32xf32>
    %cst_98 = arith.constant dense<0.000000e+00> : vector<2x32xf32>
    %396 = tpu.matmul %323, %11, %cst_98 {dimension_numbers = #tpu.dot_dimension_numbers<[1], [0], [0], [1], [0, 0, 1, 1], [], []>} : vector<2x8xf32>, vector<8x32xf32>, vector<2x32xf32> -> vector<2x32xf32>
    %397 = arith.addf %395, %396 : vector<2x32xf32>
    %398 = vector.broadcast %12 : vector<1x32xf32> to vector<2x32xf32>
    %399 = arith.addf %397, %398 : vector<2x32xf32>
    %400 = vector.extract_strided_slice %399 {offsets = [0, 0], sizes = [2, 8], strides = [1, 1]} : vector<2x32xf32> to vector<2x8xf32>
    %401 = arith.negf %400 : vector<2x8xf32>
    %402 = math.exp %401 : vector<2x8xf32>
    %cst_99 = arith.constant 1.000000e+00 : f32
    %403 = vector.broadcast %cst_99 : f32 to vector<2x8xf32>
    %404 = arith.addf %403, %402 : vector<2x8xf32>
    %405 = arith.divf %403, %404 : vector<2x8xf32>
    %406 = vector.extract_strided_slice %399 {offsets = [0, 8], sizes = [2, 8], strides = [1, 1]} : vector<2x32xf32> to vector<2x8xf32>
    %407 = arith.negf %406 : vector<2x8xf32>
    %408 = math.exp %407 : vector<2x8xf32>
    %cst_100 = arith.constant 1.000000e+00 : f32
    %409 = vector.broadcast %cst_100 : f32 to vector<2x8xf32>
    %410 = arith.addf %409, %408 : vector<2x8xf32>
    %411 = arith.divf %409, %410 : vector<2x8xf32>
    %412 = vector.extract_strided_slice %399 {offsets = [0, 16], sizes = [2, 8], strides = [1, 1]} : vector<2x32xf32> to vector<2x8xf32>
    %413 = math.tanh %412 : vector<2x8xf32>
    %414 = vector.extract_strided_slice %399 {offsets = [0, 24], sizes = [2, 8], strides = [1, 1]} : vector<2x32xf32> to vector<2x8xf32>
    %415 = arith.negf %414 : vector<2x8xf32>
    %416 = math.exp %415 : vector<2x8xf32>
    %cst_101 = arith.constant 1.000000e+00 : f32
    %417 = vector.broadcast %cst_101 : f32 to vector<2x8xf32>
    %418 = arith.addf %417, %416 : vector<2x8xf32>
    %419 = arith.divf %417, %418 : vector<2x8xf32>
    %420 = arith.mulf %411, %321 : vector<2x8xf32>
    %421 = arith.mulf %405, %413 : vector<2x8xf32>
    %422 = arith.addf %420, %421 : vector<2x8xf32>
    %423 = math.tanh %422 : vector<2x8xf32>
    %424 = arith.mulf %419, %423 : vector<2x8xf32>
    %c4_i32 = arith.constant 4 : i32
    %425 = arith.index_cast %c4_i32 : i32 to index
    %c0_102 = arith.constant 0 : index
    %c0_103 = arith.constant 0 : index
    %426 = vector.load %arg0[%425, %c0_102, %c0_103] : memref<8x2x3xf32, #tpu.memory_space<vmem>>, vector<1x2x3xf32>
    %427 = vector.shape_cast %426 : vector<1x2x3xf32> to vector<2x3xf32>
    %cst_104 = arith.constant dense<0.000000e+00> : vector<2x128xf32>
    %428 = tpu.matmul %427, %0, %cst_104 {dimension_numbers = #tpu.dot_dimension_numbers<[1], [0], [0], [1], [0, 0, 1, 1], [], []>} : vector<2x3xf32>, vector<3x128xf32>, vector<2x128xf32> -> vector<2x128xf32>
    %cst_105 = arith.constant dense<0.000000e+00> : vector<2x128xf32>
    %429 = tpu.matmul %356, %1, %cst_105 {dimension_numbers = #tpu.dot_dimension_numbers<[1], [0], [0], [1], [0, 0, 1, 1], [], []>} : vector<2x32xf32>, vector<32x128xf32>, vector<2x128xf32> -> vector<2x128xf32>
    %430 = arith.addf %428, %429 : vector<2x128xf32>
    %431 = vector.broadcast %2 : vector<1x128xf32> to vector<2x128xf32>
    %432 = arith.addf %430, %431 : vector<2x128xf32>
    %433 = vector.extract_strided_slice %432 {offsets = [0, 0], sizes = [2, 32], strides = [1, 1]} : vector<2x128xf32> to vector<2x32xf32>
    %434 = arith.negf %433 : vector<2x32xf32>
    %435 = math.exp %434 : vector<2x32xf32>
    %cst_106 = arith.constant 1.000000e+00 : f32
    %436 = vector.broadcast %cst_106 : f32 to vector<2x32xf32>
    %437 = arith.addf %436, %435 : vector<2x32xf32>
    %438 = arith.divf %436, %437 : vector<2x32xf32>
    %439 = vector.extract_strided_slice %432 {offsets = [0, 32], sizes = [2, 32], strides = [1, 1]} : vector<2x128xf32> to vector<2x32xf32>
    %440 = arith.negf %439 : vector<2x32xf32>
    %441 = math.exp %440 : vector<2x32xf32>
    %cst_107 = arith.constant 1.000000e+00 : f32
    %442 = vector.broadcast %cst_107 : f32 to vector<2x32xf32>
    %443 = arith.addf %442, %441 : vector<2x32xf32>
    %444 = arith.divf %442, %443 : vector<2x32xf32>
    %445 = vector.extract_strided_slice %432 {offsets = [0, 64], sizes = [2, 32], strides = [1, 1]} : vector<2x128xf32> to vector<2x32xf32>
    %446 = math.tanh %445 : vector<2x32xf32>
    %447 = vector.extract_strided_slice %432 {offsets = [0, 96], sizes = [2, 32], strides = [1, 1]} : vector<2x128xf32> to vector<2x32xf32>
    %448 = arith.negf %447 : vector<2x32xf32>
    %449 = math.exp %448 : vector<2x32xf32>
    %cst_108 = arith.constant 1.000000e+00 : f32
    %450 = vector.broadcast %cst_108 : f32 to vector<2x32xf32>
    %451 = arith.addf %450, %449 : vector<2x32xf32>
    %452 = arith.divf %450, %451 : vector<2x32xf32>
    %453 = arith.mulf %444, %354 : vector<2x32xf32>
    %454 = arith.mulf %438, %446 : vector<2x32xf32>
    %455 = arith.addf %453, %454 : vector<2x32xf32>
    %456 = math.tanh %455 : vector<2x32xf32>
    %457 = arith.mulf %452, %456 : vector<2x32xf32>
    %458 = vector.broadcast %3 : vector<1x32xf32> to vector<2x32xf32>
    %459 = arith.mulf %457, %458 : vector<2x32xf32>
    %460 = vector.broadcast %4 : vector<1x32xf32> to vector<2x32xf32>
    %461 = arith.addf %459, %460 : vector<2x32xf32>
    %cst_109 = arith.constant dense<0.000000e+00> : vector<2x64xf32>
    %462 = tpu.matmul %461, %5, %cst_109 {dimension_numbers = #tpu.dot_dimension_numbers<[1], [0], [0], [1], [0, 0, 1, 1], [], []>} : vector<2x32xf32>, vector<32x64xf32>, vector<2x64xf32> -> vector<2x64xf32>
    %cst_110 = arith.constant dense<0.000000e+00> : vector<2x64xf32>
    %463 = tpu.matmul %390, %6, %cst_110 {dimension_numbers = #tpu.dot_dimension_numbers<[1], [0], [0], [1], [0, 0, 1, 1], [], []>} : vector<2x16xf32>, vector<16x64xf32>, vector<2x64xf32> -> vector<2x64xf32>
    %464 = arith.addf %462, %463 : vector<2x64xf32>
    %465 = vector.broadcast %7 : vector<1x64xf32> to vector<2x64xf32>
    %466 = arith.addf %464, %465 : vector<2x64xf32>
    %467 = vector.extract_strided_slice %466 {offsets = [0, 0], sizes = [2, 16], strides = [1, 1]} : vector<2x64xf32> to vector<2x16xf32>
    %468 = arith.negf %467 : vector<2x16xf32>
    %469 = math.exp %468 : vector<2x16xf32>
    %cst_111 = arith.constant 1.000000e+00 : f32
    %470 = vector.broadcast %cst_111 : f32 to vector<2x16xf32>
    %471 = arith.addf %470, %469 : vector<2x16xf32>
    %472 = arith.divf %470, %471 : vector<2x16xf32>
    %473 = vector.extract_strided_slice %466 {offsets = [0, 16], sizes = [2, 16], strides = [1, 1]} : vector<2x64xf32> to vector<2x16xf32>
    %474 = arith.negf %473 : vector<2x16xf32>
    %475 = math.exp %474 : vector<2x16xf32>
    %cst_112 = arith.constant 1.000000e+00 : f32
    %476 = vector.broadcast %cst_112 : f32 to vector<2x16xf32>
    %477 = arith.addf %476, %475 : vector<2x16xf32>
    %478 = arith.divf %476, %477 : vector<2x16xf32>
    %479 = vector.extract_strided_slice %466 {offsets = [0, 32], sizes = [2, 16], strides = [1, 1]} : vector<2x64xf32> to vector<2x16xf32>
    %480 = math.tanh %479 : vector<2x16xf32>
    %481 = vector.extract_strided_slice %466 {offsets = [0, 48], sizes = [2, 16], strides = [1, 1]} : vector<2x64xf32> to vector<2x16xf32>
    %482 = arith.negf %481 : vector<2x16xf32>
    %483 = math.exp %482 : vector<2x16xf32>
    %cst_113 = arith.constant 1.000000e+00 : f32
    %484 = vector.broadcast %cst_113 : f32 to vector<2x16xf32>
    %485 = arith.addf %484, %483 : vector<2x16xf32>
    %486 = arith.divf %484, %485 : vector<2x16xf32>
    %487 = arith.mulf %478, %388 : vector<2x16xf32>
    %488 = arith.mulf %472, %480 : vector<2x16xf32>
    %489 = arith.addf %487, %488 : vector<2x16xf32>
    %490 = math.tanh %489 : vector<2x16xf32>
    %491 = arith.mulf %486, %490 : vector<2x16xf32>
    %492 = vector.broadcast %8 : vector<1x16xf32> to vector<2x16xf32>
    %493 = arith.mulf %491, %492 : vector<2x16xf32>
    %494 = vector.broadcast %9 : vector<1x16xf32> to vector<2x16xf32>
    %495 = arith.addf %493, %494 : vector<2x16xf32>
    %cst_114 = arith.constant dense<0.000000e+00> : vector<2x32xf32>
    %496 = tpu.matmul %495, %10, %cst_114 {dimension_numbers = #tpu.dot_dimension_numbers<[1], [0], [0], [1], [0, 0, 1, 1], [], []>} : vector<2x16xf32>, vector<16x32xf32>, vector<2x32xf32> -> vector<2x32xf32>
    %cst_115 = arith.constant dense<0.000000e+00> : vector<2x32xf32>
    %497 = tpu.matmul %424, %11, %cst_115 {dimension_numbers = #tpu.dot_dimension_numbers<[1], [0], [0], [1], [0, 0, 1, 1], [], []>} : vector<2x8xf32>, vector<8x32xf32>, vector<2x32xf32> -> vector<2x32xf32>
    %498 = arith.addf %496, %497 : vector<2x32xf32>
    %499 = vector.broadcast %12 : vector<1x32xf32> to vector<2x32xf32>
    %500 = arith.addf %498, %499 : vector<2x32xf32>
    %501 = vector.extract_strided_slice %500 {offsets = [0, 0], sizes = [2, 8], strides = [1, 1]} : vector<2x32xf32> to vector<2x8xf32>
    %502 = arith.negf %501 : vector<2x8xf32>
    %503 = math.exp %502 : vector<2x8xf32>
    %cst_116 = arith.constant 1.000000e+00 : f32
    %504 = vector.broadcast %cst_116 : f32 to vector<2x8xf32>
    %505 = arith.addf %504, %503 : vector<2x8xf32>
    %506 = arith.divf %504, %505 : vector<2x8xf32>
    %507 = vector.extract_strided_slice %500 {offsets = [0, 8], sizes = [2, 8], strides = [1, 1]} : vector<2x32xf32> to vector<2x8xf32>
    %508 = arith.negf %507 : vector<2x8xf32>
    %509 = math.exp %508 : vector<2x8xf32>
    %cst_117 = arith.constant 1.000000e+00 : f32
    %510 = vector.broadcast %cst_117 : f32 to vector<2x8xf32>
    %511 = arith.addf %510, %509 : vector<2x8xf32>
    %512 = arith.divf %510, %511 : vector<2x8xf32>
    %513 = vector.extract_strided_slice %500 {offsets = [0, 16], sizes = [2, 8], strides = [1, 1]} : vector<2x32xf32> to vector<2x8xf32>
    %514 = math.tanh %513 : vector<2x8xf32>
    %515 = vector.extract_strided_slice %500 {offsets = [0, 24], sizes = [2, 8], strides = [1, 1]} : vector<2x32xf32> to vector<2x8xf32>
    %516 = arith.negf %515 : vector<2x8xf32>
    %517 = math.exp %516 : vector<2x8xf32>
    %cst_118 = arith.constant 1.000000e+00 : f32
    %518 = vector.broadcast %cst_118 : f32 to vector<2x8xf32>
    %519 = arith.addf %518, %517 : vector<2x8xf32>
    %520 = arith.divf %518, %519 : vector<2x8xf32>
    %521 = arith.mulf %512, %422 : vector<2x8xf32>
    %522 = arith.mulf %506, %514 : vector<2x8xf32>
    %523 = arith.addf %521, %522 : vector<2x8xf32>
    %524 = math.tanh %523 : vector<2x8xf32>
    %525 = arith.mulf %520, %524 : vector<2x8xf32>
    %c5_i32 = arith.constant 5 : i32
    %526 = arith.index_cast %c5_i32 : i32 to index
    %c0_119 = arith.constant 0 : index
    %c0_120 = arith.constant 0 : index
    %527 = vector.load %arg0[%526, %c0_119, %c0_120] : memref<8x2x3xf32, #tpu.memory_space<vmem>>, vector<1x2x3xf32>
    %528 = vector.shape_cast %527 : vector<1x2x3xf32> to vector<2x3xf32>
    %cst_121 = arith.constant dense<0.000000e+00> : vector<2x128xf32>
    %529 = tpu.matmul %528, %0, %cst_121 {dimension_numbers = #tpu.dot_dimension_numbers<[1], [0], [0], [1], [0, 0, 1, 1], [], []>} : vector<2x3xf32>, vector<3x128xf32>, vector<2x128xf32> -> vector<2x128xf32>
    %cst_122 = arith.constant dense<0.000000e+00> : vector<2x128xf32>
    %530 = tpu.matmul %457, %1, %cst_122 {dimension_numbers = #tpu.dot_dimension_numbers<[1], [0], [0], [1], [0, 0, 1, 1], [], []>} : vector<2x32xf32>, vector<32x128xf32>, vector<2x128xf32> -> vector<2x128xf32>
    %531 = arith.addf %529, %530 : vector<2x128xf32>
    %532 = vector.broadcast %2 : vector<1x128xf32> to vector<2x128xf32>
    %533 = arith.addf %531, %532 : vector<2x128xf32>
    %534 = vector.extract_strided_slice %533 {offsets = [0, 0], sizes = [2, 32], strides = [1, 1]} : vector<2x128xf32> to vector<2x32xf32>
    %535 = arith.negf %534 : vector<2x32xf32>
    %536 = math.exp %535 : vector<2x32xf32>
    %cst_123 = arith.constant 1.000000e+00 : f32
    %537 = vector.broadcast %cst_123 : f32 to vector<2x32xf32>
    %538 = arith.addf %537, %536 : vector<2x32xf32>
    %539 = arith.divf %537, %538 : vector<2x32xf32>
    %540 = vector.extract_strided_slice %533 {offsets = [0, 32], sizes = [2, 32], strides = [1, 1]} : vector<2x128xf32> to vector<2x32xf32>
    %541 = arith.negf %540 : vector<2x32xf32>
    %542 = math.exp %541 : vector<2x32xf32>
    %cst_124 = arith.constant 1.000000e+00 : f32
    %543 = vector.broadcast %cst_124 : f32 to vector<2x32xf32>
    %544 = arith.addf %543, %542 : vector<2x32xf32>
    %545 = arith.divf %543, %544 : vector<2x32xf32>
    %546 = vector.extract_strided_slice %533 {offsets = [0, 64], sizes = [2, 32], strides = [1, 1]} : vector<2x128xf32> to vector<2x32xf32>
    %547 = math.tanh %546 : vector<2x32xf32>
    %548 = vector.extract_strided_slice %533 {offsets = [0, 96], sizes = [2, 32], strides = [1, 1]} : vector<2x128xf32> to vector<2x32xf32>
    %549 = arith.negf %548 : vector<2x32xf32>
    %550 = math.exp %549 : vector<2x32xf32>
    %cst_125 = arith.constant 1.000000e+00 : f32
    %551 = vector.broadcast %cst_125 : f32 to vector<2x32xf32>
    %552 = arith.addf %551, %550 : vector<2x32xf32>
    %553 = arith.divf %551, %552 : vector<2x32xf32>
    %554 = arith.mulf %545, %455 : vector<2x32xf32>
    %555 = arith.mulf %539, %547 : vector<2x32xf32>
    %556 = arith.addf %554, %555 : vector<2x32xf32>
    %557 = math.tanh %556 : vector<2x32xf32>
    %558 = arith.mulf %553, %557 : vector<2x32xf32>
    %559 = vector.broadcast %3 : vector<1x32xf32> to vector<2x32xf32>
    %560 = arith.mulf %558, %559 : vector<2x32xf32>
    %561 = vector.broadcast %4 : vector<1x32xf32> to vector<2x32xf32>
    %562 = arith.addf %560, %561 : vector<2x32xf32>
    %cst_126 = arith.constant dense<0.000000e+00> : vector<2x64xf32>
    %563 = tpu.matmul %562, %5, %cst_126 {dimension_numbers = #tpu.dot_dimension_numbers<[1], [0], [0], [1], [0, 0, 1, 1], [], []>} : vector<2x32xf32>, vector<32x64xf32>, vector<2x64xf32> -> vector<2x64xf32>
    %cst_127 = arith.constant dense<0.000000e+00> : vector<2x64xf32>
    %564 = tpu.matmul %491, %6, %cst_127 {dimension_numbers = #tpu.dot_dimension_numbers<[1], [0], [0], [1], [0, 0, 1, 1], [], []>} : vector<2x16xf32>, vector<16x64xf32>, vector<2x64xf32> -> vector<2x64xf32>
    %565 = arith.addf %563, %564 : vector<2x64xf32>
    %566 = vector.broadcast %7 : vector<1x64xf32> to vector<2x64xf32>
    %567 = arith.addf %565, %566 : vector<2x64xf32>
    %568 = vector.extract_strided_slice %567 {offsets = [0, 0], sizes = [2, 16], strides = [1, 1]} : vector<2x64xf32> to vector<2x16xf32>
    %569 = arith.negf %568 : vector<2x16xf32>
    %570 = math.exp %569 : vector<2x16xf32>
    %cst_128 = arith.constant 1.000000e+00 : f32
    %571 = vector.broadcast %cst_128 : f32 to vector<2x16xf32>
    %572 = arith.addf %571, %570 : vector<2x16xf32>
    %573 = arith.divf %571, %572 : vector<2x16xf32>
    %574 = vector.extract_strided_slice %567 {offsets = [0, 16], sizes = [2, 16], strides = [1, 1]} : vector<2x64xf32> to vector<2x16xf32>
    %575 = arith.negf %574 : vector<2x16xf32>
    %576 = math.exp %575 : vector<2x16xf32>
    %cst_129 = arith.constant 1.000000e+00 : f32
    %577 = vector.broadcast %cst_129 : f32 to vector<2x16xf32>
    %578 = arith.addf %577, %576 : vector<2x16xf32>
    %579 = arith.divf %577, %578 : vector<2x16xf32>
    %580 = vector.extract_strided_slice %567 {offsets = [0, 32], sizes = [2, 16], strides = [1, 1]} : vector<2x64xf32> to vector<2x16xf32>
    %581 = math.tanh %580 : vector<2x16xf32>
    %582 = vector.extract_strided_slice %567 {offsets = [0, 48], sizes = [2, 16], strides = [1, 1]} : vector<2x64xf32> to vector<2x16xf32>
    %583 = arith.negf %582 : vector<2x16xf32>
    %584 = math.exp %583 : vector<2x16xf32>
    %cst_130 = arith.constant 1.000000e+00 : f32
    %585 = vector.broadcast %cst_130 : f32 to vector<2x16xf32>
    %586 = arith.addf %585, %584 : vector<2x16xf32>
    %587 = arith.divf %585, %586 : vector<2x16xf32>
    %588 = arith.mulf %579, %489 : vector<2x16xf32>
    %589 = arith.mulf %573, %581 : vector<2x16xf32>
    %590 = arith.addf %588, %589 : vector<2x16xf32>
    %591 = math.tanh %590 : vector<2x16xf32>
    %592 = arith.mulf %587, %591 : vector<2x16xf32>
    %593 = vector.broadcast %8 : vector<1x16xf32> to vector<2x16xf32>
    %594 = arith.mulf %592, %593 : vector<2x16xf32>
    %595 = vector.broadcast %9 : vector<1x16xf32> to vector<2x16xf32>
    %596 = arith.addf %594, %595 : vector<2x16xf32>
    %cst_131 = arith.constant dense<0.000000e+00> : vector<2x32xf32>
    %597 = tpu.matmul %596, %10, %cst_131 {dimension_numbers = #tpu.dot_dimension_numbers<[1], [0], [0], [1], [0, 0, 1, 1], [], []>} : vector<2x16xf32>, vector<16x32xf32>, vector<2x32xf32> -> vector<2x32xf32>
    %cst_132 = arith.constant dense<0.000000e+00> : vector<2x32xf32>
    %598 = tpu.matmul %525, %11, %cst_132 {dimension_numbers = #tpu.dot_dimension_numbers<[1], [0], [0], [1], [0, 0, 1, 1], [], []>} : vector<2x8xf32>, vector<8x32xf32>, vector<2x32xf32> -> vector<2x32xf32>
    %599 = arith.addf %597, %598 : vector<2x32xf32>
    %600 = vector.broadcast %12 : vector<1x32xf32> to vector<2x32xf32>
    %601 = arith.addf %599, %600 : vector<2x32xf32>
    %602 = vector.extract_strided_slice %601 {offsets = [0, 0], sizes = [2, 8], strides = [1, 1]} : vector<2x32xf32> to vector<2x8xf32>
    %603 = arith.negf %602 : vector<2x8xf32>
    %604 = math.exp %603 : vector<2x8xf32>
    %cst_133 = arith.constant 1.000000e+00 : f32
    %605 = vector.broadcast %cst_133 : f32 to vector<2x8xf32>
    %606 = arith.addf %605, %604 : vector<2x8xf32>
    %607 = arith.divf %605, %606 : vector<2x8xf32>
    %608 = vector.extract_strided_slice %601 {offsets = [0, 8], sizes = [2, 8], strides = [1, 1]} : vector<2x32xf32> to vector<2x8xf32>
    %609 = arith.negf %608 : vector<2x8xf32>
    %610 = math.exp %609 : vector<2x8xf32>
    %cst_134 = arith.constant 1.000000e+00 : f32
    %611 = vector.broadcast %cst_134 : f32 to vector<2x8xf32>
    %612 = arith.addf %611, %610 : vector<2x8xf32>
    %613 = arith.divf %611, %612 : vector<2x8xf32>
    %614 = vector.extract_strided_slice %601 {offsets = [0, 16], sizes = [2, 8], strides = [1, 1]} : vector<2x32xf32> to vector<2x8xf32>
    %615 = math.tanh %614 : vector<2x8xf32>
    %616 = vector.extract_strided_slice %601 {offsets = [0, 24], sizes = [2, 8], strides = [1, 1]} : vector<2x32xf32> to vector<2x8xf32>
    %617 = arith.negf %616 : vector<2x8xf32>
    %618 = math.exp %617 : vector<2x8xf32>
    %cst_135 = arith.constant 1.000000e+00 : f32
    %619 = vector.broadcast %cst_135 : f32 to vector<2x8xf32>
    %620 = arith.addf %619, %618 : vector<2x8xf32>
    %621 = arith.divf %619, %620 : vector<2x8xf32>
    %622 = arith.mulf %613, %523 : vector<2x8xf32>
    %623 = arith.mulf %607, %615 : vector<2x8xf32>
    %624 = arith.addf %622, %623 : vector<2x8xf32>
    %625 = math.tanh %624 : vector<2x8xf32>
    %626 = arith.mulf %621, %625 : vector<2x8xf32>
    %c6_i32 = arith.constant 6 : i32
    %627 = arith.index_cast %c6_i32 : i32 to index
    %c0_136 = arith.constant 0 : index
    %c0_137 = arith.constant 0 : index
    %628 = vector.load %arg0[%627, %c0_136, %c0_137] : memref<8x2x3xf32, #tpu.memory_space<vmem>>, vector<1x2x3xf32>
    %629 = vector.shape_cast %628 : vector<1x2x3xf32> to vector<2x3xf32>
    %cst_138 = arith.constant dense<0.000000e+00> : vector<2x128xf32>
    %630 = tpu.matmul %629, %0, %cst_138 {dimension_numbers = #tpu.dot_dimension_numbers<[1], [0], [0], [1], [0, 0, 1, 1], [], []>} : vector<2x3xf32>, vector<3x128xf32>, vector<2x128xf32> -> vector<2x128xf32>
    %cst_139 = arith.constant dense<0.000000e+00> : vector<2x128xf32>
    %631 = tpu.matmul %558, %1, %cst_139 {dimension_numbers = #tpu.dot_dimension_numbers<[1], [0], [0], [1], [0, 0, 1, 1], [], []>} : vector<2x32xf32>, vector<32x128xf32>, vector<2x128xf32> -> vector<2x128xf32>
    %632 = arith.addf %630, %631 : vector<2x128xf32>
    %633 = vector.broadcast %2 : vector<1x128xf32> to vector<2x128xf32>
    %634 = arith.addf %632, %633 : vector<2x128xf32>
    %635 = vector.extract_strided_slice %634 {offsets = [0, 0], sizes = [2, 32], strides = [1, 1]} : vector<2x128xf32> to vector<2x32xf32>
    %636 = arith.negf %635 : vector<2x32xf32>
    %637 = math.exp %636 : vector<2x32xf32>
    %cst_140 = arith.constant 1.000000e+00 : f32
    %638 = vector.broadcast %cst_140 : f32 to vector<2x32xf32>
    %639 = arith.addf %638, %637 : vector<2x32xf32>
    %640 = arith.divf %638, %639 : vector<2x32xf32>
    %641 = vector.extract_strided_slice %634 {offsets = [0, 32], sizes = [2, 32], strides = [1, 1]} : vector<2x128xf32> to vector<2x32xf32>
    %642 = arith.negf %641 : vector<2x32xf32>
    %643 = math.exp %642 : vector<2x32xf32>
    %cst_141 = arith.constant 1.000000e+00 : f32
    %644 = vector.broadcast %cst_141 : f32 to vector<2x32xf32>
    %645 = arith.addf %644, %643 : vector<2x32xf32>
    %646 = arith.divf %644, %645 : vector<2x32xf32>
    %647 = vector.extract_strided_slice %634 {offsets = [0, 64], sizes = [2, 32], strides = [1, 1]} : vector<2x128xf32> to vector<2x32xf32>
    %648 = math.tanh %647 : vector<2x32xf32>
    %649 = vector.extract_strided_slice %634 {offsets = [0, 96], sizes = [2, 32], strides = [1, 1]} : vector<2x128xf32> to vector<2x32xf32>
    %650 = arith.negf %649 : vector<2x32xf32>
    %651 = math.exp %650 : vector<2x32xf32>
    %cst_142 = arith.constant 1.000000e+00 : f32
    %652 = vector.broadcast %cst_142 : f32 to vector<2x32xf32>
    %653 = arith.addf %652, %651 : vector<2x32xf32>
    %654 = arith.divf %652, %653 : vector<2x32xf32>
    %655 = arith.mulf %646, %556 : vector<2x32xf32>
    %656 = arith.mulf %640, %648 : vector<2x32xf32>
    %657 = arith.addf %655, %656 : vector<2x32xf32>
    %658 = math.tanh %657 : vector<2x32xf32>
    %659 = arith.mulf %654, %658 : vector<2x32xf32>
    %660 = vector.broadcast %3 : vector<1x32xf32> to vector<2x32xf32>
    %661 = arith.mulf %659, %660 : vector<2x32xf32>
    %662 = vector.broadcast %4 : vector<1x32xf32> to vector<2x32xf32>
    %663 = arith.addf %661, %662 : vector<2x32xf32>
    %cst_143 = arith.constant dense<0.000000e+00> : vector<2x64xf32>
    %664 = tpu.matmul %663, %5, %cst_143 {dimension_numbers = #tpu.dot_dimension_numbers<[1], [0], [0], [1], [0, 0, 1, 1], [], []>} : vector<2x32xf32>, vector<32x64xf32>, vector<2x64xf32> -> vector<2x64xf32>
    %cst_144 = arith.constant dense<0.000000e+00> : vector<2x64xf32>
    %665 = tpu.matmul %592, %6, %cst_144 {dimension_numbers = #tpu.dot_dimension_numbers<[1], [0], [0], [1], [0, 0, 1, 1], [], []>} : vector<2x16xf32>, vector<16x64xf32>, vector<2x64xf32> -> vector<2x64xf32>
    %666 = arith.addf %664, %665 : vector<2x64xf32>
    %667 = vector.broadcast %7 : vector<1x64xf32> to vector<2x64xf32>
    %668 = arith.addf %666, %667 : vector<2x64xf32>
    %669 = vector.extract_strided_slice %668 {offsets = [0, 0], sizes = [2, 16], strides = [1, 1]} : vector<2x64xf32> to vector<2x16xf32>
    %670 = arith.negf %669 : vector<2x16xf32>
    %671 = math.exp %670 : vector<2x16xf32>
    %cst_145 = arith.constant 1.000000e+00 : f32
    %672 = vector.broadcast %cst_145 : f32 to vector<2x16xf32>
    %673 = arith.addf %672, %671 : vector<2x16xf32>
    %674 = arith.divf %672, %673 : vector<2x16xf32>
    %675 = vector.extract_strided_slice %668 {offsets = [0, 16], sizes = [2, 16], strides = [1, 1]} : vector<2x64xf32> to vector<2x16xf32>
    %676 = arith.negf %675 : vector<2x16xf32>
    %677 = math.exp %676 : vector<2x16xf32>
    %cst_146 = arith.constant 1.000000e+00 : f32
    %678 = vector.broadcast %cst_146 : f32 to vector<2x16xf32>
    %679 = arith.addf %678, %677 : vector<2x16xf32>
    %680 = arith.divf %678, %679 : vector<2x16xf32>
    %681 = vector.extract_strided_slice %668 {offsets = [0, 32], sizes = [2, 16], strides = [1, 1]} : vector<2x64xf32> to vector<2x16xf32>
    %682 = math.tanh %681 : vector<2x16xf32>
    %683 = vector.extract_strided_slice %668 {offsets = [0, 48], sizes = [2, 16], strides = [1, 1]} : vector<2x64xf32> to vector<2x16xf32>
    %684 = arith.negf %683 : vector<2x16xf32>
    %685 = math.exp %684 : vector<2x16xf32>
    %cst_147 = arith.constant 1.000000e+00 : f32
    %686 = vector.broadcast %cst_147 : f32 to vector<2x16xf32>
    %687 = arith.addf %686, %685 : vector<2x16xf32>
    %688 = arith.divf %686, %687 : vector<2x16xf32>
    %689 = arith.mulf %680, %590 : vector<2x16xf32>
    %690 = arith.mulf %674, %682 : vector<2x16xf32>
    %691 = arith.addf %689, %690 : vector<2x16xf32>
    %692 = math.tanh %691 : vector<2x16xf32>
    %693 = arith.mulf %688, %692 : vector<2x16xf32>
    %694 = vector.broadcast %8 : vector<1x16xf32> to vector<2x16xf32>
    %695 = arith.mulf %693, %694 : vector<2x16xf32>
    %696 = vector.broadcast %9 : vector<1x16xf32> to vector<2x16xf32>
    %697 = arith.addf %695, %696 : vector<2x16xf32>
    %cst_148 = arith.constant dense<0.000000e+00> : vector<2x32xf32>
    %698 = tpu.matmul %697, %10, %cst_148 {dimension_numbers = #tpu.dot_dimension_numbers<[1], [0], [0], [1], [0, 0, 1, 1], [], []>} : vector<2x16xf32>, vector<16x32xf32>, vector<2x32xf32> -> vector<2x32xf32>
    %cst_149 = arith.constant dense<0.000000e+00> : vector<2x32xf32>
    %699 = tpu.matmul %626, %11, %cst_149 {dimension_numbers = #tpu.dot_dimension_numbers<[1], [0], [0], [1], [0, 0, 1, 1], [], []>} : vector<2x8xf32>, vector<8x32xf32>, vector<2x32xf32> -> vector<2x32xf32>
    %700 = arith.addf %698, %699 : vector<2x32xf32>
    %701 = vector.broadcast %12 : vector<1x32xf32> to vector<2x32xf32>
    %702 = arith.addf %700, %701 : vector<2x32xf32>
    %703 = vector.extract_strided_slice %702 {offsets = [0, 0], sizes = [2, 8], strides = [1, 1]} : vector<2x32xf32> to vector<2x8xf32>
    %704 = arith.negf %703 : vector<2x8xf32>
    %705 = math.exp %704 : vector<2x8xf32>
    %cst_150 = arith.constant 1.000000e+00 : f32
    %706 = vector.broadcast %cst_150 : f32 to vector<2x8xf32>
    %707 = arith.addf %706, %705 : vector<2x8xf32>
    %708 = arith.divf %706, %707 : vector<2x8xf32>
    %709 = vector.extract_strided_slice %702 {offsets = [0, 8], sizes = [2, 8], strides = [1, 1]} : vector<2x32xf32> to vector<2x8xf32>
    %710 = arith.negf %709 : vector<2x8xf32>
    %711 = math.exp %710 : vector<2x8xf32>
    %cst_151 = arith.constant 1.000000e+00 : f32
    %712 = vector.broadcast %cst_151 : f32 to vector<2x8xf32>
    %713 = arith.addf %712, %711 : vector<2x8xf32>
    %714 = arith.divf %712, %713 : vector<2x8xf32>
    %715 = vector.extract_strided_slice %702 {offsets = [0, 16], sizes = [2, 8], strides = [1, 1]} : vector<2x32xf32> to vector<2x8xf32>
    %716 = math.tanh %715 : vector<2x8xf32>
    %717 = vector.extract_strided_slice %702 {offsets = [0, 24], sizes = [2, 8], strides = [1, 1]} : vector<2x32xf32> to vector<2x8xf32>
    %718 = arith.negf %717 : vector<2x8xf32>
    %719 = math.exp %718 : vector<2x8xf32>
    %cst_152 = arith.constant 1.000000e+00 : f32
    %720 = vector.broadcast %cst_152 : f32 to vector<2x8xf32>
    %721 = arith.addf %720, %719 : vector<2x8xf32>
    %722 = arith.divf %720, %721 : vector<2x8xf32>
    %723 = arith.mulf %714, %624 : vector<2x8xf32>
    %724 = arith.mulf %708, %716 : vector<2x8xf32>
    %725 = arith.addf %723, %724 : vector<2x8xf32>
    %726 = math.tanh %725 : vector<2x8xf32>
    %727 = arith.mulf %722, %726 : vector<2x8xf32>
    %c7_i32 = arith.constant 7 : i32
    %728 = arith.index_cast %c7_i32 : i32 to index
    %c0_153 = arith.constant 0 : index
    %c0_154 = arith.constant 0 : index
    %729 = vector.load %arg0[%728, %c0_153, %c0_154] : memref<8x2x3xf32, #tpu.memory_space<vmem>>, vector<1x2x3xf32>
    %730 = vector.shape_cast %729 : vector<1x2x3xf32> to vector<2x3xf32>
    %cst_155 = arith.constant dense<0.000000e+00> : vector<2x128xf32>
    %731 = tpu.matmul %730, %0, %cst_155 {dimension_numbers = #tpu.dot_dimension_numbers<[1], [0], [0], [1], [0, 0, 1, 1], [], []>} : vector<2x3xf32>, vector<3x128xf32>, vector<2x128xf32> -> vector<2x128xf32>
    %cst_156 = arith.constant dense<0.000000e+00> : vector<2x128xf32>
    %732 = tpu.matmul %659, %1, %cst_156 {dimension_numbers = #tpu.dot_dimension_numbers<[1], [0], [0], [1], [0, 0, 1, 1], [], []>} : vector<2x32xf32>, vector<32x128xf32>, vector<2x128xf32> -> vector<2x128xf32>
    %733 = arith.addf %731, %732 : vector<2x128xf32>
    %734 = vector.broadcast %2 : vector<1x128xf32> to vector<2x128xf32>
    %735 = arith.addf %733, %734 : vector<2x128xf32>
    %736 = vector.extract_strided_slice %735 {offsets = [0, 0], sizes = [2, 32], strides = [1, 1]} : vector<2x128xf32> to vector<2x32xf32>
    %737 = arith.negf %736 : vector<2x32xf32>
    %738 = math.exp %737 : vector<2x32xf32>
    %cst_157 = arith.constant 1.000000e+00 : f32
    %739 = vector.broadcast %cst_157 : f32 to vector<2x32xf32>
    %740 = arith.addf %739, %738 : vector<2x32xf32>
    %741 = arith.divf %739, %740 : vector<2x32xf32>
    %742 = vector.extract_strided_slice %735 {offsets = [0, 32], sizes = [2, 32], strides = [1, 1]} : vector<2x128xf32> to vector<2x32xf32>
    %743 = arith.negf %742 : vector<2x32xf32>
    %744 = math.exp %743 : vector<2x32xf32>
    %cst_158 = arith.constant 1.000000e+00 : f32
    %745 = vector.broadcast %cst_158 : f32 to vector<2x32xf32>
    %746 = arith.addf %745, %744 : vector<2x32xf32>
    %747 = arith.divf %745, %746 : vector<2x32xf32>
    %748 = vector.extract_strided_slice %735 {offsets = [0, 64], sizes = [2, 32], strides = [1, 1]} : vector<2x128xf32> to vector<2x32xf32>
    %749 = math.tanh %748 : vector<2x32xf32>
    %750 = vector.extract_strided_slice %735 {offsets = [0, 96], sizes = [2, 32], strides = [1, 1]} : vector<2x128xf32> to vector<2x32xf32>
    %751 = arith.negf %750 : vector<2x32xf32>
    %752 = math.exp %751 : vector<2x32xf32>
    %cst_159 = arith.constant 1.000000e+00 : f32
    %753 = vector.broadcast %cst_159 : f32 to vector<2x32xf32>
    %754 = arith.addf %753, %752 : vector<2x32xf32>
    %755 = arith.divf %753, %754 : vector<2x32xf32>
    %756 = arith.mulf %747, %657 : vector<2x32xf32>
    %757 = arith.mulf %741, %749 : vector<2x32xf32>
    %758 = arith.addf %756, %757 : vector<2x32xf32>
    %759 = math.tanh %758 : vector<2x32xf32>
    %760 = arith.mulf %755, %759 : vector<2x32xf32>
    %761 = vector.broadcast %3 : vector<1x32xf32> to vector<2x32xf32>
    %762 = arith.mulf %760, %761 : vector<2x32xf32>
    %763 = vector.broadcast %4 : vector<1x32xf32> to vector<2x32xf32>
    %764 = arith.addf %762, %763 : vector<2x32xf32>
    %cst_160 = arith.constant dense<0.000000e+00> : vector<2x64xf32>
    %765 = tpu.matmul %764, %5, %cst_160 {dimension_numbers = #tpu.dot_dimension_numbers<[1], [0], [0], [1], [0, 0, 1, 1], [], []>} : vector<2x32xf32>, vector<32x64xf32>, vector<2x64xf32> -> vector<2x64xf32>
    %cst_161 = arith.constant dense<0.000000e+00> : vector<2x64xf32>
    %766 = tpu.matmul %693, %6, %cst_161 {dimension_numbers = #tpu.dot_dimension_numbers<[1], [0], [0], [1], [0, 0, 1, 1], [], []>} : vector<2x16xf32>, vector<16x64xf32>, vector<2x64xf32> -> vector<2x64xf32>
    %767 = arith.addf %765, %766 : vector<2x64xf32>
    %768 = vector.broadcast %7 : vector<1x64xf32> to vector<2x64xf32>
    %769 = arith.addf %767, %768 : vector<2x64xf32>
    %770 = vector.extract_strided_slice %769 {offsets = [0, 0], sizes = [2, 16], strides = [1, 1]} : vector<2x64xf32> to vector<2x16xf32>
    %771 = arith.negf %770 : vector<2x16xf32>
    %772 = math.exp %771 : vector<2x16xf32>
    %cst_162 = arith.constant 1.000000e+00 : f32
    %773 = vector.broadcast %cst_162 : f32 to vector<2x16xf32>
    %774 = arith.addf %773, %772 : vector<2x16xf32>
    %775 = arith.divf %773, %774 : vector<2x16xf32>
    %776 = vector.extract_strided_slice %769 {offsets = [0, 16], sizes = [2, 16], strides = [1, 1]} : vector<2x64xf32> to vector<2x16xf32>
    %777 = arith.negf %776 : vector<2x16xf32>
    %778 = math.exp %777 : vector<2x16xf32>
    %cst_163 = arith.constant 1.000000e+00 : f32
    %779 = vector.broadcast %cst_163 : f32 to vector<2x16xf32>
    %780 = arith.addf %779, %778 : vector<2x16xf32>
    %781 = arith.divf %779, %780 : vector<2x16xf32>
    %782 = vector.extract_strided_slice %769 {offsets = [0, 32], sizes = [2, 16], strides = [1, 1]} : vector<2x64xf32> to vector<2x16xf32>
    %783 = math.tanh %782 : vector<2x16xf32>
    %784 = vector.extract_strided_slice %769 {offsets = [0, 48], sizes = [2, 16], strides = [1, 1]} : vector<2x64xf32> to vector<2x16xf32>
    %785 = arith.negf %784 : vector<2x16xf32>
    %786 = math.exp %785 : vector<2x16xf32>
    %cst_164 = arith.constant 1.000000e+00 : f32
    %787 = vector.broadcast %cst_164 : f32 to vector<2x16xf32>
    %788 = arith.addf %787, %786 : vector<2x16xf32>
    %789 = arith.divf %787, %788 : vector<2x16xf32>
    %790 = arith.mulf %781, %691 : vector<2x16xf32>
    %791 = arith.mulf %775, %783 : vector<2x16xf32>
    %792 = arith.addf %790, %791 : vector<2x16xf32>
    %793 = math.tanh %792 : vector<2x16xf32>
    %794 = arith.mulf %789, %793 : vector<2x16xf32>
    %795 = vector.broadcast %8 : vector<1x16xf32> to vector<2x16xf32>
    %796 = arith.mulf %794, %795 : vector<2x16xf32>
    %797 = vector.broadcast %9 : vector<1x16xf32> to vector<2x16xf32>
    %798 = arith.addf %796, %797 : vector<2x16xf32>
    %cst_165 = arith.constant dense<0.000000e+00> : vector<2x32xf32>
    %799 = tpu.matmul %798, %10, %cst_165 {dimension_numbers = #tpu.dot_dimension_numbers<[1], [0], [0], [1], [0, 0, 1, 1], [], []>} : vector<2x16xf32>, vector<16x32xf32>, vector<2x32xf32> -> vector<2x32xf32>
    %cst_166 = arith.constant dense<0.000000e+00> : vector<2x32xf32>
    %800 = tpu.matmul %727, %11, %cst_166 {dimension_numbers = #tpu.dot_dimension_numbers<[1], [0], [0], [1], [0, 0, 1, 1], [], []>} : vector<2x8xf32>, vector<8x32xf32>, vector<2x32xf32> -> vector<2x32xf32>
    %801 = arith.addf %799, %800 : vector<2x32xf32>
    %802 = vector.broadcast %12 : vector<1x32xf32> to vector<2x32xf32>
    %803 = arith.addf %801, %802 : vector<2x32xf32>
    %804 = vector.extract_strided_slice %803 {offsets = [0, 0], sizes = [2, 8], strides = [1, 1]} : vector<2x32xf32> to vector<2x8xf32>
    %805 = arith.negf %804 : vector<2x8xf32>
    %806 = math.exp %805 : vector<2x8xf32>
    %cst_167 = arith.constant 1.000000e+00 : f32
    %807 = vector.broadcast %cst_167 : f32 to vector<2x8xf32>
    %808 = arith.addf %807, %806 : vector<2x8xf32>
    %809 = arith.divf %807, %808 : vector<2x8xf32>
    %810 = vector.extract_strided_slice %803 {offsets = [0, 8], sizes = [2, 8], strides = [1, 1]} : vector<2x32xf32> to vector<2x8xf32>
    %811 = arith.negf %810 : vector<2x8xf32>
    %812 = math.exp %811 : vector<2x8xf32>
    %cst_168 = arith.constant 1.000000e+00 : f32
    %813 = vector.broadcast %cst_168 : f32 to vector<2x8xf32>
    %814 = arith.addf %813, %812 : vector<2x8xf32>
    %815 = arith.divf %813, %814 : vector<2x8xf32>
    %816 = vector.extract_strided_slice %803 {offsets = [0, 16], sizes = [2, 8], strides = [1, 1]} : vector<2x32xf32> to vector<2x8xf32>
    %817 = math.tanh %816 : vector<2x8xf32>
    %818 = vector.extract_strided_slice %803 {offsets = [0, 24], sizes = [2, 8], strides = [1, 1]} : vector<2x32xf32> to vector<2x8xf32>
    %819 = arith.negf %818 : vector<2x8xf32>
    %820 = math.exp %819 : vector<2x8xf32>
    %cst_169 = arith.constant 1.000000e+00 : f32
    %821 = vector.broadcast %cst_169 : f32 to vector<2x8xf32>
    %822 = arith.addf %821, %820 : vector<2x8xf32>
    %823 = arith.divf %821, %822 : vector<2x8xf32>
    %824 = arith.mulf %815, %725 : vector<2x8xf32>
    %825 = arith.mulf %809, %817 : vector<2x8xf32>
    %826 = arith.addf %824, %825 : vector<2x8xf32>
    %827 = math.tanh %826 : vector<2x8xf32>
    %828 = arith.mulf %823, %827 : vector<2x8xf32>
    %c8_i32 = arith.constant 8 : i32
    %829 = vector.broadcast %13 : vector<1x8xf32> to vector<2x8xf32>
    %830 = arith.mulf %828, %829 : vector<2x8xf32>
    %831 = vector.broadcast %14 : vector<1x8xf32> to vector<2x8xf32>
    %832 = arith.addf %830, %831 : vector<2x8xf32>
    %c0_170 = arith.constant 0 : index
    %c0_171 = arith.constant 0 : index
    %833 = vector.load %arg16[%c0_170, %c0_171] : memref<8x3xf32, #tpu.memory_space<vmem>>, vector<8x3xf32>
    %cst_172 = arith.constant dense<0.000000e+00> : vector<2x3xf32>
    %834 = tpu.matmul %832, %833, %cst_172 {dimension_numbers = #tpu.dot_dimension_numbers<[1], [0], [0], [1], [0, 0, 1, 1], [], []>} : vector<2x8xf32>, vector<8x3xf32>, vector<2x3xf32> -> vector<2x3xf32>
    %c0_173 = arith.constant 0 : index
    %c0_174 = arith.constant 0 : index
    %835 = vector.load %arg17[%c0_173, %c0_174] : memref<1x3xf32, #tpu.memory_space<vmem>>, vector<1x3xf32>
    %836 = vector.broadcast %835 : vector<1x3xf32> to vector<2x3xf32>
    %837 = arith.addf %834, %836 : vector<2x3xf32>
    %c0_175 = arith.constant 0 : index
    %c0_176 = arith.constant 0 : index
    %838 = vector.load %arg18[%c0_175, %c0_176] : memref<2x3xf32, #tpu.memory_space<vmem>>, vector<2x3xf32>
    tpu.vector_store %arg18[%c0_175, %c0_176], %837 {strides = array<i32>} : memref<2x3xf32, #tpu.memory_space<vmem>>, vector<2x3xf32>,
    return
  }
}

</mosaic_0001>

<bundles_post_ra>
// kernel: tpu_custom_call.1
= control target key start
LH: loop header
LB: loop body
LE: loop exit
PB: predicated region body
PF: predicated region fallthrough
CT: control target
= control target key end

     0   :  { %s6568_s0 = inlined_call_operand.vmem [shape: f32[8,2,3], index: 0, kind: input, shape index: {}]   ;;  %s6569_s1 = inlined_call_operand.hbm [shape: f32[3,128], index: 1, kind: input, shape index: {}]   ;;  %s6570_s2 = inlined_call_operand.vmem [shape: f32[32,128], index: 2, kind: input, shape index: {}]   ;;  %s6571_s3 = inlined_call_operand.hbm [shape: f32[1,128], index: 3, kind: input, shape index: {}]   ;;  %s6572_s4 = inlined_call_operand.hbm [shape: f32[1,32], index: 4, kind: input, shape index: {}]   ;;  %s6573_s5 = inlined_call_operand.hbm [shape: f32[1,32], index: 5, kind: input, shape index: {}]   ;;  %s6574_s6 = inlined_call_operand.hbm [shape: f32[32,64], index: 6, kind: input, shape index: {}]   ;;  %s6575_s7 = inlined_call_operand.vmem [shape: f32[16,64], index: 7, kind: input, shape index: {}]   ;;  %s6576_s8 = inlined_call_operand.hbm [shape: f32[1,64], index: 8, kind: input, shape index: {}]   ;;  %s6577_s9 = inlined_call_operand.vmem [shape: f32[1,16], index: 9, kind: input, shape index: {}]   ;;  %s6578_s10 = inlined_call_operand.vmem [shape: f32[1,16], index: 10, kind: input, shape index: {}]   ;;  %s6579_s11 = inlined_call_operand.vmem [shape: f32[16,32], index: 11, kind: input, shape index: {}]   ;;  %s6580_s12 = inlined_call_operand.vmem [shape: f32[8,32], index: 12, kind: input, shape index: {}]   ;;  %s6581_s13 = inlined_call_operand.vmem [shape: f32[1,32], index: 13, kind: input, shape index: {}]   ;;  %s6582_s14 = inlined_call_operand.vmem [shape: f32[1,8], index: 14, kind: input, shape index: {}]   ;;  %s6583_s15 = inlined_call_operand.vmem [shape: f32[1,8], index: 15, kind: input, shape index: {}]   ;;  %s6584_s16 = inlined_call_operand.vmem [shape: f32[8,3], index: 16, kind: input, shape index: {}]   ;;  %s6585_s17 = inlined_call_operand.vmem [shape: f32[1,3], index: 17, kind: input, shape index: {}]   ;;  %s6586_s18 = inlined_call_operand.hbm [shape: f32[2,3], index: 18, kind: output, shape index: {}]  }
   0x1   :  { %6590 = sst [smem:[#allocation19_spill]] %s6568_s0 }
   0x2   :  { %6591 = sst [smem:[#allocation20_spill]] %s6569_s1 }
   0x3   :  { %6592 = sst [smem:[#allocation21_spill]] %s6570_s2 }
   0x4   :  { %23 = vsyncpa [#allocation3], 0 }
   0x5   :  { %24 = vsyncpa [#allocation6], 0 }
   0x6   :  { %25 = vsyncpa [#allocation9], 0 }
   0x7   :  { %26 = vsyncpa [#allocation12], 0 }
   0x8   :  { %27 = vsyncpa [#allocation4], 0  ;;  %s5713_s27 = smov [#allocation5]   ;;  %s5714_s29 = smov [#allocation8]  }
   0x9   :  { %s48_s28 = sshll.u32 %s5713_s27, 4  ;;  %s68_s30 = sshll.u32 %s5714_s29, 4  ;;  %s49_s28 = int_to_ptr.vmem [resolvable:$true] %s48_s28  ;;  %s69_s30 = int_to_ptr.vmem [resolvable:$true] %s68_s30 }
   0xa   :  { %s5549_s1 = scalar_lea.hbm %s6571_s3, 16 }
   0xb   :  { %p5550_p0 = scmp.ne.s32.totalorder %s6571_s3, %s5549_s1  ;;  %p5553_p1 = scmp.lt.u32.totalorder %s5549_s1, %s6571_s3 }
   0xd   :  { %p5555_p2 = pnand %p5553_p1, %p5550_p0 }
   0xf   :  { %5558 = shalt.err (!%p5555_p2)
}
  0x10   :  { %s5559_s23 = scalar_lea.vmem %s49_s28, 16  ;;  %s5563_s24 = scalar_lea.vmem %s49_s28, 32 }
  0x11   :  { %p5560_p3 = scmp.ne.s32.totalorder %s49_s28, %s5559_s23  ;;  %p5564_p4 = scmp.lt.s32.totalorder %s49_s28, %s49_s28 }
  0x12   :  { %p5565_p5 = scmp.lt.s32.totalorder %s5563_s24, %s5559_s23 }
  0x14   :  { %p5566_p6 = por %p5565_p5, %p5564_p4 }
  0x16   :  { %p5567_p7 = pnand %p5566_p6, %p5560_p3 }
  0x18   :  { %5570 = shalt.err (!%p5567_p7)
}
  0x19   :  { %51 = dma.hbm_to_vmem [thread:$0]  %s6571_s3, 16, %s49_s28, [#allocation6]  }
  0x1a   :  { %s5571_s0 = scalar_lea.hbm %s6573_s5, 16 }
  0x1b   :  { %p5572_p8 = scmp.ne.s32.totalorder %s6573_s5, %s5571_s0  ;;  %p5575_p9 = scmp.lt.u32.totalorder %s5571_s0, %s6573_s5 }
  0x1d   :  { %p5577_p10 = pnand %p5575_p9, %p5572_p8 }
  0x1f   :  { %5580 = shalt.err (!%p5577_p10)
}
  0x20   :  { %s5581_s22 = scalar_lea.vmem %s69_s30, 16  ;;  %s5585_s2 = scalar_lea.vmem %s69_s30, 32 }
  0x21   :  { %p5582_p11 = scmp.ne.s32.totalorder %s69_s30, %s5581_s22  ;;  %p5586_p12 = scmp.lt.s32.totalorder %s69_s30, %s69_s30 }
  0x22   :  { %p5587_p13 = scmp.lt.s32.totalorder %s5585_s2, %s5581_s22 }
  0x24   :  { %p5588_p0 = por %p5587_p13, %p5586_p12 }
  0x26   :  { %p5589_p1 = pnand %p5588_p0, %p5582_p11 }
  0x28   :  { %5592 = shalt.err (!%p5589_p1)
}
  0x29   :  { %71 = dma.hbm_to_vmem [thread:$0]  %s6573_s5, 16, %s69_s30, [#allocation9]  }
  0x2a   :  { %s5715_s23 = smov [#allocation2]   ;;  %s5716_s25 = smov [#allocation7]  }
  0x2b   :  { %s36_s24 = sshll.u32 %s5715_s23, 4  ;;  %s58_s26 = sshll.u32 %s5716_s25, 4  ;;  %s37_s24 = int_to_ptr.vmem [resolvable:$true] %s36_s24  ;;  %s59_s26 = int_to_ptr.vmem [resolvable:$true] %s58_s26 }
  0x2c   :  { %s6593_s0 = sld [smem:[#allocation20_spill]] }
  0x32   :  { %s5593_s19 = scalar_lea.hbm %s6593_s0, 64 }
  0x33   :  { %p5594_p2 = scmp.ne.s32.totalorder %s6593_s0, %s5593_s19  ;;  %p5597_p3 = scmp.lt.u32.totalorder %s5593_s19, %s6593_s0 }
  0x35   :  { %p5599_p4 = pnand %p5597_p3, %p5594_p2 }
  0x37   :  { %5602 = shalt.err (!%p5599_p4)
}
  0x38   :  { %s5603_s5 = scalar_lea.vmem %s37_s24, 64  ;;  %p5608_p6 = scmp.lt.s32.totalorder %s37_s24, %s37_s24 }
  0x39   :  { %p5604_p5 = scmp.ne.s32.totalorder %s37_s24, %s5603_s5  ;;  %p5609_p7 = scmp.lt.s32.totalorder %s5603_s5, %s5603_s5 }
  0x3b   :  { %p5610_p8 = por %p5609_p7, %p5608_p6 }
  0x3d   :  { %p5611_p9 = pnand %p5610_p8, %p5604_p5 }
  0x3f   :  { %5614 = shalt.err (!%p5611_p9)
}
  0x40   :  { %39 = dma.hbm_to_vmem [thread:$0]  %s6593_s0, 64, %s37_s24, [#allocation3]  }
  0x41   :  { %s5615_s23 = scalar_lea.hbm %s6572_s4, 16 }
  0x42   :  { %p5616_p10 = scmp.ne.s32.totalorder %s6572_s4, %s5615_s23  ;;  %p5619_p11 = scmp.lt.u32.totalorder %s5615_s23, %s6572_s4 }
  0x44   :  { %p5621_p12 = pnand %p5619_p11, %p5616_p10 }
  0x46   :  { %5624 = shalt.err (!%p5621_p12)
}
  0x47   :  { %s5625_s1 = scalar_lea.vmem %s59_s26, 16  ;;  %s5629_s20 = scalar_lea.vmem %s59_s26, 32 }
  0x48   :  { %p5626_p13 = scmp.ne.s32.totalorder %s59_s26, %s5625_s1  ;;  %p5630_p0 = scmp.lt.s32.totalorder %s59_s26, %s59_s26 }
  0x49   :  { %p5631_p1 = scmp.lt.s32.totalorder %s5629_s20, %s5625_s1 }
  0x4b   :  { %p5632_p2 = por %p5631_p1, %p5630_p0 }
  0x4d   :  { %p5633_p3 = pnand %p5632_p2, %p5626_p13 }
  0x4f   :  { %5636 = shalt.err (!%p5633_p3)
}
  0x50   :  { %61 = dma.hbm_to_vmem [thread:$0]  %s6572_s4, 16, %s59_s26, [#allocation6]  }
  0x51   :  { %s5717_s21 = smov [#allocation10]   ;;  %s5637_s2 = scalar_lea.hbm %s6574_s6, 512 }
  0x52   :  { %s77_s22 = sshll.u32 %s5717_s21, 4  ;;  %p5638_p4 = scmp.ne.s32.totalorder %s6574_s6, %s5637_s2  ;;  %s78_s22 = int_to_ptr.vmem [resolvable:$true] %s77_s22 }
  0x53   :  { %p5641_p5 = scmp.lt.u32.totalorder %s5637_s2, %s6574_s6 }
  0x55   :  { %p5643_p6 = pnand %p5641_p5, %p5638_p4 }
  0x57   :  { %5646 = shalt.err (!%p5643_p6)
}
  0x58   :  { %s5647_s27 = scalar_lea.vmem %s78_s22, 512  ;;  %p5652_p8 = scmp.lt.s32.totalorder %s78_s22, %s78_s22 }
  0x59   :  { %p5648_p7 = scmp.ne.s32.totalorder %s78_s22, %s5647_s27  ;;  %p5653_p9 = scmp.lt.s32.totalorder %s5647_s27, %s5647_s27 }
  0x5b   :  { %p5654_p10 = por %p5653_p9, %p5652_p8 }
  0x5d   :  { %p5655_p11 = pnand %p5654_p10, %p5648_p7 }
  0x5f   :  { %5658 = shalt.err (!%p5655_p11)
}
  0x60   :  { %s5718_s4 = smov 128   ;;  %s5719_s26 = smov 8  }
  0x61   :  { %83 = dma.hbm_to_vmem [thread:$0]  %s6574_s6, 512, %s78_s22, [#allocation9], %s5718_s4, %s5718_s4, %s5719_s26  }
  0x62   :  { %s5720_s1 = smov [#allocation11]   ;;  %s5659_s21 = scalar_lea.hbm %s6576_s8, 16 }
  0x63   :  { %s92_s20 = sshll.u32 %s5720_s1, 4  ;;  %p5660_p12 = scmp.ne.s32.totalorder %s6576_s8, %s5659_s21  ;;  %s93_s20 = int_to_ptr.vmem [resolvable:$true] %s92_s20 }
  0x64   :  { %p5663_p13 = scmp.lt.u32.totalorder %s5659_s21, %s6576_s8 }
  0x66   :  { %p5665_p0 = pnand %p5663_p13, %p5660_p12 }
  0x68   :  { %5668 = shalt.err (!%p5665_p0)
}
  0x69   :  { %s5669_s28 = scalar_lea.vmem %s93_s20, 16  ;;  %s5673_s6 = scalar_lea.vmem %s93_s20, 32 }
  0x6a   :  { %p5670_p1 = scmp.ne.s32.totalorder %s93_s20, %s5669_s28  ;;  %p5674_p2 = scmp.lt.s32.totalorder %s93_s20, %s93_s20 }
  0x6b   :  { %p5675_p3 = scmp.lt.s32.totalorder %s5673_s6, %s5669_s28 }
  0x6d   :  { %p5676_p4 = por %p5675_p3, %p5674_p2 }
  0x6f   :  { %p5677_p5 = pnand %p5676_p4, %p5670_p1 }
  0x71   :  { %5680 = shalt.err (!%p5677_p5)
}
  0x72   :  { %95 = dma.hbm_to_vmem [thread:$0]  %s6576_s8, 16, %s93_s20, [#allocation12]  }
  0x73   :  { %5703 = dma.done.wait [#allocation3], 64  }
  0x74   :  { %5704 = vsyncadd [#allocation3], 4294967232 }
  0x75   :  { %5705 = dma.done.wait [#allocation6], 32  }
  0x76   :  { %5706 = vsyncadd [#allocation6], 4294967264 }
  0x77   :  { %5707 = dma.done.wait [#allocation9], 528  }
  0x78   :  { %5708 = vsyncadd [#allocation9], 4294966768 }
  0x79   :  { %5709 = dma.done.wait [#allocation12], 16  }
  0x7a   :  { %5710 = vsyncadd [#allocation12], 4294967280  ;;  %v5721_v0 = vmov 0.0|0.0   ;;  %v5722_v1 = vmov 0.0   ;;  %vm5723_vm0 = vmmov 0   ;;  %vm234_vm1 = vcmask 1042432  }
  0x7b   :  { %5187 = vmatprep.subr.bf16.mxu0 %v5721_v0  ;;  %4825 = vmatprep.subr.mxu1 %v5722_v1  ;;  %s6594_s27 = sld [smem:[#allocation21_spill]]  ;;  %vm230_vm2 = vcmask 23552   ;;  %v5922_v7 = vld [vmem:[#allocation2] sm:$0x7]  ;;  %s6595_s5 = sld [smem:[#allocation19_spill]]  ;;  %v145_v29 = vld [vmem:[%s6575_s7 + $0x8] sm:$0xff] }
  0x7c   :  { %4827 = vmatprep.mubr.msk.f32.mxu1 %vm5723_vm0, %v5722_v1  ;;  %4822 = vmatprep.mubr.msk.f32.mxu0 %vm5723_vm0, %v5722_v1  ;;  %v5942_v12 = vld [vmem:[#allocation5] ss:$0 sm:$0xff]  ;;  %s5724_s30 = smov 64   ;;  %s5725_s2 = smov 32   ;;  %v4562_v24 = vld [vmem:[#allocation8] ss:$0 sm:$0xff] }
  0x7d   :  { %4826 = vmatpush3.msk.msra.mxu1 %vm234_vm1, %v5922_v7  ;;  %s5726_s3 = smov 96   ;;  %v144_v28 = vld [vmem:[%s6575_s7] sm:$0xff]  ;;  %v140_v30 = vld [vmem:[#allocation10] sm:$0xff]  ;;  %v141_v32 = vld [vmem:[#allocation10 + $0x8] sm:$0xff]  ;;  %vm156_vm3 = vcmask 261120   ;;  %s5727_s7 = smov 16  }
  0x7e   :  { %5193 = vmatprep.subr.bf16.mxu1 %v5721_v0  ;;  %v5957_v31 = vpack.c.bf16 %v145_v29, %v144_v28  ;;  %v5960_v33 = vpack.c.bf16 %v141_v32, %v140_v30  ;;  %v142_v35 = vld [vmem:[#allocation10 + $0x10] sm:$0xff]  ;;  %v143_v36 = vld [vmem:[#allocation10 + $0x18] sm:$0xff]  ;;  %v5988_v48 = vld [vmem:[#allocation11] ss:$0 sm:$0xff]  ;;  %s5729_s0 = smov 80   ;;  %vm357_vm4 = vcmask 130048  }
  0x7f   :  { %v4561_v37 = vld [vmem:[#allocation7] ss:$0 sm:$0xff]  ;;  %v5966_v38 = vpack.c.bf16 %v143_v36, %v142_v35  ;;  %v4566_v60 = vld [vmem:[%s6577_s9] ss:$0 sm:$0xff]  ;;  %s5730_s22 = smov 112   ;;  %s5731_s23 = smov 104  }
  0x80   :  { %vm554_vm5 = vcmask 64512   ;;  %vm4537_vm6 = vcmask 17408  }
  0x81   :  { %v133_v2 = vld [vmem:[%s6594_s27] sm:$0xff]  ;;  %v134_v3 = vld [vmem:[%s6594_s27 + $0x8] sm:$0xff]  ;;  %v135_v4 = vld [vmem:[%s6594_s27 + $0x10] sm:$0xff] }
  0x82   :  { %v5917_v5 = vpack.c.bf16 %v134_v3, %v133_v2  ;;  %v136_v6 = vld [vmem:[%s6594_s27 + $0x18] sm:$0xff]  ;;  %v155_v8 = vld [vmem:[%s6595_s5] sm:$0x3]  ;;  %s5728_s27 = smov 48  }
  0x83   :  { %v5930_v9 = vpack.c.bf16 %v136_v6, %v135_v4  ;;  %4828 = vmatmul.mubr.msk.f32.vlgmr.msra.gmra.mrb[0].mxu1 %vm230_vm2, %v155_v8  ;;  %v6002_v2 = vld [vmem:[%s6580_s12] sm:$0xff]  ;;  %v150_v4 = vld [vmem:[%s6579_s11 + $0x8] sm:$0xff] }
  0x84   :  { %5189 = vmatpush3.bf16.msra.mxu0 %v5917_v5  ;;  %4834 = vmatprep.mubr.msk.f32.mxu1 %vm5723_vm0, %v5722_v1  ;;  %v149_v3 = vld [vmem:[%s6579_s11] sm:$0xff] }
  0x85   :  { %5190 = vmatprep.subr.bf16.mxu0 %v5721_v0  ;;  %5195 = vmatpush3.bf16.msra.mxu1 %v5957_v31  ;;  %v6011_v6 = vpack.c.bf16 %v150_v4, %v149_v3 }
  0x86   :  { %5196 = vmatprep.subr.bf16.mxu1 %v5721_v0 }
  0x88   :  { %5192 = vmatpush3.bf16.msra.mxu0 %v5930_v9  ;;  %4835 = vmatmul.mubr.f32.vlgmr.msra.gmra.mrb[2].mxu1 %v5722_v1 }
  0x89   :  { %4848 = vmatprep.subr.mxu0 %v5722_v1  ;;  %5198 = vmatpush3.bf16.msra.mxu1 %v5960_v33 }
  0x8a   :  { %4845 = vmatprep.mubr.msk.f32.mxu1 %vm5723_vm0, %v5722_v1  ;;  %5199 = vmatprep.subr.bf16.mxu1 %v5721_v0 }
  0x8b   :  { %4823 = vmatmul.mubr.f32.vlgmr.msra.gmra.mrb[0].mxu0 %v5722_v1 }
  0x8c   :  { %4850 = vmatprep.mubr.msk.f32.mxu0 %vm5723_vm0, %v5722_v1  ;;  %4849 = vmatpush3.msra.mxu0 %v6002_v2 }
  0x8d   :  { %5201 = vmatpush3.bf16.msra.mxu1 %v5966_v38  ;;  %5202 = vmatprep.subr.bf16.mxu0 %v5721_v0 }
  0x8e   :  { %5205 = vmatprep.subr.bf16.mxu1 %v5721_v0 }
  0x8f   :  { %4851 = vmatmul.mubr.f32.vlgmr.msra.gmra.mrb[2].mxu0 %v5722_v1 }
  0x90   :  { %5204 = vmatpush3.bf16.msra.mxu0 %v6011_v6  ;;  %4857 = vmatprep.mubr.msk.f32.mxu0 %vm5723_vm0, %v5722_v1 }
  0x91   :  { %4871 = vmatprep.subr.mxu0 %v5722_v1 }
 0x156   :  { %v304_v10 = vpop.f32.mrb[0].mxu1 }
 0x157   :  { %v4829_v11 = vpop.f32.mrb[1].mxu1 }
 0x15b   :  { %v426_v45 = vpop.f32.mrb[2].mxu1 }
 0x15c   :  { %v4836_v46 = vpop.f32.mrb[3].mxu1 }
 0x15e   :  { %v226_v13 = vpop.f32.mrb[0].mxu0 }
 0x15f   :  { %v305_v14 = vadd.f32 %v304_v10, %v226_v13  ;;  %v4824_v15 = vpop.f32.mrb[1].mxu0  ;;  %v4567_v10 = vld [vmem:[%s6578_s10] ss:$0 sm:$0xff] }
 0x161   :  { %v314_v16 = vadd.f32 %v5942_v12, %v305_v14 }
 0x163   :  { %5352 = vtanh.f32 %v314_v16  ;;  %v4560_v18 = vmul.f32 -1.442695, %v314_v16 }
 0x165   :  { %5354 = vpow2.f32 %v4560_v18 }
 0x16d   :  { %v5353_v17 = vpop.eup %5352 }
 0x16e   :  { %324 = vrot.lane.b32.xlu0 %v5353_v17, %s5724_s30 }
 0x16f   :  { %v5355_v19 = vpop.eup %5354 }
 0x170   :  { %v318_v20 = vadd.f32 1.0, %v5355_v19  ;;  %v623_v19 = vpop.f32.mrb[2].mxu0 }
 0x172   :  { %5356 = vrcp.f32 %v318_v20  ;;  %v4852_v20 = vpop.f32.mrb[3].mxu0 }
 0x17c   :  { %v5357_v21 = vpop.eup %5356 }
 0x17d   :  { %v322_v25 = vmul.f32 0.0, %v5357_v21 }
 0x1e0   :  { %v325_v22 = vpop.permute.xlu0 %324 }
 0x1e1   :  { %v327_v23 = vmul.f32 %v5357_v21, %v325_v22  ;;  %v4571_v22 = vld [vmem:[%s6595_s5 + $0x2] sm:$0x3] }
 0x1e3   :  { %329 = vrot.lane.b32.xlu0 %v327_v23, %s5725_s2 }
 0x1e7   :  { %353 = vrot.lane.b32.xlu0 %v4562_v24, %s5726_s3 }
 0x255   :  { %v330_v26 = vpop.permute.xlu0 %329 }
 0x256   :  { %v5948_v27 = vadd.f32 %v330_v26, %v322_v25 }
 0x258   :  { %5358 = vtanh.f32 %v5948_v27 }
 0x259   :  { %v5976_v42 = vpop.permute.xlu0 %353 }
 0x262   :  { %v5359_v34 = vpop.eup %5358 }
 0x263   :  { %335 = vrot.lane.b32.xlu1 %v5359_v34, %s5724_s30 }
 0x267   :  { %344 = vrot.lane.b32.xlu1 %v4561_v37, %s5726_s3 }
 0x2d5   :  { %v336_v39 = vpop.permute.xlu1 %335 }
 0x2d6   :  { %v338_v40 = vmul.f32 %v5357_v21, %v336_v39 }
 0x2d9   :  { %v5974_v41 = vpop.permute.xlu1 %344 }
 0x2da   :  { %v347_v43 = vmul.f32 %v5974_v41, %v338_v40 }
 0x2dc   :  { %v356_v44 = vadd.f32 %v5976_v42, %v347_v43 }
 0x2de   :  { %431 = vrot.lane.b32.xlu1 %v356_v44, %s5725_s2 }
 0x350   :  { %v432_v47 = vpop.permute.xlu1 %431 }
 0x351   :  { %4846 = vmatmul.mubr.msk.f32.vlgmr.msra.gmra.mrb[4].mxu1 %vm156_vm3, %v432_v47 }
 0x352   :  { %5207 = vmatpush3.bf16.msra.mxu1 %v5917_v5  ;;  %4868 = vmatprep.mubr.msk.f32.mxu1 %vm5723_vm0, %v5722_v1 }
 0x353   :  { %5208 = vmatprep.subr.bf16.mxu1 %v5721_v0 }
 0x356   :  { %5210 = vmatpush3.bf16.msra.mxu1 %v5930_v9 }
 0x357   :  { %5214 = vmatprep.subr.bf16.mxu1 %v5721_v0 }
 0x424   :  { %v501_v49 = vpop.f32.mrb[4].mxu1 }
 0x425   :  { %v502_v50 = vadd.f32 %v501_v49, %v426_v45  ;;  %v4847_v51 = vpop.f32.mrb[5].mxu1 }
 0x427   :  { %v511_v52 = vadd.f32 %v5988_v48, %v502_v50 }
 0x429   :  { %5360 = vtanh.f32 %v511_v52  ;;  %v4565_v54 = vmul.f32 -1.442695, %v511_v52 }
 0x42b   :  { %5362 = vpow2.f32 %v4565_v54 }
 0x433   :  { %v5361_v53 = vpop.eup %5360 }
 0x434   :  { %521 = vrot.lane.b32.xlu0 %v5361_v53, %s5726_s3 }
 0x435   :  { %v5363_v55 = vpop.eup %5362 }
 0x436   :  { %v515_v56 = vadd.f32 1.0, %v5363_v55 }
 0x438   :  { %5364 = vrcp.f32 %v515_v56 }
 0x442   :  { %v5365_v57 = vpop.eup %5364 }
 0x443   :  { %v519_v61 = vmul.f32 0.0, %v5365_v57 }
 0x4a6   :  { %v522_v58 = vpop.permute.xlu0 %521 }
 0x4a7   :  { %v524_v59 = vmul.f32 %v5365_v57, %v522_v58 }
 0x4a9   :  { %526 = vrot.lane.b32.xlu1 %v524_v59, %s5727_s7 }
 0x4ad   :  { %541 = vrot.lane.b32.xlu1 %v4566_v60, %s5728_s27 }
 0x51b   :  { %v527_v62 = vpop.permute.xlu1 %526 }
 0x51c   :  { %v5996_v63 = vadd.f32 %v527_v62, %v519_v61 }
 0x51e   :  { %5366 = vtanh.f32 %v5996_v63 }
 0x51f   :  { %v6024_v13 = vpop.permute.xlu1 %541 }
 0x528   :  { %v5367_v8 = vpop.eup %5366 }
 0x529   :  { %532 = vrot.lane.b32.xlu0 %v5367_v8, %s5725_s2 }
 0x52d   :  { %550 = vrot.lane.b32.xlu0 %v4567_v10, %s5728_s27 }
 0x531   :  { %736 = vrot.lane.b32.xlu0 %v338_v40, %s5725_s2  ;;  %v6057_v40 = vld [vmem:[%s6581_s13] ss:$0 sm:$0xff] }
 0x59b   :  { %v533_v11 = vpop.permute.xlu0 %532 }
 0x59c   :  { %v535_v14 = vmul.f32 %v5365_v57, %v533_v11 }
 0x59e   :  { %v544_v15 = vmul.f32 %v6024_v13, %v535_v14 }
 0x59f   :  { %v6027_v16 = vpop.permute.xlu0 %550 }
 0x5a0   :  { %v553_v17 = vadd.f32 %v6027_v16, %v544_v15 }
 0x5a2   :  { %628 = vrot.lane.b32.xlu1 %v553_v17, %s5729_s0 }
 0x5a3   :  { %v737_v18 = vpop.permute.xlu0 %736 }
 0x5a4   :  { %4869 = vmatmul.mubr.msk.f32.vlgmr.msra.gmra.mrb[6].mxu1 %vm156_vm3, %v737_v18 }
 0x5a5   :  { %5216 = vmatpush3.bf16.msra.mxu1 %v5960_v33  ;;  %4891 = vmatprep.mubr.msk.f32.mxu1 %vm5723_vm0, %v5722_v1 }
 0x5a6   :  { %5217 = vmatprep.subr.bf16.mxu1 %v5721_v0 }
 0x5a9   :  { %5219 = vmatpush3.bf16.msra.mxu1 %v5966_v38 }
 0x5aa   :  { %5223 = vmatprep.subr.bf16.mxu1 %v5721_v0 }
 0x614   :  { %v629_v21 = vpop.permute.xlu1 %628 }
 0x615   :  { %4858 = vmatmul.mubr.msk.f32.vlgmr.msra.gmra.mrb[4].mxu0 %vm357_vm4, %v629_v21 }
 0x616   :  { %4872 = vmatpush3.msk.msra.mxu0 %vm234_vm1, %v5922_v7  ;;  %4873 = vmatprep.mubr.msk.f32.mxu0 %vm5723_vm0, %v5722_v1 }
 0x617   :  { %5211 = vmatprep.subr.bf16.mxu0 %v5721_v0 }
 0x619   :  { %4874 = vmatmul.mubr.msk.f32.vlgmr.msra.gmra.mrb[6].mxu0 %vm230_vm2, %v4571_v22 }
 0x61a   :  { %5213 = vmatpush3.bf16.msra.mxu0 %v5957_v31  ;;  %4880 = vmatprep.mubr.msk.f32.mxu0 %vm5723_vm0, %v5722_v1 }
 0x61b   :  { %4894 = vmatprep.subr.mxu0 %v5722_v1 }
 0x677   :  { %v806_v23 = vpop.f32.mrb[6].mxu1 }
 0x678   :  { %v4870_v24 = vpop.f32.mrb[7].mxu1 }
 0x6e8   :  { %v698_v25 = vpop.f32.mrb[4].mxu0 }
 0x6e9   :  { %v699_v26 = vadd.f32 %v698_v25, %v623_v19  ;;  %v4859_v28 = vpop.f32.mrb[5].mxu0 }
 0x6eb   :  { %v708_v43 = vadd.f32 %v6057_v40, %v699_v26 }
 0x6ec   :  { %v879_v29 = vpop.f32.mrb[6].mxu0 }
 0x6ed   :  { %v880_v30 = vadd.f32 %v879_v29, %v806_v23  ;;  %v4875_v32 = vpop.f32.mrb[7].mxu0  ;;  %v4570_v49 = vmul.f32 -1.442695, %v708_v43 }
 0x6ef   :  { %v883_v34 = vadd.f32 %v5942_v12, %v880_v30 }
 0x6f1   :  { %5368 = vtanh.f32 %v883_v34  ;;  %v4575_v36 = vmul.f32 -1.442695, %v883_v34 }
 0x6f3   :  { %5370 = vpow2.f32 %v4575_v36 }
 0x6fb   :  { %v5369_v35 = vpop.eup %5368 }
 0x6fc   :  { %893 = vrot.lane.b32.xlu1 %v5369_v35, %s5724_s30 }
 0x6fd   :  { %v5371_v37 = vpop.eup %5370 }
 0x6fe   :  { %v887_v39 = vadd.f32 1.0, %v5371_v37 }
 0x700   :  { %5372 = vrcp.f32 %v887_v39 }
 0x701   :  { %5374 = vtanh.f32 %v708_v43 }
 0x702   :  { %5376 = vpow2.f32 %v4570_v49 }
 0x70a   :  { %v5373_v44 = vpop.eup %5372 }
 0x70b   :  { %v5375_v47 = vpop.eup %5374  ;;  %v891_v52 = vmul.f32 %v5373_v44, %v5948_v27 }
 0x70c   :  { %v5377_v50 = vpop.eup %5376 }
 0x70d   :  { %v712_v51 = vadd.f32 1.0, %v5377_v50 }
 0x70f   :  { %5378 = vrcp.f32 %v712_v51 }
 0x719   :  { %v5379_v56 = vpop.eup %5378 }
 0x71a   :  { %v716_v59 = vmul.f32 0.0, %v5379_v56 }
 0x76e   :  { %v894_v45 = vpop.permute.xlu1 %893 }
 0x76f   :  { %v896_v46 = vmul.f32 %v5373_v44, %v894_v45 }
 0x771   :  { %898 = vrot.lane.b32.xlu0 %v896_v46, %s5725_s2 }
 0x775   :  { %911 = vrot.lane.b32.xlu0 %v535_v14, %s5729_s0 }
 0x779   :  { %718 = vrot.lane.b32.xlu0 %v5375_v47, %s5730_s22 }
 0x7e3   :  { %v899_v53 = vpop.permute.xlu0 %898 }
 0x7e4   :  { %v6064_v54 = vadd.f32 %v899_v53, %v891_v52 }
 0x7e6   :  { %5380 = vtanh.f32 %v6064_v54 }
 0x7e7   :  { %v912_v55 = vpop.permute.xlu0 %911 }
 0x7e8   :  { %4881 = vmatmul.mubr.msk.f32.vlgmr.msra.gmra.mrb[8].mxu0 %vm357_vm4, %v912_v55 }
 0x7e9   :  { %4895 = vmatpush3.msra.mxu0 %v6002_v2  ;;  %4896 = vmatprep.mubr.msk.f32.mxu0 %vm5723_vm0, %v5722_v1 }
 0x7ea   :  { %5220 = vmatprep.subr.bf16.mxu0 %v5721_v0 }
 0x7eb   :  { %v719_v57 = vpop.permute.xlu0 %718 }
 0x7ec   :  { %v721_v58 = vmul.f32 %v5379_v56, %v719_v57 }
 0x7ee   :  { %723 = vrot.lane.b32.xlu0 %v721_v58, %s5719_s26 }
 0x7f0   :  { %v5381_v27 = vpop.eup %5380 }
 0x7f1   :  { %904 = vrot.lane.b32.xlu1 %v5381_v27, %s5724_s30 }
 0x860   :  { %v724_v60 = vpop.permute.xlu0 %723 }
 0x861   :  { %v6074_v61 = vadd.f32 %v724_v60, %v716_v59 }
 0x863   :  { %5382 = vtanh.f32 %v6074_v61  ;;  %v905_v62 = vpop.permute.xlu1 %904 }
 0x864   :  { %v907_v3 = vmul.f32 %v5373_v44, %v905_v62 }
 0x866   :  { %v908_v4 = vmul.f32 %v907_v3, %v5974_v41 }
 0x868   :  { %v909_v8 = vadd.f32 %v908_v4, %v5976_v42 }
 0x86a   :  { %986 = vrot.lane.b32.xlu1 %v909_v8, %s5725_s2 }
 0x86d   :  { %v5383_v10 = vpop.eup %5382 }
 0x86e   :  { %729 = vrot.lane.b32.xlu0 %v5383_v10, %s5727_s7 }
 0x8bb   :  { %v981_v11 = vpop.f32.mrb[8].mxu0 }
 0x8bc   :  { %v4882_v14 = vpop.f32.mrb[9].mxu0 }
 0x8dc   :  { %v987_v15 = vpop.permute.xlu1 %986 }
 0x8dd   :  { %4892 = vmatmul.mubr.msk.f32.vlgmr.msra.gmra.mrb[8].mxu1 %vm156_vm3, %v987_v15 }
 0x8de   :  { %5225 = vmatpush3.bf16.msra.mxu1 %v5917_v5  ;;  %4914 = vmatprep.mubr.msk.f32.mxu1 %vm5723_vm0, %v5722_v1 }
 0x8df   :  { %5226 = vmatprep.subr.bf16.mxu1 %v5721_v0 }
 0x8e0   :  { %v730_v17 = vpop.permute.xlu0 %729 }
 0x8e1   :  { %v732_v18 = vmul.f32 %v5379_v56, %v730_v17 }
 0x8e2   :  { %5228 = vmatpush3.bf16.msra.mxu1 %v5930_v9 }
 0x8e3   :  { %1088 = vrot.lane.b32.xlu0 %v732_v18, %s5731_s23  ;;  %5232 = vmatprep.subr.bf16.mxu1 %v5721_v0 }
 0x8e7   :  { %1265 = vrot.lane.b32.xlu0 %v907_v3, %s5725_s2 }
 0x955   :  { %v1089_v19 = vpop.permute.xlu0 %1088 }
 0x956   :  { %4897 = vmatmul.mubr.msk.f32.vlgmr.msra.gmra.mrb[10].mxu0 %vm554_vm5, %v1089_v19 }
 0x957   :  { %5222 = vmatpush3.bf16.msra.mxu0 %v6011_v6  ;;  %4903 = vmatprep.mubr.msk.f32.mxu0 %vm5723_vm0, %v5722_v1 }
 0x958   :  { %4917 = vmatprep.subr.mxu0 %v5722_v1 }
 0x959   :  { %v1266_v20 = vpop.permute.xlu0 %1265 }
 0x95a   :  { %4915 = vmatmul.mubr.msk.f32.vlgmr.msra.gmra.mrb[10].mxu1 %vm156_vm3, %v1266_v20 }
 0x95b   :  { %5234 = vmatpush3.bf16.msra.mxu1 %v5960_v33  ;;  %4937 = vmatprep.mubr.msk.f32.mxu1 %vm5723_vm0, %v5722_v1 }
 0x95c   :  { %5235 = vmatprep.subr.bf16.mxu1 %v5721_v0 }
 0x95f   :  { %5237 = vmatpush3.bf16.msra.mxu1 %v5966_v38 }
 0x960   :  { %5241 = vmatprep.subr.bf16.mxu1 %v5721_v0 }
 0x9b0   :  { %v1056_v21 = vpop.f32.mrb[8].mxu1 }
 0x9b1   :  { %v1057_v22 = vadd.f32 %v1056_v21, %v981_v11  ;;  %v4893_v23 = vpop.f32.mrb[9].mxu1 }
 0x9b3   :  { %v1060_v24 = vadd.f32 %v5988_v48, %v1057_v22 }
 0x9b5   :  { %5384 = vtanh.f32 %v1060_v24  ;;  %v4578_v26 = vmul.f32 -1.442695, %v1060_v24 }
 0x9b7   :  { %5386 = vpow2.f32 %v4578_v26 }
 0x9bf   :  { %v5385_v25 = vpop.eup %5384 }
 0x9c0   :  { %1070 = vrot.lane.b32.xlu1 %v5385_v25, %s5726_s3 }
 0x9c1   :  { %v5387_v28 = vpop.eup %5386 }
 0x9c2   :  { %v1064_v29 = vadd.f32 1.0, %v5387_v28 }
 0x9c4   :  { %5388 = vrcp.f32 %v1064_v29 }
 0x9ce   :  { %v5389_v36 = vpop.eup %5388 }
 0x9cf   :  { %v1068_v43 = vmul.f32 %v5389_v36, %v5996_v63  ;;  %v4582_v63 = vld [vmem:[%s6595_s5 + $0x4] sm:$0x3] }
 0xa29   :  { %v1158_v30 = vpop.f32.mrb[10].mxu0 }
 0xa2a   :  { %v4898_v32 = vpop.f32.mrb[11].mxu0 }
 0xa2d   :  { %v1335_v34 = vpop.f32.mrb[10].mxu1 }
 0xa2e   :  { %v4916_v35 = vpop.f32.mrb[11].mxu1 }
 0xa32   :  { %v1071_v37 = vpop.permute.xlu1 %1070 }
 0xa33   :  { %v1073_v39 = vmul.f32 %v5389_v36, %v1071_v37 }
 0xa35   :  { %1075 = vrot.lane.b32.xlu1 %v1073_v39, %s5727_s7 }
 0xaa7   :  { %v1076_v44 = vpop.permute.xlu1 %1075 }
 0xaa8   :  { %v6106_v45 = vadd.f32 %v1076_v44, %v1068_v43 }
 0xaaa   :  { %5390 = vtanh.f32 %v6106_v45 }
 0xab4   :  { %v5391_v46 = vpop.eup %5390 }
 0xab5   :  { %1081 = vrot.lane.b32.xlu1 %v5391_v46, %s5725_s2 }
 0xb27   :  { %v1082_v47 = vpop.permute.xlu1 %1081 }
 0xb28   :  { %v1084_v49 = vmul.f32 %v5389_v36, %v1082_v47 }
 0xb2a   :  { %v1085_v50 = vmul.f32 %v1084_v49, %v6024_v13 }
 0xb2c   :  { %v1086_v51 = vadd.f32 %v1085_v50, %v6027_v16 }
 0xb2e   :  { %1163 = vrot.lane.b32.xlu1 %v1086_v51, %s5729_s0 }
 0xba0   :  { %v1164_v52 = vpop.permute.xlu1 %1163 }
 0xba1   :  { %4904 = vmatmul.mubr.msk.f32.vlgmr.msra.gmra.mrb[12].mxu0 %vm357_vm4, %v1164_v52 }
 0xba2   :  { %4918 = vmatpush3.msk.msra.mxu0 %vm234_vm1, %v5922_v7  ;;  %4919 = vmatprep.mubr.msk.f32.mxu0 %vm5723_vm0, %v5722_v1 }
 0xba3   :  { %5229 = vmatprep.subr.bf16.mxu0 %v5721_v0 }
 0xba5   :  { %4920 = vmatmul.mubr.msk.f32.vlgmr.msra.gmra.mrb[14].mxu0 %vm230_vm2, %v4582_v63 }
 0xba6   :  { %5231 = vmatpush3.bf16.msra.mxu0 %v5957_v31  ;;  %4926 = vmatprep.mubr.msk.f32.mxu0 %vm5723_vm0, %v5722_v1 }
 0xba7   :  { %4940 = vmatprep.subr.mxu0 %v5722_v1 }
 0xc74   :  { %v1233_v53 = vpop.f32.mrb[12].mxu0 }
 0xc75   :  { %v1234_v55 = vadd.f32 %v1233_v53, %v1158_v30  ;;  %v4905_v56 = vpop.f32.mrb[13].mxu0 }
 0xc77   :  { %v1237_v8 = vadd.f32 %v6057_v40, %v1234_v55 }
 0xc78   :  { %v1408_v57 = vpop.f32.mrb[14].mxu0 }
 0xc79   :  { %v1409_v58 = vadd.f32 %v1408_v57, %v1335_v34  ;;  %v4921_v27 = vpop.f32.mrb[15].mxu0  ;;  %v4581_v17 = vmul.f32 -1.442695, %v1237_v8 }
 0xc7b   :  { %v1412_v59 = vadd.f32 %v5942_v12, %v1409_v58 }
 0xc7d   :  { %5392 = vtanh.f32 %v1412_v59  ;;  %v4586_v62 = vmul.f32 -1.442695, %v1412_v59 }
 0xc7f   :  { %5394 = vpow2.f32 %v4586_v62 }
 0xc87   :  { %v5393_v60 = vpop.eup %5392 }
 0xc88   :  { %1422 = vrot.lane.b32.xlu1 %v5393_v60, %s5724_s30 }
 0xc89   :  { %v5395_v3 = vpop.eup %5394 }
 0xc8a   :  { %v1416_v4 = vadd.f32 1.0, %v5395_v3 }
 0xc8c   :  { %5396 = vrcp.f32 %v1416_v4 }
 0xc8d   :  { %5398 = vtanh.f32 %v1237_v8 }
 0xc8e   :  { %5400 = vpow2.f32 %v4581_v17 }
 0xc96   :  { %v5397_v10 = vpop.eup %5396 }
 0xc97   :  { %v5399_v15 = vpop.eup %5398  ;;  %v1420_v20 = vmul.f32 %v5397_v10, %v6064_v54 }
 0xc98   :  { %v5401_v18 = vpop.eup %5400 }
 0xc99   :  { %v1241_v19 = vadd.f32 1.0, %v5401_v18 }
 0xc9b   :  { %5402 = vrcp.f32 %v1241_v19 }
 0xca5   :  { %v5403_v24 = vpop.eup %5402 }
 0xca6   :  { %v1245_v28 = vmul.f32 %v5403_v24, %v6074_v61 }
 0xcfa   :  { %v1423_v11 = vpop.permute.xlu1 %1422 }
 0xcfb   :  { %v1425_v14 = vmul.f32 %v5397_v10, %v1423_v11 }
 0xcfd   :  { %1427 = vrot.lane.b32.xlu0 %v1425_v14, %s5725_s2 }
 0xd01   :  { %1440 = vrot.lane.b32.xlu0 %v1084_v49, %s5729_s0 }
 0xd05   :  { %1247 = vrot.lane.b32.xlu0 %v5399_v15, %s5730_s22 }
 0xd6f   :  { %v1428_v21 = vpop.permute.xlu0 %1427 }
 0xd70   :  { %v6134_v22 = vadd.f32 %v1428_v21, %v1420_v20 }
 0xd72   :  { %5404 = vtanh.f32 %v6134_v22 }
 0xd73   :  { %v1441_v23 = vpop.permute.xlu0 %1440 }
 0xd74   :  { %4927 = vmatmul.mubr.msk.f32.vlgmr.msra.gmra.mrb[16].mxu0 %vm357_vm4, %v1441_v23 }
 0xd75   :  { %4941 = vmatpush3.msra.mxu0 %v6002_v2  ;;  %4942 = vmatprep.mubr.msk.f32.mxu0 %vm5723_vm0, %v5722_v1 }
 0xd76   :  { %5238 = vmatprep.subr.bf16.mxu0 %v5721_v0 }
 0xd77   :  { %v1248_v25 = vpop.permute.xlu0 %1247 }
 0xd78   :  { %v1250_v26 = vmul.f32 %v5403_v24, %v1248_v25 }
 0xd7a   :  { %1252 = vrot.lane.b32.xlu0 %v1250_v26, %s5719_s26 }
 0xd7c   :  { %v5405_v54 = vpop.eup %5404 }
 0xd7d   :  { %1433 = vrot.lane.b32.xlu1 %v5405_v54, %s5724_s30 }
 0xdec   :  { %v1253_v29 = vpop.permute.xlu0 %1252 }
 0xded   :  { %v6145_v30 = vadd.f32 %v1253_v29, %v1245_v28 }
 0xdef   :  { %5406 = vtanh.f32 %v6145_v30  ;;  %v1434_v32 = vpop.permute.xlu1 %1433 }
 0xdf0   :  { %v1436_v34 = vmul.f32 %v5397_v10, %v1434_v32 }
 0xdf2   :  { %v1437_v35 = vmul.f32 %v1436_v34, %v5974_v41 }
 0xdf4   :  { %v1438_v36 = vadd.f32 %v1437_v35, %v5976_v42 }
 0xdf6   :  { %1515 = vrot.lane.b32.xlu1 %v1438_v36, %s5725_s2 }
 0xdf9   :  { %v5407_v37 = vpop.eup %5406 }
 0xdfa   :  { %1258 = vrot.lane.b32.xlu0 %v5407_v37, %s5727_s7 }
 0xe47   :  { %v1510_v39 = vpop.f32.mrb[16].mxu0 }
 0xe48   :  { %v4928_v43 = vpop.f32.mrb[17].mxu0 }
 0xe68   :  { %v1516_v44 = vpop.permute.xlu1 %1515 }
 0xe69   :  { %4938 = vmatmul.mubr.msk.f32.vlgmr.msra.gmra.mrb[12].mxu1 %vm156_vm3, %v1516_v44 }
 0xe6a   :  { %5243 = vmatpush3.bf16.msra.mxu1 %v5917_v5  ;;  %4960 = vmatprep.mubr.msk.f32.mxu1 %vm5723_vm0, %v5722_v1 }
 0xe6b   :  { %5244 = vmatprep.subr.bf16.mxu1 %v5721_v0 }
 0xe6c   :  { %v1259_v61 = vpop.permute.xlu0 %1258 }
 0xe6d   :  { %v1261_v46 = vmul.f32 %v5403_v24, %v1259_v61 }
 0xe6e   :  { %5246 = vmatpush3.bf16.msra.mxu1 %v5930_v9 }
 0xe6f   :  { %1617 = vrot.lane.b32.xlu0 %v1261_v46, %s5731_s23  ;;  %5250 = vmatprep.subr.bf16.mxu1 %v5721_v0 }
 0xe73   :  { %1794 = vrot.lane.b32.xlu0 %v1436_v34, %s5725_s2 }
 0xee1   :  { %v1618_v47 = vpop.permute.xlu0 %1617 }
 0xee2   :  { %4943 = vmatmul.mubr.msk.f32.vlgmr.msra.gmra.mrb[18].mxu0 %vm554_vm5, %v1618_v47 }
 0xee3   :  { %5240 = vmatpush3.bf16.msra.mxu0 %v6011_v6  ;;  %4949 = vmatprep.mubr.msk.f32.mxu0 %vm5723_vm0, %v5722_v1 }
 0xee4   :  { %4963 = vmatprep.subr.mxu0 %v5722_v1 }
 0xee5   :  { %v1795_v49 = vpop.permute.xlu0 %1794 }
 0xee6   :  { %4961 = vmatmul.mubr.msk.f32.vlgmr.msra.gmra.mrb[14].mxu1 %vm156_vm3, %v1795_v49 }
 0xee7   :  { %5252 = vmatpush3.bf16.msra.mxu1 %v5960_v33  ;;  %4983 = vmatprep.mubr.msk.f32.mxu1 %vm5723_vm0, %v5722_v1 }
 0xee8   :  { %5253 = vmatprep.subr.bf16.mxu1 %v5721_v0 }
 0xeeb   :  { %5255 = vmatpush3.bf16.msra.mxu1 %v5966_v38 }
 0xeec   :  { %5259 = vmatprep.subr.bf16.mxu1 %v5721_v0 }
 0xf3c   :  { %v1585_v50 = vpop.f32.mrb[12].mxu1 }
 0xf3d   :  { %v1586_v51 = vadd.f32 %v1585_v50, %v1510_v39  ;;  %v4939_v52 = vpop.f32.mrb[13].mxu1 }
 0xf3f   :  { %v1589_v63 = vadd.f32 %v5988_v48, %v1586_v51 }
 0xf41   :  { %5408 = vtanh.f32 %v1589_v63  ;;  %v4589_v55 = vmul.f32 -1.442695, %v1589_v63 }
 0xf43   :  { %5410 = vpow2.f32 %v4589_v55 }
 0xf4b   :  { %v5409_v53 = vpop.eup %5408 }
 0xf4c   :  { %1599 = vrot.lane.b32.xlu1 %v5409_v53, %s5726_s3 }
 0xf4d   :  { %v5411_v56 = vpop.eup %5410 }
 0xf4e   :  { %v1593_v57 = vadd.f32 1.0, %v5411_v56 }
 0xf50   :  { %5412 = vrcp.f32 %v1593_v57 }
 0xf5a   :  { %v5413_v62 = vpop.eup %5412 }
 0xf5b   :  { %v1597_v8 = vmul.f32 %v5413_v62, %v6106_v45  ;;  %v4593_v45 = vld [vmem:[%s6595_s5 + $0x6] sm:$0x3] }
 0xfb5   :  { %v1687_v58 = vpop.f32.mrb[18].mxu0 }
 0xfb6   :  { %v4944_v27 = vpop.f32.mrb[19].mxu0 }
 0xfb9   :  { %v1864_v59 = vpop.f32.mrb[14].mxu1 }
 0xfba   :  { %v4962_v60 = vpop.f32.mrb[15].mxu1 }
 0xfbe   :  { %v1600_v3 = vpop.permute.xlu1 %1599 }
 0xfbf   :  { %v1602_v4 = vmul.f32 %v5413_v62, %v1600_v3 }
 0xfc1   :  { %1604 = vrot.lane.b32.xlu1 %v1602_v4, %s5727_s7 }
0x1033   :  { %v1605_v10 = vpop.permute.xlu1 %1604 }
0x1034   :  { %v6177_v11 = vadd.f32 %v1605_v10, %v1597_v8 }
0x1036   :  { %5414 = vtanh.f32 %v6177_v11 }
0x1040   :  { %v5415_v14 = vpop.eup %5414 }
0x1041   :  { %1610 = vrot.lane.b32.xlu1 %v5415_v14, %s5725_s2 }
0x10b3   :  { %v1611_v15 = vpop.permute.xlu1 %1610 }
0x10b4   :  { %v1613_v17 = vmul.f32 %v5413_v62, %v1611_v15 }
0x10b6   :  { %v1614_v18 = vmul.f32 %v1613_v17, %v6024_v13 }
0x10b8   :  { %v1615_v19 = vadd.f32 %v1614_v18, %v6027_v16 }
0x10ba   :  { %1692 = vrot.lane.b32.xlu1 %v1615_v19, %s5729_s0 }
0x112c   :  { %v1693_v20 = vpop.permute.xlu1 %1692 }
0x112d   :  { %4950 = vmatmul.mubr.msk.f32.vlgmr.msra.gmra.mrb[20].mxu0 %vm357_vm4, %v1693_v20 }
0x112e   :  { %4964 = vmatpush3.msk.msra.mxu0 %vm234_vm1, %v5922_v7  ;;  %4965 = vmatprep.mubr.msk.f32.mxu0 %vm5723_vm0, %v5722_v1 }
0x112f   :  { %5247 = vmatprep.subr.bf16.mxu0 %v5721_v0 }
0x1131   :  { %4966 = vmatmul.mubr.msk.f32.vlgmr.msra.gmra.mrb[22].mxu0 %vm230_vm2, %v4593_v45 }
0x1132   :  { %5249 = vmatpush3.bf16.msra.mxu0 %v5957_v31  ;;  %4972 = vmatprep.mubr.msk.f32.mxu0 %vm5723_vm0, %v5722_v1 }
0x1133   :  { %4986 = vmatprep.subr.mxu0 %v5722_v1 }
0x1200   :  { %v1762_v21 = vpop.f32.mrb[20].mxu0 }
0x1201   :  { %v1763_v23 = vadd.f32 %v1762_v21, %v1687_v58  ;;  %v4951_v24 = vpop.f32.mrb[21].mxu0 }
0x1203   :  { %v1766_v36 = vadd.f32 %v6057_v40, %v1763_v23 }
0x1204   :  { %v1937_v25 = vpop.f32.mrb[22].mxu0 }
0x1205   :  { %v1938_v26 = vadd.f32 %v1937_v25, %v1864_v59  ;;  %v4967_v54 = vpop.f32.mrb[23].mxu0  ;;  %v4592_v61 = vmul.f32 -1.442695, %v1766_v36 }
0x1207   :  { %v1941_v28 = vadd.f32 %v5942_v12, %v1938_v26 }
0x1209   :  { %5416 = vtanh.f32 %v1941_v28  ;;  %v4597_v32 = vmul.f32 -1.442695, %v1941_v28 }
0x120b   :  { %5418 = vpow2.f32 %v4597_v32 }
0x1213   :  { %v5417_v29 = vpop.eup %5416 }
0x1214   :  { %1951 = vrot.lane.b32.xlu1 %v5417_v29, %s5724_s30 }
0x1215   :  { %v5419_v34 = vpop.eup %5418 }
0x1216   :  { %v1945_v35 = vadd.f32 1.0, %v5419_v34 }
0x1218   :  { %5420 = vrcp.f32 %v1945_v35 }
0x1219   :  { %5422 = vtanh.f32 %v1766_v36 }
0x121a   :  { %5424 = vpow2.f32 %v4592_v61 }
0x1222   :  { %v5421_v37 = vpop.eup %5420 }
0x1223   :  { %v5423_v44 = vpop.eup %5422  ;;  %v1949_v49 = vmul.f32 %v5421_v37, %v6134_v22 }
0x1224   :  { %v5425_v46 = vpop.eup %5424 }
0x1225   :  { %v1770_v47 = vadd.f32 1.0, %v5425_v46 }
0x1227   :  { %5426 = vrcp.f32 %v1770_v47 }
0x1231   :  { %v5427_v63 = vpop.eup %5426 }
0x1232   :  { %v1774_v56 = vmul.f32 %v5427_v63, %v6145_v30 }
0x1286   :  { %v1952_v39 = vpop.permute.xlu1 %1951 }
0x1287   :  { %v1954_v43 = vmul.f32 %v5421_v37, %v1952_v39 }
0x1289   :  { %1956 = vrot.lane.b32.xlu0 %v1954_v43, %s5725_s2 }
0x128d   :  { %1969 = vrot.lane.b32.xlu0 %v1613_v17, %s5729_s0 }
0x1291   :  { %1776 = vrot.lane.b32.xlu0 %v5423_v44, %s5730_s22 }
0x12fb   :  { %v1957_v50 = vpop.permute.xlu0 %1956 }
0x12fc   :  { %v6205_v51 = vadd.f32 %v1957_v50, %v1949_v49 }
0x12fe   :  { %5428 = vtanh.f32 %v6205_v51 }
0x12ff   :  { %v1970_v52 = vpop.permute.xlu0 %1969 }
0x1300   :  { %4973 = vmatmul.mubr.msk.f32.vlgmr.msra.gmra.mrb[24].mxu0 %vm357_vm4, %v1970_v52 }
0x1301   :  { %4987 = vmatpush3.msra.mxu0 %v6002_v2  ;;  %4988 = vmatprep.mubr.msk.f32.mxu0 %vm5723_vm0, %v5722_v1 }
0x1302   :  { %5256 = vmatprep.subr.bf16.mxu0 %v5721_v0 }
0x1303   :  { %v1777_v53 = vpop.permute.xlu0 %1776 }
0x1304   :  { %v1779_v55 = vmul.f32 %v5427_v63, %v1777_v53 }
0x1306   :  { %1781 = vrot.lane.b32.xlu0 %v1779_v55, %s5719_s26 }
0x1308   :  { %v5429_v22 = vpop.eup %5428 }
0x1309   :  { %1962 = vrot.lane.b32.xlu1 %v5429_v22, %s5724_s30 }
0x1378   :  { %v1782_v57 = vpop.permute.xlu0 %1781 }
0x1379   :  { %v6216_v58 = vadd.f32 %v1782_v57, %v1774_v56 }
0x137b   :  { %5430 = vtanh.f32 %v6216_v58  ;;  %v1963_v27 = vpop.permute.xlu1 %1962 }
0x137c   :  { %v1965_v59 = vmul.f32 %v5421_v37, %v1963_v27 }
0x137e   :  { %v1966_v60 = vmul.f32 %v1965_v59, %v5974_v41 }
0x1380   :  { %v1967_v62 = vadd.f32 %v1966_v60, %v5976_v42 }
0x1382   :  { %2044 = vrot.lane.b32.xlu1 %v1967_v62, %s5725_s2 }
0x1385   :  { %v5431_v3 = vpop.eup %5430 }
0x1386   :  { %1787 = vrot.lane.b32.xlu0 %v5431_v3, %s5727_s7 }
0x13d3   :  { %v2039_v4 = vpop.f32.mrb[24].mxu0 }
0x13d4   :  { %v4974_v8 = vpop.f32.mrb[25].mxu0 }
0x13f4   :  { %v2045_v10 = vpop.permute.xlu1 %2044 }
0x13f5   :  { %4984 = vmatmul.mubr.msk.f32.vlgmr.msra.gmra.mrb[16].mxu1 %vm156_vm3, %v2045_v10 }
0x13f6   :  { %5261 = vmatpush3.bf16.msra.mxu1 %v5917_v5  ;;  %5006 = vmatprep.mubr.msk.f32.mxu1 %vm5723_vm0, %v5722_v1 }
0x13f7   :  { %5262 = vmatprep.subr.bf16.mxu1 %v5721_v0 }
0x13f8   :  { %v1788_v30 = vpop.permute.xlu0 %1787 }
0x13f9   :  { %v1790_v14 = vmul.f32 %v5427_v63, %v1788_v30 }
0x13fa   :  { %5264 = vmatpush3.bf16.msra.mxu1 %v5930_v9 }
0x13fb   :  { %2146 = vrot.lane.b32.xlu0 %v1790_v14, %s5731_s23  ;;  %5268 = vmatprep.subr.bf16.mxu1 %v5721_v0 }
0x13ff   :  { %2323 = vrot.lane.b32.xlu0 %v1965_v59, %s5725_s2 }
0x146d   :  { %v2147_v15 = vpop.permute.xlu0 %2146 }
0x146e   :  { %4989 = vmatmul.mubr.msk.f32.vlgmr.msra.gmra.mrb[26].mxu0 %vm554_vm5, %v2147_v15 }
0x146f   :  { %5258 = vmatpush3.bf16.msra.mxu0 %v6011_v6  ;;  %4995 = vmatprep.mubr.msk.f32.mxu0 %vm5723_vm0, %v5722_v1 }
0x1470   :  { %5009 = vmatprep.subr.mxu0 %v5722_v1 }
0x1471   :  { %v2324_v17 = vpop.permute.xlu0 %2323 }
0x1472   :  { %5007 = vmatmul.mubr.msk.f32.vlgmr.msra.gmra.mrb[18].mxu1 %vm156_vm3, %v2324_v17 }
0x1473   :  { %5270 = vmatpush3.bf16.msra.mxu1 %v5960_v33  ;;  %5029 = vmatprep.mubr.msk.f32.mxu1 %vm5723_vm0, %v5722_v1 }
0x1474   :  { %5271 = vmatprep.subr.bf16.mxu1 %v5721_v0 }
0x1477   :  { %5273 = vmatpush3.bf16.msra.mxu1 %v5966_v38 }
0x1478   :  { %5277 = vmatprep.subr.bf16.mxu1 %v5721_v0 }
0x14c8   :  { %v2114_v18 = vpop.f32.mrb[16].mxu1 }
0x14c9   :  { %v2115_v19 = vadd.f32 %v2114_v18, %v2039_v4  ;;  %v4985_v20 = vpop.f32.mrb[17].mxu1 }
0x14cb   :  { %v2118_v45 = vadd.f32 %v5988_v48, %v2115_v19 }
0x14cd   :  { %5432 = vtanh.f32 %v2118_v45  ;;  %v4600_v23 = vmul.f32 -1.442695, %v2118_v45 }
0x14cf   :  { %5434 = vpow2.f32 %v4600_v23 }
0x14d7   :  { %v5433_v21 = vpop.eup %5432 }
0x14d8   :  { %2128 = vrot.lane.b32.xlu1 %v5433_v21, %s5726_s3 }
0x14d9   :  { %v5435_v24 = vpop.eup %5434 }
0x14da   :  { %v2122_v25 = vadd.f32 1.0, %v5435_v24 }
0x14dc   :  { %5436 = vrcp.f32 %v2122_v25 }
0x14e6   :  { %v5437_v32 = vpop.eup %5436 }
0x14e7   :  { %v2126_v48 = vmul.f32 %v5437_v32, %v6177_v11  ;;  %v4604_v11 = vld [vmem:[%s6595_s5 + $0x8] sm:$0x3] }
0x1541   :  { %v2216_v26 = vpop.f32.mrb[26].mxu0 }
0x1542   :  { %v4990_v54 = vpop.f32.mrb[27].mxu0 }
0x1545   :  { %v2393_v28 = vpop.f32.mrb[18].mxu1 }
0x1546   :  { %v5008_v29 = vpop.f32.mrb[19].mxu1 }
0x154a   :  { %v2129_v34 = vpop.permute.xlu1 %2128 }
0x154b   :  { %v2131_v35 = vmul.f32 %v5437_v32, %v2129_v34 }
0x154d   :  { %2133 = vrot.lane.b32.xlu1 %v2131_v35, %s5727_s7 }
0x15bf   :  { %v2134_v36 = vpop.permute.xlu1 %2133 }
0x15c0   :  { %v6248_v37 = vadd.f32 %v2134_v36, %v2126_v48 }
0x15c2   :  { %5438 = vtanh.f32 %v6248_v37 }
0x15cc   :  { %v5439_v39 = vpop.eup %5438 }
0x15cd   :  { %2139 = vrot.lane.b32.xlu1 %v5439_v39, %s5725_s2 }
0x163f   :  { %v2140_v43 = vpop.permute.xlu1 %2139 }
0x1640   :  { %v2142_v44 = vmul.f32 %v5437_v32, %v2140_v43 }
0x1642   :  { %v2143_v61 = vmul.f32 %v2142_v44, %v6024_v13 }
0x1644   :  { %v2144_v46 = vadd.f32 %v2143_v61, %v6027_v16 }
0x1646   :  { %2221 = vrot.lane.b32.xlu1 %v2144_v46, %s5729_s0 }
0x16b8   :  { %v2222_v47 = vpop.permute.xlu1 %2221 }
0x16b9   :  { %4996 = vmatmul.mubr.msk.f32.vlgmr.msra.gmra.mrb[28].mxu0 %vm357_vm4, %v2222_v47 }
0x16ba   :  { %5010 = vmatpush3.msk.msra.mxu0 %vm234_vm1, %v5922_v7  ;;  %5011 = vmatprep.mubr.msk.f32.mxu0 %vm5723_vm0, %v5722_v1 }
0x16bb   :  { %5265 = vmatprep.subr.bf16.mxu0 %v5721_v0 }
0x16bd   :  { %5012 = vmatmul.mubr.msk.f32.vlgmr.msra.gmra.mrb[30].mxu0 %vm230_vm2, %v4604_v11 }
0x16be   :  { %5267 = vmatpush3.bf16.msra.mxu0 %v5957_v31  ;;  %5018 = vmatprep.mubr.msk.f32.mxu0 %vm5723_vm0, %v5722_v1 }
0x16bf   :  { %5032 = vmatprep.subr.mxu0 %v5722_v1 }
0x178c   :  { %v2291_v49 = vpop.f32.mrb[28].mxu0 }
0x178d   :  { %v2292_v7 = vadd.f32 %v2291_v49, %v2216_v26  ;;  %v4997_v50 = vpop.f32.mrb[29].mxu0 }
0x178f   :  { %v2295_v59 = vadd.f32 %v6057_v40, %v2292_v7 }
0x1790   :  { %v2466_v52 = vpop.f32.mrb[30].mxu0 }
0x1791   :  { %v2467_v63 = vadd.f32 %v2466_v52, %v2393_v28  ;;  %v5013_v53 = vpop.f32.mrb[31].mxu0  ;;  %v4603_v4 = vmul.f32 -1.442695, %v2295_v59 }
0x1793   :  { %v2470_v55 = vadd.f32 %v5942_v12, %v2467_v63 }
0x1795   :  { %5440 = vtanh.f32 %v2470_v55  ;;  %v4608_v56 = vmul.f32 -1.442695, %v2470_v55 }
0x1797   :  { %5442 = vpow2.f32 %v4608_v56 }
0x179f   :  { %v5441_v22 = vpop.eup %5440 }
0x17a0   :  { %2480 = vrot.lane.b32.xlu1 %v5441_v22, %s5724_s30 }
0x17a1   :  { %v5443_v57 = vpop.eup %5442 }
0x17a2   :  { %v2474_v27 = vadd.f32 1.0, %v5443_v57 }
0x17a4   :  { %5444 = vrcp.f32 %v2474_v27 }
0x17a5   :  { %5446 = vtanh.f32 %v2295_v59 }
0x17a6   :  { %5448 = vpow2.f32 %v4603_v4 }
0x17ae   :  { %v5445_v60 = vpop.eup %5444 }
0x17af   :  { %v5447_v12 = vpop.eup %5446  ;;  %v2478_v30 = vmul.f32 %v5445_v60, %v6205_v51 }
0x17b0   :  { %v5449_v8 = vpop.eup %5448 }
0x17b1   :  { %v2299_v10 = vadd.f32 1.0, %v5449_v8  ;;  %v4615_v8 = vld [vmem:[%s6595_s5 + $0xa] sm:$0x3] }
0x17b3   :  { %5450 = vrcp.f32 %v2299_v10 }
0x17bd   :  { %v5451_v18 = vpop.eup %5450 }
0x17be   :  { %v2303_v45 = vmul.f32 %v5451_v18, %v6216_v58 }
0x1812   :  { %v2481_v62 = vpop.permute.xlu1 %2480 }
0x1813   :  { %v2483_v3 = vmul.f32 %v5445_v60, %v2481_v62 }
0x1815   :  { %2485 = vrot.lane.b32.xlu0 %v2483_v3, %s5725_s2 }
0x1819   :  { %2498 = vrot.lane.b32.xlu0 %v2142_v44, %s5729_s0  ;;  %v6315_v44 = vld [vmem:[#allocation11] ss:$0 sm:$0xff] }
0x181d   :  { %2305 = vrot.lane.b32.xlu0 %v5447_v12, %s5730_s22 }
0x1887   :  { %v2486_v14 = vpop.permute.xlu0 %2485 }
0x1888   :  { %v6276_v15 = vadd.f32 %v2486_v14, %v2478_v30 }
0x188a   :  { %5452 = vtanh.f32 %v6276_v15 }
0x188b   :  { %v2499_v17 = vpop.permute.xlu0 %2498 }
0x188c   :  { %5019 = vmatmul.mubr.msk.f32.vlgmr.msra.gmra.mrb[32].mxu0 %vm357_vm4, %v2499_v17 }
0x188d   :  { %5033 = vmatpush3.msra.mxu0 %v6002_v2  ;;  %5034 = vmatprep.mubr.msk.f32.mxu0 %vm5723_vm0, %v5722_v1 }
0x188e   :  { %5274 = vmatprep.subr.bf16.mxu0 %v5721_v0 }
0x188f   :  { %v2306_v19 = vpop.permute.xlu0 %2305 }
0x1890   :  { %v2308_v20 = vmul.f32 %v5451_v18, %v2306_v19 }
0x1892   :  { %2310 = vrot.lane.b32.xlu0 %v2308_v20, %s5719_s26  ;;  %v6344_v20 = vld [vmem:[#allocation5] ss:$0 sm:$0xff] }
0x1894   :  { %v5453_v51 = vpop.eup %5452 }
0x1895   :  { %2491 = vrot.lane.b32.xlu1 %v5453_v51, %s5724_s30 }
0x1904   :  { %v2311_v21 = vpop.permute.xlu0 %2310 }
0x1905   :  { %v6287_v23 = vadd.f32 %v2311_v21, %v2303_v45 }
0x1907   :  { %5454 = vtanh.f32 %v6287_v23  ;;  %v2492_v2 = vpop.permute.xlu1 %2491 }
0x1908   :  { %v2494_v24 = vmul.f32 %v5445_v60, %v2492_v2 }
0x190a   :  { %v2495_v25 = vmul.f32 %v2494_v24, %v5974_v41 }
0x190c   :  { %v2496_v26 = vadd.f32 %v2495_v25, %v5976_v42 }
0x190e   :  { %2573 = vrot.lane.b32.xlu1 %v2496_v26, %s5725_s2 }
0x1911   :  { %v5455_v54 = vpop.eup %5454 }
0x1912   :  { %2316 = vrot.lane.b32.xlu0 %v5455_v54, %s5727_s7 }
0x195f   :  { %v2568_v28 = vpop.f32.mrb[32].mxu0 }
0x1960   :  { %v5020_v29 = vpop.f32.mrb[33].mxu0 }
0x1980   :  { %v2574_v32 = vpop.permute.xlu1 %2573 }
0x1981   :  { %5030 = vmatmul.mubr.msk.f32.vlgmr.msra.gmra.mrb[20].mxu1 %vm156_vm3, %v2574_v32 }
0x1982   :  { %5279 = vmatpush3.bf16.msra.mxu1 %v5917_v5  ;;  %5052 = vmatprep.mubr.msk.f32.mxu1 %vm5723_vm0, %v5722_v1 }
0x1983   :  { %5280 = vmatprep.subr.bf16.mxu1 %v5721_v0 }
0x1984   :  { %v2317_v58 = vpop.permute.xlu0 %2316 }
0x1985   :  { %v2319_v34 = vmul.f32 %v5451_v18, %v2317_v58 }
0x1986   :  { %5282 = vmatpush3.bf16.msra.mxu1 %v5930_v9 }
0x1987   :  { %2675 = vrot.lane.b32.xlu0 %v2319_v34, %s5731_s23  ;;  %5286 = vmatprep.subr.bf16.mxu1 %v5721_v0 }
0x198b   :  { %2852 = vrot.lane.b32.xlu0 %v2494_v24, %s5725_s2 }
0x19f9   :  { %v2676_v35 = vpop.permute.xlu0 %2675 }
0x19fa   :  { %5035 = vmatmul.mubr.msk.f32.vlgmr.msra.gmra.mrb[34].mxu0 %vm554_vm5, %v2676_v35 }
0x19fb   :  { %5276 = vmatpush3.bf16.msra.mxu0 %v6011_v6  ;;  %5041 = vmatprep.mubr.msk.f32.mxu0 %vm5723_vm0, %v5722_v1 }
0x19fc   :  { %5055 = vmatprep.subr.mxu0 %v5722_v1 }
0x19fd   :  { %v2853_v48 = vpop.permute.xlu0 %2852 }
0x19fe   :  { %5053 = vmatmul.mubr.msk.f32.vlgmr.msra.gmra.mrb[22].mxu1 %vm156_vm3, %v2853_v48 }
0x19ff   :  { %5288 = vmatpush3.bf16.msra.mxu1 %v5960_v33  ;;  %5075 = vmatprep.mubr.msk.f32.mxu1 %vm5723_vm0, %v5722_v1 }
0x1a00   :  { %5289 = vmatprep.subr.bf16.mxu1 %v5721_v0 }
0x1a03   :  { %5291 = vmatpush3.bf16.msra.mxu1 %v5966_v38 }
0x1a04   :  { %5295 = vmatprep.subr.bf16.mxu1 %v5721_v0 }
0x1a54   :  { %v2643_v36 = vpop.f32.mrb[20].mxu1 }
0x1a55   :  { %v2644_v39 = vadd.f32 %v2643_v36, %v2568_v28  ;;  %v5031_v43 = vpop.f32.mrb[21].mxu1 }
0x1a57   :  { %v2647_v61 = vadd.f32 %v6315_v44, %v2644_v39  ;;  %v6360_v39 = vld [vmem:[%s6580_s12] sm:$0xff] }
0x1a59   :  { %5456 = vtanh.f32 %v2647_v61  ;;  %v4611_v47 = vmul.f32 -1.442695, %v2647_v61 }
0x1a5b   :  { %5458 = vpow2.f32 %v4611_v47 }
0x1a63   :  { %v5457_v46 = vpop.eup %5456 }
0x1a64   :  { %2657 = vrot.lane.b32.xlu1 %v5457_v46, %s5726_s3 }
0x1a65   :  { %v5459_v11 = vpop.eup %5458 }
0x1a66   :  { %v2651_v49 = vadd.f32 1.0, %v5459_v11 }
0x1a68   :  { %5460 = vrcp.f32 %v2651_v49 }
0x1a72   :  { %v5461_v53 = vpop.eup %5460 }
0x1a73   :  { %v2655_v56 = vmul.f32 %v5461_v53, %v6248_v37  ;;  %v6329_v37 = vld [vmem:[#allocation2] sm:$0x7] }
0x1acd   :  { %v2745_v7 = vpop.f32.mrb[34].mxu0 }
0x1ace   :  { %v5036_v50 = vpop.f32.mrb[35].mxu0 }
0x1ad1   :  { %v2922_v52 = vpop.f32.mrb[22].mxu1 }
0x1ad2   :  { %v5054_v63 = vpop.f32.mrb[23].mxu1 }
0x1ad6   :  { %v2658_v55 = vpop.permute.xlu1 %2657 }
0x1ad7   :  { %v2660_v22 = vmul.f32 %v5461_v53, %v2658_v55 }
0x1ad9   :  { %2662 = vrot.lane.b32.xlu1 %v2660_v22, %s5727_s7 }
0x1b4b   :  { %v2663_v57 = vpop.permute.xlu1 %2662 }
0x1b4c   :  { %v6321_v27 = vadd.f32 %v2663_v57, %v2655_v56 }
0x1b4e   :  { %5462 = vtanh.f32 %v6321_v27 }
0x1b58   :  { %v5463_v59 = vpop.eup %5462 }
0x1b59   :  { %2668 = vrot.lane.b32.xlu1 %v5463_v59, %s5725_s2 }
0x1bcb   :  { %v2669_v60 = vpop.permute.xlu1 %2668 }
0x1bcc   :  { %v2671_v62 = vmul.f32 %v5461_v53, %v2669_v60 }
0x1bce   :  { %v2672_v3 = vmul.f32 %v2671_v62, %v6024_v13 }
0x1bd0   :  { %v2673_v12 = vadd.f32 %v2672_v3, %v6027_v16 }
0x1bd2   :  { %2750 = vrot.lane.b32.xlu1 %v2673_v12, %s5729_s0 }
0x1c44   :  { %v2751_v4 = vpop.permute.xlu1 %2750 }
0x1c45   :  { %5042 = vmatmul.mubr.msk.f32.vlgmr.msra.gmra.mrb[36].mxu0 %vm357_vm4, %v2751_v4 }
0x1c46   :  { %5056 = vmatpush3.msk.msra.mxu0 %vm234_vm1, %v6329_v37  ;;  %5057 = vmatprep.mubr.msk.f32.mxu0 %vm5723_vm0, %v5722_v1 }
0x1c47   :  { %5283 = vmatprep.subr.bf16.mxu0 %v5721_v0 }
0x1c49   :  { %5058 = vmatmul.mubr.msk.f32.vlgmr.msra.gmra.mrb[38].mxu0 %vm230_vm2, %v4615_v8 }
0x1c4a   :  { %5285 = vmatpush3.bf16.msra.mxu0 %v5957_v31  ;;  %5064 = vmatprep.mubr.msk.f32.mxu0 %vm5723_vm0, %v5722_v1 }
0x1c4b   :  { %5078 = vmatprep.subr.mxu0 %v5722_v1 }
0x1d18   :  { %v2820_v10 = vpop.f32.mrb[36].mxu0 }
0x1d19   :  { %v2821_v30 = vadd.f32 %v2820_v10, %v2745_v7  ;;  %v5043_v14 = vpop.f32.mrb[37].mxu0 }
0x1d1b   :  { %v2824_v25 = vadd.f32 %v6057_v40, %v2821_v30 }
0x1d1c   :  { %v2995_v17 = vpop.f32.mrb[38].mxu0 }
0x1d1d   :  { %v2996_v18 = vadd.f32 %v2995_v17, %v2922_v52  ;;  %v5059_v19 = vpop.f32.mrb[39].mxu0  ;;  %v4614_v32 = vmul.f32 -1.442695, %v2824_v25 }
0x1d1f   :  { %v2999_v51 = vadd.f32 %v6344_v20, %v2996_v18 }
0x1d21   :  { %5464 = vtanh.f32 %v2999_v51  ;;  %v4619_v21 = vmul.f32 -1.442695, %v2999_v51 }
0x1d23   :  { %5466 = vpow2.f32 %v4619_v21 }
0x1d2b   :  { %v5465_v45 = vpop.eup %5464 }
0x1d2c   :  { %3009 = vrot.lane.b32.xlu1 %v5465_v45, %s5724_s30 }
0x1d2d   :  { %v5467_v2 = vpop.eup %5466 }
0x1d2e   :  { %v3003_v24 = vadd.f32 1.0, %v5467_v2 }
0x1d30   :  { %5468 = vrcp.f32 %v3003_v24 }
0x1d31   :  { %5470 = vtanh.f32 %v2824_v25 }
0x1d32   :  { %5472 = vpow2.f32 %v4614_v32 }
0x1d3a   :  { %v5469_v26 = vpop.eup %5468 }
0x1d3b   :  { %v5471_v29 = vpop.eup %5470  ;;  %v3007_v35 = vmul.f32 %v5469_v26, %v6276_v15 }
0x1d3c   :  { %v5473_v58 = vpop.eup %5472 }
0x1d3d   :  { %v2828_v34 = vadd.f32 1.0, %v5473_v58 }
0x1d3f   :  { %5474 = vrcp.f32 %v2828_v34 }
0x1d49   :  { %v5475_v15 = vpop.eup %5474 }
0x1d4a   :  { %v2832_v47 = vmul.f32 %v5475_v15, %v6287_v23 }
0x1d9e   :  { %v3010_v54 = vpop.permute.xlu1 %3009 }
0x1d9f   :  { %v3012_v28 = vmul.f32 %v5469_v26, %v3010_v54 }
0x1da1   :  { %3014 = vrot.lane.b32.xlu0 %v3012_v28, %s5725_s2 }
0x1da5   :  { %3027 = vrot.lane.b32.xlu0 %v2671_v62, %s5729_s0 }
0x1da9   :  { %2834 = vrot.lane.b32.xlu0 %v5471_v29, %s5730_s22 }
0x1e13   :  { %v3015_v48 = vpop.permute.xlu0 %3014 }
0x1e14   :  { %v6353_v40 = vadd.f32 %v3015_v48, %v3007_v35 }
0x1e16   :  { %5476 = vtanh.f32 %v6353_v40 }
0x1e17   :  { %v3028_v36 = vpop.permute.xlu0 %3027 }
0x1e18   :  { %5065 = vmatmul.mubr.msk.f32.vlgmr.msra.gmra.mrb[40].mxu0 %vm357_vm4, %v3028_v36 }
0x1e19   :  { %5079 = vmatpush3.msra.mxu0 %v6360_v39  ;;  %5080 = vmatprep.mubr.msk.f32.mxu0 %vm5723_vm0, %v5722_v1 }
0x1e1a   :  { %5292 = vmatprep.subr.bf16.mxu0 %v5721_v0 }
0x1e1b   :  { %v2835_v43 = vpop.permute.xlu0 %2834 }
0x1e1c   :  { %v2837_v61 = vmul.f32 %v5475_v15, %v2835_v43 }
0x1e1e   :  { %2839 = vrot.lane.b32.xlu0 %v2837_v61, %s5719_s26 }
0x1e20   :  { %v5477_v46 = vpop.eup %5476 }
0x1e21   :  { %3020 = vrot.lane.b32.xlu1 %v5477_v46, %s5724_s30 }
0x1e90   :  { %v2840_v11 = vpop.permute.xlu0 %2839 }
0x1e91   :  { %v6369_v49 = vadd.f32 %v2840_v11, %v2832_v47 }
0x1e93   :  { %5478 = vtanh.f32 %v6369_v49  ;;  %v3021_v7 = vpop.permute.xlu1 %3020 }
0x1e94   :  { %v3023_v50 = vmul.f32 %v5469_v26, %v3021_v7 }
0x1e96   :  { %v3024_v52 = vmul.f32 %v3023_v50, %v5974_v41 }
0x1e98   :  { %v3025_v63 = vadd.f32 %v3024_v52, %v5976_v42  ;;  %v6427_v52 = vld [vmem:[%s6581_s13] ss:$0 sm:$0xff] }
0x1e9a   :  { %3102 = vrot.lane.b32.xlu1 %v3025_v63, %s5725_s2 }
0x1e9d   :  { %v5479_v53 = vpop.eup %5478 }
0x1e9e   :  { %2845 = vrot.lane.b32.xlu0 %v5479_v53, %s5727_s7 }
0x1eeb   :  { %v3097_v55 = vpop.f32.mrb[40].mxu0 }
0x1eec   :  { %v5066_v22 = vpop.f32.mrb[41].mxu0 }
0x1f0c   :  { %v3103_v56 = vpop.permute.xlu1 %3102 }
0x1f0d   :  { %5076 = vmatmul.mubr.msk.f32.vlgmr.msra.gmra.mrb[24].mxu1 %vm156_vm3, %v3103_v56 }
0x1f0e   :  { %5297 = vmatpush3.bf16.msra.mxu1 %v5917_v5  ;;  %5098 = vmatprep.mubr.msk.f32.mxu1 %vm5723_vm0, %v5722_v1 }
0x1f0f   :  { %5298 = vmatprep.subr.bf16.mxu1 %v5721_v0 }
0x1f10   :  { %v2846_v23 = vpop.permute.xlu0 %2845 }
0x1f11   :  { %v2848_v57 = vmul.f32 %v5475_v15, %v2846_v23 }
0x1f12   :  { %5300 = vmatpush3.bf16.msra.mxu1 %v5930_v9 }
0x1f13   :  { %3204 = vrot.lane.b32.xlu0 %v2848_v57, %s5731_s23  ;;  %5304 = vmatprep.subr.bf16.mxu1 %v5721_v0 }
0x1f17   :  { %3381 = vrot.lane.b32.xlu0 %v3023_v50, %s5725_s2 }
0x1f85   :  { %v3205_v59 = vpop.permute.xlu0 %3204 }
0x1f86   :  { %5081 = vmatmul.mubr.msk.f32.vlgmr.msra.gmra.mrb[42].mxu0 %vm554_vm5, %v3205_v59 }
0x1f87   :  { %5294 = vmatpush3.bf16.msra.mxu0 %v6011_v6  ;;  %5087 = vmatprep.mubr.msk.f32.mxu0 %vm5723_vm0, %v5722_v1 }
0x1f88   :  { %5101 = vmatprep.subr.mxu0 %v5722_v1 }
0x1f89   :  { %v3382_v60 = vpop.permute.xlu0 %3381 }
0x1f8a   :  { %5099 = vmatmul.mubr.msk.f32.vlgmr.msra.gmra.mrb[26].mxu1 %vm156_vm3, %v3382_v60 }
0x1f8b   :  { %5306 = vmatpush3.bf16.msra.mxu1 %v5960_v33  ;;  %5121 = vmatprep.mubr.msk.f32.mxu1 %vm5723_vm0, %v5722_v1 }
0x1f8c   :  { %5307 = vmatprep.subr.bf16.mxu1 %v5721_v0 }
0x1f8f   :  { %5309 = vmatpush3.bf16.msra.mxu1 %v5966_v38 }
0x1f90   :  { %5313 = vmatprep.subr.bf16.mxu1 %v5721_v0 }
0x1fe0   :  { %v3172_v62 = vpop.f32.mrb[24].mxu1 }
0x1fe1   :  { %v3173_v3 = vadd.f32 %v3172_v62, %v3097_v55  ;;  %v5077_v12 = vpop.f32.mrb[25].mxu1 }
0x1fe3   :  { %v3176_v4 = vadd.f32 %v6315_v44, %v3173_v3 }
0x1fe5   :  { %5480 = vtanh.f32 %v3176_v4  ;;  %v4622_v10 = vmul.f32 -1.442695, %v3176_v4 }
0x1fe7   :  { %5482 = vpow2.f32 %v4622_v10 }
0x1fef   :  { %v5481_v8 = vpop.eup %5480 }
0x1ff0   :  { %3186 = vrot.lane.b32.xlu1 %v5481_v8, %s5726_s3 }
0x1ff1   :  { %v5483_v30 = vpop.eup %5482 }
0x1ff2   :  { %v3180_v14 = vadd.f32 1.0, %v5483_v30 }
0x1ff4   :  { %5484 = vrcp.f32 %v3180_v14 }
0x1ffe   :  { %v5485_v45 = vpop.eup %5484 }
0x1fff   :  { %v3184_v24 = vmul.f32 %v5485_v45, %v6321_v27  ;;  %v4626_v27 = vld [vmem:[%s6595_s5 + $0xc] sm:$0x3] }
0x2059   :  { %v3274_v17 = vpop.f32.mrb[42].mxu0 }
0x205a   :  { %v5082_v18 = vpop.f32.mrb[43].mxu0 }
0x205d   :  { %v3451_v19 = vpop.f32.mrb[26].mxu1 }
0x205e   :  { %v5100_v51 = vpop.f32.mrb[27].mxu1 }
0x2062   :  { %v3187_v21 = vpop.permute.xlu1 %3186 }
0x2063   :  { %v3189_v2 = vmul.f32 %v5485_v45, %v3187_v21 }
0x2065   :  { %3191 = vrot.lane.b32.xlu1 %v3189_v2, %s5727_s7 }
0x20d7   :  { %v3192_v25 = vpop.permute.xlu1 %3191 }
0x20d8   :  { %v6401_v26 = vadd.f32 %v3192_v25, %v3184_v24 }
0x20da   :  { %5486 = vtanh.f32 %v6401_v26 }
0x20e4   :  { %v5487_v54 = vpop.eup %5486 }
0x20e5   :  { %3197 = vrot.lane.b32.xlu1 %v5487_v54, %s5725_s2 }
0x2157   :  { %v3198_v28 = vpop.permute.xlu1 %3197 }
0x2158   :  { %v3200_v29 = vmul.f32 %v5485_v45, %v3198_v28 }
0x215a   :  { %v3201_v32 = vmul.f32 %v3200_v29, %v6024_v13 }
0x215c   :  { %v3202_v58 = vadd.f32 %v3201_v32, %v6027_v16 }
0x215e   :  { %3279 = vrot.lane.b32.xlu1 %v3202_v58, %s5729_s0 }
0x21d0   :  { %v3280_v34 = vpop.permute.xlu1 %3279 }
0x21d1   :  { %5088 = vmatmul.mubr.msk.f32.vlgmr.msra.gmra.mrb[44].mxu0 %vm357_vm4, %v3280_v34 }
0x21d2   :  { %5102 = vmatpush3.msk.msra.mxu0 %vm234_vm1, %v6329_v37  ;;  %5103 = vmatprep.mubr.msk.f32.mxu0 %vm5723_vm0, %v5722_v1 }
0x21d3   :  { %5301 = vmatprep.subr.bf16.mxu0 %v5721_v0 }
0x21d5   :  { %5104 = vmatmul.mubr.msk.f32.vlgmr.msra.gmra.mrb[46].mxu0 %vm230_vm2, %v4626_v27 }
0x21d6   :  { %5303 = vmatpush3.bf16.msra.mxu0 %v5957_v31  ;;  %5110 = vmatprep.mubr.msk.f32.mxu0 %vm5723_vm0, %v5722_v1 }
0x21d7   :  { %5124 = vmatprep.subr.mxu0 %v5722_v1 }
0x22a4   :  { %v3349_v35 = vpop.f32.mrb[44].mxu0 }
0x22a5   :  { %v3350_v48 = vadd.f32 %v3349_v35, %v3274_v17  ;;  %v5089_v36 = vpop.f32.mrb[45].mxu0 }
0x22a7   :  { %v3353_v63 = vadd.f32 %v6427_v52, %v3350_v48 }
0x22a8   :  { %v3524_v15 = vpop.f32.mrb[46].mxu0 }
0x22a9   :  { %v3525_v43 = vadd.f32 %v3524_v15, %v3451_v19  ;;  %v5105_v61 = vpop.f32.mrb[47].mxu0  ;;  %v4625_v23 = vmul.f32 -1.442695, %v3353_v63 }
0x22ab   :  { %v3528_v46 = vadd.f32 %v6344_v20, %v3525_v43 }
0x22ad   :  { %5488 = vtanh.f32 %v3528_v46  ;;  %v4630_v11 = vmul.f32 -1.442695, %v3528_v46 }
0x22af   :  { %5490 = vpow2.f32 %v4630_v11 }
0x22b7   :  { %v5489_v47 = vpop.eup %5488 }
0x22b8   :  { %3538 = vrot.lane.b32.xlu1 %v5489_v47, %s5724_s30 }
0x22b9   :  { %v5491_v7 = vpop.eup %5490 }
0x22ba   :  { %v3532_v50 = vadd.f32 1.0, %v5491_v7 }
0x22bc   :  { %5492 = vrcp.f32 %v3532_v50 }
0x22bd   :  { %5494 = vtanh.f32 %v3353_v63 }
0x22be   :  { %5496 = vpow2.f32 %v4625_v23 }
0x22c6   :  { %v5493_v53 = vpop.eup %5492 }
0x22c7   :  { %v5495_v56 = vpop.eup %5494  ;;  %v3536_v60 = vmul.f32 %v5493_v53, %v6353_v40 }
0x22c8   :  { %v5497_v57 = vpop.eup %5496 }
0x22c9   :  { %v3357_v59 = vadd.f32 1.0, %v5497_v57 }
0x22cb   :  { %5498 = vrcp.f32 %v3357_v59 }
0x22d5   :  { %v5499_v4 = vpop.eup %5498 }
0x22d6   :  { %v3361_v30 = vmul.f32 %v5499_v4, %v6369_v49 }
0x232a   :  { %v3539_v55 = vpop.permute.xlu1 %3538 }
0x232b   :  { %v3541_v22 = vmul.f32 %v5493_v53, %v3539_v55 }
0x232d   :  { %3543 = vrot.lane.b32.xlu0 %v3541_v22, %s5725_s2 }
0x2331   :  { %3556 = vrot.lane.b32.xlu0 %v3200_v29, %s5729_s0 }
0x2335   :  { %3363 = vrot.lane.b32.xlu0 %v5495_v56, %s5730_s22 }
0x239f   :  { %v3544_v62 = vpop.permute.xlu0 %3543 }
0x23a0   :  { %v6434_v3 = vadd.f32 %v3544_v62, %v3536_v60 }
0x23a2   :  { %5500 = vtanh.f32 %v6434_v3 }
0x23a3   :  { %v3557_v12 = vpop.permute.xlu0 %3556 }
0x23a4   :  { %5111 = vmatmul.mubr.msk.f32.vlgmr.msra.gmra.mrb[48].mxu0 %vm357_vm4, %v3557_v12 }
0x23a5   :  { %5125 = vmatpush3.msra.mxu0 %v6360_v39  ;;  %5126 = vmatprep.mubr.msk.f32.mxu0 %vm5723_vm0, %v5722_v1 }
0x23a6   :  { %5310 = vmatprep.subr.bf16.mxu0 %v5721_v0 }
0x23a7   :  { %v3364_v8 = vpop.permute.xlu0 %3363 }
0x23a8   :  { %v3366_v10 = vmul.f32 %v5499_v4, %v3364_v8 }
0x23aa   :  { %3368 = vrot.lane.b32.xlu0 %v3366_v10, %s5719_s26 }
0x23ac   :  { %v5501_v40 = vpop.eup %5500 }
0x23ad   :  { %3549 = vrot.lane.b32.xlu1 %v5501_v40, %s5724_s30 }
0x241c   :  { %v3369_v14 = vpop.permute.xlu0 %3368 }
0x241d   :  { %v6445_v17 = vadd.f32 %v3369_v14, %v3361_v30 }
0x241f   :  { %5502 = vtanh.f32 %v6445_v17  ;;  %v3550_v18 = vpop.permute.xlu1 %3549 }
0x2420   :  { %v3552_v19 = vmul.f32 %v5493_v53, %v3550_v18 }
0x2422   :  { %v3553_v51 = vmul.f32 %v3552_v19, %v5974_v41 }
0x2424   :  { %v3554_v45 = vadd.f32 %v3553_v51, %v5976_v42 }
0x2426   :  { %3631 = vrot.lane.b32.xlu1 %v3554_v45, %s5725_s2 }
0x2429   :  { %v5503_v21 = vpop.eup %5502 }
0x242a   :  { %3374 = vrot.lane.b32.xlu0 %v5503_v21, %s5727_s7 }
0x2477   :  { %v3626_v2 = vpop.f32.mrb[48].mxu0 }
0x2478   :  { %v5112_v24 = vpop.f32.mrb[49].mxu0 }
0x2498   :  { %v3632_v25 = vpop.permute.xlu1 %3631 }
0x2499   :  { %5122 = vmatmul.mubr.msk.f32.vlgmr.msra.gmra.mrb[28].mxu1 %vm156_vm3, %v3632_v25 }
0x249a   :  { %5315 = vmatpush3.bf16.msra.mxu1 %v5917_v5  ;;  %5144 = vmatprep.mubr.msk.f32.mxu1 %vm5723_vm0, %v5722_v1 }
0x249b   :  { %5316 = vmatprep.subr.bf16.mxu1 %v5721_v0 }
0x249c   :  { %v3375_v49 = vpop.permute.xlu0 %3374 }
0x249d   :  { %v3377_v54 = vmul.f32 %v5499_v4, %v3375_v49 }
0x249e   :  { %5318 = vmatpush3.bf16.msra.mxu1 %v5930_v9 }
0x249f   :  { %3733 = vrot.lane.b32.xlu0 %v3377_v54, %s5731_s23  ;;  %5322 = vmatprep.subr.bf16.mxu1 %v5721_v0 }
0x24a3   :  { %3910 = vrot.lane.b32.xlu0 %v3552_v19, %s5725_s2 }
0x2511   :  { %v3734_v28 = vpop.permute.xlu0 %3733 }
0x2512   :  { %5127 = vmatmul.mubr.msk.f32.vlgmr.msra.gmra.mrb[50].mxu0 %vm554_vm5, %v3734_v28 }
0x2513   :  { %5312 = vmatpush3.bf16.msra.mxu0 %v6011_v6  ;;  %5133 = vmatprep.mubr.msk.f32.mxu0 %vm5723_vm0, %v5722_v1 }
0x2514   :  { %5147 = vmatprep.subr.mxu0 %v5722_v1 }
0x2515   :  { %v3911_v5 = vpop.permute.xlu0 %3910 }
0x2516   :  { %5145 = vmatmul.mubr.msk.f32.vlgmr.msra.gmra.mrb[30].mxu1 %vm156_vm3, %v3911_v5 }
0x2517   :  { %5324 = vmatpush3.bf16.msra.mxu1 %v5960_v33  ;;  %5167 = vmatprep.mubr.msk.f32.mxu1 %vm5723_vm0, %v5722_v1 }
0x2518   :  { %5325 = vmatprep.subr.bf16.mxu1 %v5721_v0 }
0x251b   :  { %5327 = vmatpush3.bf16.msra.mxu1 %v5966_v38 }
0x251c   :  { %5182 = vmatprep.subr.mxu1 %v5722_v1 }
0x256c   :  { %v3701_v9 = vpop.f32.mrb[28].mxu1 }
0x256d   :  { %v3702_v29 = vadd.f32 %v3701_v9, %v3626_v2  ;;  %v5123_v32 = vpop.f32.mrb[29].mxu1 }
0x256f   :  { %v3705_v58 = vadd.f32 %v6315_v44, %v3702_v29 }
0x2571   :  { %5504 = vtanh.f32 %v3705_v58  ;;  %v4633_v27 = vmul.f32 -1.442695, %v3705_v58 }
0x2573   :  { %5506 = vpow2.f32 %v4633_v27 }
0x257b   :  { %v5505_v34 = vpop.eup %5504 }
0x257c   :  { %3715 = vrot.lane.b32.xlu1 %v5505_v34, %s5726_s3 }
0x257d   :  { %v5507_v33 = vpop.eup %5506 }
0x257e   :  { %v3709_v35 = vadd.f32 1.0, %v5507_v33 }
0x2580   :  { %5508 = vrcp.f32 %v3709_v35 }
0x258a   :  { %v5509_v43 = vpop.eup %5508 }
0x258b   :  { %v3713_v47 = vmul.f32 %v5509_v43, %v6401_v26  ;;  %v4637_v26 = vld [vmem:[%s6595_s5 + $0xe] sm:$0x3] }
0x25e5   :  { %v3803_v48 = vpop.f32.mrb[50].mxu0 }
0x25e6   :  { %v5128_v36 = vpop.f32.mrb[51].mxu0 }
0x25e9   :  { %v3980_v15 = vpop.f32.mrb[30].mxu1 }
0x25ea   :  { %v5146_v38 = vpop.f32.mrb[31].mxu1 }
0x25ee   :  { %v3716_v61 = vpop.permute.xlu1 %3715 }
0x25ef   :  { %v3718_v46 = vmul.f32 %v5509_v43, %v3716_v61 }
0x25f1   :  { %3720 = vrot.lane.b32.xlu1 %v3718_v46, %s5727_s7 }
0x2663   :  { %v3721_v11 = vpop.permute.xlu1 %3720 }
0x2664   :  { %v6477_v7 = vadd.f32 %v3721_v11, %v3713_v47 }
0x2666   :  { %5510 = vtanh.f32 %v6477_v7 }
0x2670   :  { %v5511_v50 = vpop.eup %5510 }
0x2671   :  { %3726 = vrot.lane.b32.xlu1 %v5511_v50, %s5725_s2 }
0x26e3   :  { %v3727_v63 = vpop.permute.xlu1 %3726 }
0x26e4   :  { %v3729_v53 = vmul.f32 %v5509_v43, %v3727_v63 }
0x26e6   :  { %v3730_v55 = vmul.f32 %v3729_v53, %v6024_v13 }
0x26e8   :  { %v3731_v22 = vadd.f32 %v3730_v55, %v6027_v16 }
0x26ea   :  { %3808 = vrot.lane.b32.xlu1 %v3731_v22, %s5729_s0 }
0x275c   :  { %v3809_v56 = vpop.permute.xlu1 %3808 }
0x275d   :  { %5134 = vmatmul.mubr.msk.f32.vlgmr.msra.gmra.mrb[52].mxu0 %vm357_vm4, %v3809_v56 }
0x275e   :  { %5148 = vmatpush3.msk.msra.mxu0 %vm234_vm1, %v6329_v37  ;;  %5149 = vmatprep.mubr.msk.f32.mxu0 %vm5723_vm0, %v5722_v1 }
0x275f   :  { %5319 = vmatprep.subr.bf16.mxu0 %v5721_v0 }
0x2761   :  { %5150 = vmatmul.mubr.msk.f32.vlgmr.msra.gmra.mrb[54].mxu0 %vm230_vm2, %v4637_v26 }
0x2762   :  { %5321 = vmatpush3.bf16.msra.mxu0 %v5957_v31  ;;  %5156 = vmatprep.mubr.msk.f32.mxu0 %vm5723_vm0, %v5722_v1 }
0x2763   :  { %5170 = vmatprep.subr.mxu0 %v5722_v1 }
0x2830   :  { %v3878_v23 = vpop.f32.mrb[52].mxu0 }
0x2831   :  { %v3879_v37 = vadd.f32 %v3878_v23, %v3803_v48  ;;  %v5135_v57 = vpop.f32.mrb[53].mxu0 }
0x2833   :  { %v3882_v40 = vadd.f32 %v6427_v52, %v3879_v37 }
0x2834   :  { %v4053_v59 = vpop.f32.mrb[54].mxu0 }
0x2835   :  { %v4054_v60 = vadd.f32 %v4053_v59, %v3980_v15  ;;  %v5151_v62 = vpop.f32.mrb[55].mxu0  ;;  %v4636_v19 = vmul.f32 -1.442695, %v3882_v40 }
0x2837   :  { %v4057_v12 = vadd.f32 %v6344_v20, %v4054_v60 }
0x2839   :  { %5512 = vtanh.f32 %v4057_v12  ;;  %v4641_v8 = vmul.f32 -1.442695, %v4057_v12 }
0x283b   :  { %5514 = vpow2.f32 %v4641_v8 }
0x2843   :  { %v5513_v4 = vpop.eup %5512 }
0x2844   :  { %4067 = vrot.lane.b32.xlu1 %v5513_v4, %s5724_s30 }
0x2845   :  { %v5515_v31 = vpop.eup %5514 }
0x2846   :  { %v4061_v10 = vadd.f32 1.0, %v5515_v31 }
0x2848   :  { %5516 = vrcp.f32 %v4061_v10 }
0x2849   :  { %5518 = vtanh.f32 %v3882_v40  ;;  %v4648_v40 = vld [vmem:[%s6582_s14] ss:$0 sm:$0xff] }
0x284a   :  { %5520 = vpow2.f32 %v4636_v19  ;;  %v4649_v19 = vld [vmem:[%s6583_s15] ss:$0 sm:$0xff] }
0x2852   :  { %v5517_v30 = vpop.eup %5516 }
0x2853   :  { %v5519_v20 = vpop.eup %5518  ;;  %v4065_v21 = vmul.f32 %v5517_v30, %v6434_v3 }
0x2854   :  { %v5521_v51 = vpop.eup %5520 }
0x2855   :  { %v3886_v45 = vadd.f32 1.0, %v5521_v51 }
0x2857   :  { %5522 = vrcp.f32 %v3886_v45 }
0x2861   :  { %v5523_v49 = vpop.eup %5522 }
0x2862   :  { %v3890_v3 = vmul.f32 %v5523_v49, %v6445_v17 }
0x28b6   :  { %v4068_v14 = vpop.permute.xlu1 %4067 }
0x28b7   :  { %v4070_v18 = vmul.f32 %v5517_v30, %v4068_v14 }
0x28b9   :  { %4072 = vrot.lane.b32.xlu0 %v4070_v18, %s5725_s2  ;;  %v4454_v18 = vld [vmem:[%s6584_s16] sm:$0xff] }
0x28bd   :  { %4085 = vrot.lane.b32.xlu0 %v3729_v53, %s5729_s0 }
0x28c1   :  { %3892 = vrot.lane.b32.xlu0 %v5519_v20, %s5730_s22 }
0x292b   :  { %v4073_v2 = vpop.permute.xlu0 %4072 }
0x292c   :  { %v4075_v24 = vadd.f32 %v4073_v2, %v4065_v21 }
0x292e   :  { %5524 = vtanh.f32 %v4075_v24 }
0x292f   :  { %v4086_v25 = vpop.permute.xlu0 %4085 }
0x2930   :  { %5157 = vmatmul.mubr.msk.f32.vlgmr.msra.gmra.mrb[56].mxu0 %vm357_vm4, %v4086_v25 }
0x2931   :  { %5171 = vmatpush3.msra.mxu0 %v6360_v39  ;;  %5172 = vmatprep.mubr.msk.f32.mxu0 %vm5723_vm0, %v5722_v1 }
0x2932   :  { %5328 = vmatprep.subr.bf16.mxu0 %v5721_v0 }
0x2933   :  { %v3893_v54 = vpop.permute.xlu0 %3892 }
0x2934   :  { %v3895_v28 = vmul.f32 %v5523_v49, %v3893_v54  ;;  %v4650_v54 = vld [vmem:[%s6585_s17] ss:$0 sm:$0xff] }
0x2936   :  { %3897 = vrot.lane.b32.xlu0 %v3895_v28, %s5719_s26 }
0x2938   :  { %v5525_v5 = vpop.eup %5524 }
0x2939   :  { %4078 = vrot.lane.b32.xlu1 %v5525_v5, %s5724_s30 }
0x29a8   :  { %v3898_v9 = vpop.permute.xlu0 %3897 }
0x29a9   :  { %v6513_v29 = vadd.f32 %v3898_v9, %v3890_v3 }
0x29ab   :  { %5526 = vtanh.f32 %v6513_v29  ;;  %v4079_v39 = vpop.permute.xlu1 %4078 }
0x29ac   :  { %v4081_v32 = vmul.f32 %v5517_v30, %v4079_v39 }
0x29ae   :  { %v4082_v58 = vmul.f32 %v4081_v32, %v5974_v41 }
0x29b0   :  { %v4083_v0 = vadd.f32 %v4082_v58, %v5976_v42 }
0x29b2   :  { %4160 = vrot.lane.b32.xlu1 %v4083_v0, %s5725_s2 }
0x29b5   :  { %v5527_v34 = vpop.eup %5526 }
0x29b6   :  { %3903 = vrot.lane.b32.xlu0 %v5527_v34, %s5727_s7 }
0x2a03   :  { %v4155_v27 = vpop.f32.mrb[56].mxu0 }
0x2a04   :  { %v5158_v33 = vpop.f32.mrb[57].mxu0 }
0x2a24   :  { %v4161_v35 = vpop.permute.xlu1 %4160 }
0x2a25   :  { %5168 = vmatmul.mubr.msk.f32.vlgmr.msra.gmra.mrb[32].mxu1 %vm156_vm3, %v4161_v35 }
0x2a26   :  { %5184 = vmatprep.mubr.msk.f32.mxu1 %vm5723_vm0, %v5722_v1  ;;  %5183 = vmatpush3.msra.mxu1 %v4454_v18 }
0x2a28   :  { %v3904_v17 = vpop.permute.xlu0 %3903 }
0x2a29   :  { %v3906_v48 = vmul.f32 %v5523_v49, %v3904_v17 }
0x2a2b   :  { %4262 = vrot.lane.b32.xlu0 %v3906_v48, %s5731_s23 }
0x2a9d   :  { %v4263_v41 = vpop.permute.xlu0 %4262 }
0x2a9e   :  { %5173 = vmatmul.mubr.msk.f32.vlgmr.msra.gmra.mrb[58].mxu0 %vm554_vm5, %v4263_v41 }
0x2a9f   :  { %5330 = vmatpush3.bf16.msra.mxu0 %v6011_v6  ;;  %5179 = vmatprep.mubr.msk.f32.mxu0 %vm5723_vm0, %v5722_v1 }
0x2af8   :  { %v4230_v42 = vpop.f32.mrb[32].mxu1 }
0x2af9   :  { %v4231_v36 = vadd.f32 %v4230_v42, %v4155_v27  ;;  %v5169_v15 = vpop.f32.mrb[33].mxu1 }
0x2afb   :  { %v4234_v38 = vadd.f32 %v6315_v44, %v4231_v36 }
0x2afd   :  { %5528 = vtanh.f32 %v4234_v38  ;;  %v4644_v61 = vmul.f32 -1.442695, %v4234_v38 }
0x2aff   :  { %5530 = vpow2.f32 %v4644_v61 }
0x2b07   :  { %v5529_v43 = vpop.eup %5528 }
0x2b08   :  { %4244 = vrot.lane.b32.xlu1 %v5529_v43, %s5726_s3 }
0x2b09   :  { %v5531_v46 = vpop.eup %5530 }
0x2b0a   :  { %v4238_v47 = vadd.f32 1.0, %v5531_v46 }
0x2b0c   :  { %5532 = vrcp.f32 %v4238_v47 }
0x2b16   :  { %v5533_v6 = vpop.eup %5532 }
0x2b17   :  { %v4242_v1 = vmul.f32 %v5533_v6, %v6477_v7 }
0x2b71   :  { %v4332_v11 = vpop.f32.mrb[58].mxu0 }
0x2b72   :  { %v5174_v50 = vpop.f32.mrb[59].mxu0 }
0x2b7a   :  { %v4245_v63 = vpop.permute.xlu1 %4244 }
0x2b7b   :  { %v4247_v53 = vmul.f32 %v5533_v6, %v4245_v63 }
0x2b7d   :  { %4249 = vrot.lane.b32.xlu1 %v4247_v53, %s5727_s7 }
0x2bef   :  { %v4250_v55 = vpop.permute.xlu1 %4249 }
0x2bf0   :  { %v4252_v44 = vadd.f32 %v4250_v55, %v4242_v1 }
0x2bf2   :  { %5534 = vtanh.f32 %v4252_v44 }
0x2bfc   :  { %v5535_v22 = vpop.eup %5534 }
0x2bfd   :  { %4255 = vrot.lane.b32.xlu1 %v5535_v22, %s5725_s2  ;;  %s5732_s2 = smov 24  }
0x2c6f   :  { %v4256_v56 = vpop.permute.xlu1 %4255 }
0x2c70   :  { %v4258_v26 = vmul.f32 %v5533_v6, %v4256_v56 }
0x2c72   :  { %v4259_v23 = vmul.f32 %v4258_v26, %v6024_v13 }
0x2c74   :  { %v4260_v37 = vadd.f32 %v4259_v23, %v6027_v16 }
0x2c76   :  { %4337 = vrot.lane.b32.xlu1 %v4260_v37, %s5729_s0 }
0x2ce8   :  { %v4338_v57 = vpop.permute.xlu1 %4337 }
0x2ce9   :  { %5180 = vmatmul.mubr.msk.f32.vlgmr.msra.gmra.mrb[60].mxu0 %vm357_vm4, %v4338_v57 }
0x2dbc   :  { %v4407_v59 = vpop.f32.mrb[60].mxu0 }
0x2dbd   :  { %v4408_v60 = vadd.f32 %v4407_v59, %v4332_v11  ;;  %v5181_v7 = vpop.f32.mrb[61].mxu0 }
0x2dbf   :  { %v4411_v62 = vadd.f32 %v6427_v52, %v4408_v60 }
0x2dc1   :  { %5536 = vtanh.f32 %v4411_v62  ;;  %v4647_v4 = vmul.f32 -1.442695, %v4411_v62 }
0x2dc3   :  { %5538 = vpow2.f32 %v4647_v4 }
0x2dcb   :  { %v5537_v12 = vpop.eup %5536 }
0x2dcc   :  { %4421 = vrot.lane.b32.xlu0 %v5537_v12, %s5730_s22 }
0x2dcd   :  { %v5539_v8 = vpop.eup %5538 }
0x2dce   :  { %v4415_v13 = vadd.f32 1.0, %v5539_v8 }
0x2dd0   :  { %5540 = vrcp.f32 %v4415_v13 }
0x2dda   :  { %v5541_v16 = vpop.eup %5540 }
0x2ddb   :  { %v4419_v52 = vmul.f32 %v5541_v16, %v6513_v29 }
0x2e3e   :  { %v4422_v31 = vpop.permute.xlu0 %4421 }
0x2e3f   :  { %v4424_v10 = vmul.f32 %v5541_v16, %v4422_v31 }
0x2e41   :  { %4426 = vrot.lane.b32.xlu1 %v4424_v10, %s5719_s26 }
0x2e45   :  { %4441 = vrot.lane.b32.xlu1 %v4648_v40, %s5732_s2 }
0x2eb3   :  { %v4427_v30 = vpop.permute.xlu1 %4426 }
0x2eb4   :  { %v4429_v14 = vadd.f32 %v4427_v30, %v4419_v52 }
0x2eb6   :  { %5542 = vtanh.f32 %v4429_v14 }
0x2eb7   :  { %v4442_v45 = vpop.permute.xlu1 %4441 }
0x2ec0   :  { %v5543_v20 = vpop.eup %5542 }
0x2ec1   :  { %4432 = vrot.lane.b32.xlu0 %v5543_v20, %s5727_s7  ;;  %s5733_s7 = smov [#allocation13]  }
0x2ec2   :  { %s4545_s22 = sshll.u32 %s5733_s7, 4  ;;  %s4546_s22 = int_to_ptr.vmem [resolvable:$true] %s4545_s22 }
0x2ec3   :  { %s5681_s15 = scalar_lea.vmem %s4546_s22, 32  ;;  %p5686_p7 = scmp.lt.s32.totalorder %s4546_s22, %s4546_s22 }
0x2ec4   :  { %p5682_p6 = scmp.ne.s32.totalorder %s4546_s22, %s5681_s15  ;;  %p5687_p8 = scmp.lt.s32.totalorder %s5681_s15, %s5681_s15 }
0x2ec5   :  { %4450 = vrot.lane.b32.xlu0 %v4649_v19, %s5732_s2 }
0x2ec6   :  { %p5688_p9 = por %p5687_p8, %p5686_p7 }
0x2ec8   :  { %p5689_p10 = pnand %p5688_p9, %p5682_p6 }
0x2f33   :  { %v4433_v51 = vpop.permute.xlu0 %4432 }
0x2f34   :  { %v4435_v21 = vmul.f32 %v5541_v16, %v4433_v51 }
0x2f36   :  { %v4444_v2 = vmul.f32 %v4442_v45, %v4435_v21 }
0x2f37   :  { %v4451_v24 = vpop.permute.xlu0 %4450 }
0x2f38   :  { %v4453_v25 = vadd.f32 %v4451_v24, %v4444_v2 }
0x2f3a   :  { %4463 = vrot.lane.b32.xlu1 %v4453_v25, %s5731_s23 }
0x2fac   :  { %v4464_v49 = vpop.permute.xlu1 %4463 }
0x2fad   :  { %5185 = vmatmul.mubr.msk.f32.vlgmr.msra.gmra.mrb[34].mxu1 %vm554_vm5, %v4464_v49 }
0x3080   :  { %v4533_v28 = vpop.f32.mrb[34].mxu1 }
0x3081   :  { %v4534_v5 = vadd.f32 %v4650_v54, %v4533_v28  ;;  %v5186_v3 = vpop.f32.mrb[35].mxu1 }
0x3083   :  { %4538 = vst.msk [vmem:[#allocation13] sm:$0x3] %vm4537_vm6, %v4534_v5 }
0x3084   :  { %5692 = shalt.err (!%p5689_p10)
}
0x3085   :  { %s5693_s25 = scalar_lea.hbm %s6586_s18, 32 }
0x3086   :  { %p5694_p11 = scmp.ne.s32.totalorder %s6586_s18, %s5693_s25  ;;  %p5697_p12 = scmp.lt.u32.totalorder %s5693_s25, %s6586_s18 }
0x3088   :  { %p5699_p13 = pnand %p5697_p12, %p5694_p11 }
0x308a   :  { %5702 = shalt.err (!%p5699_p13)
}
0x308b   :  { %4548 = dma.vmem_to_hbm [thread:$0]  %s4546_s22, 32, %s6586_s18, [#allocation4]  }
0x308c   :  { %5711 = dma.done.wait [#allocation4], 32  }
0x308d   :  { %5712 = vsyncadd [#allocation4], 4294967264 }
0x308e   :  { %4552 = vsyncpa [#allocation3], 1 }
0x308f   :  { %4553 = vsyncpa [#allocation6], 1 }
0x3090   :  { %4554 = vsyncpa [#allocation9], 1 }
0x3091   :  { %4555 = vsyncpa [#allocation12], 1 }
0x3092   :  { %4556 = vsyncpa [#allocation4], 1 }

</bundles_post_ra>
